<compile_context>
chip_gen: v7x
topology: tpu7x:2x2x1
jax: 0.10.0
libtpu: 0.0.40
codegen_flags: <defaults>
</compile_context>

<pallas_src>
import functools
import math

import jax
import jax.numpy as jnp
import numpy as np
from jax.experimental import pallas as pl
from jax.experimental.pallas import tpu as pltpu

LANE = 128  # every channel dimension padded to the TPU lane width


def _round_up(v, m):
    return ((v + m - 1) // m) * m


# ----------------------------------------------------------------------------
# Fused Pallas kernel: backbone convs + Detect head + box decode (per image).
# ----------------------------------------------------------------------------
def _yolo_fused_kernel(x_ref, t1_ref, w1_ref, b1_ref, t2_ref, w2_ref, b2_ref,
                       w3_ref, b3_ref, ga_ref, am_ref, xym_ref, whm_ref,
                       head_ref, z_ref, *, det_stride):
    f32 = jnp.float32
    bf16 = jnp.bfloat16

    def conv3x3_silu(t_ref, w_ref, b_ref, act):
        # Sum over the 9 taps: (constant 0/1 gather matmul) @ W_tap, f32 accum.
        rows = t_ref.shape[1]
        acc = jnp.zeros((rows, LANE), f32)
        for t in range(t_ref.shape[0]):            # static unroll (9 taps)
            patches = jnp.dot(t_ref[t], act,
                              preferred_element_type=f32).astype(bf16)
            acc = acc + jnp.dot(patches, w_ref[t], preferred_element_type=f32)
        acc = acc + b_ref[...]                      # bias (BN folded), f32
        return (acc * jax.nn.sigmoid(acc)).astype(bf16)   # fused SiLU

    x = x_ref[0]                                    # (384, 128) bf16
    h1 = conv3x3_silu(t1_ref, w1_ref, b1_ref, x)    # (64, 128)  8x8 feature map
    h2 = conv3x3_silu(t2_ref, w2_ref, b2_ref, h1)   # (16, 128)  4x4 feature map

    # 1x1 Detect head + sigmoid (padded channels are inert: w/b padding is 0).
    logits = jnp.dot(h2, w3_ref[...], preferred_element_type=f32) + b3_ref[...]
    p = jax.nn.sigmoid(logits)                      # (16, 128) f32

    # Fused YOLOv5 decode — purely elementwise with constant per-channel masks
    # (xy channels get grid offsets, wh channels get anchor scaling).
    xym = xym_ref[...]
    whm = whm_ref[...]
    xy = (p * 2.0 - 0.5 + ga_ref[...]) * det_stride
    wh = (p * p * 4.0) * am_ref[...]
    z = xym * xy + whm * wh + (1.0 - xym - whm) * p

    head_ref[0] = p                                 # raw (sigmoided) head
    z_ref[0] = z                                    # decoded predictions


# ----------------------------------------------------------------------------
# Wrapper: boundary layout transform -> fused kernel -> tiny output reshapes.
# ----------------------------------------------------------------------------
def _fused_forward(params, im_nchw, *, na, no, ny, nx, det_stride):
    b = im_nchw.shape[0]
    cin = im_nchw.shape[1]

    # One boundary transform: NCHW -> NHWC, zero-pad spatial (+1) and channels
    # (-> 128 lanes), flatten the padded spatial grid, pad rows to 128-multiple.
    x = jnp.transpose(im_nchw, (0, 2, 3, 1))
    x = jnp.pad(x, ((0, 0), (1, 1), (1, 1), (0, LANE - cin)))
    hp, wp = x.shape[1], x.shape[2]
    k1 = _round_up(hp * wp, LANE)
    x = x.reshape(b, hp * wp, LANE)
    x = jnp.pad(x, ((0, 0), (0, k1 - hp * wp), (0, 0))).astype(jnp.bfloat16)

    t1, w1, b1 = params["t1"], params["w1"], params["b1"]
    t2, w2, b2 = params["t2"], params["w2"], params["b2"]
    w3, b3 = params["w3"], params["b3"]
    ga, am = params["grid_add"], params["anchor_mul"]
    xym, whm = params["xy_mask"], params["wh_mask"]
    assert t1.shape[2] == k1, "input spatial size does not match the built net"

    operands = (x, t1, w1, b1, t2, w2, b2, w3, b3, ga, am, xym, whm)

    def _const_spec(a):
        zeros = (0,) * a.ndim
        return pl.BlockSpec(a.shape, lambda i, _z=zeros: _z)

    in_specs = [pl.BlockSpec((1, k1, LANE), lambda i: (i, 0, 0))]
    in_specs += [_const_spec(a) for a in operands[1:]]

    cells = ny * nx
    out_shape = (jax.ShapeDtypeStruct((b, cells, LANE), jnp.float32),
                 jax.ShapeDtypeStruct((b, cells, LANE), jnp.float32))
    out_specs = [pl.BlockSpec((1, cells, LANE), lambda i: (i, 0, 0)),
                 pl.BlockSpec((1, cells, LANE), lambda i: (i, 0, 0))]

    r1 = t1.shape[1]
    flops = b * (t1.shape[0] * 2 * r1 * LANE * (t1.shape[2] + LANE)
                 + t2.shape[0] * 2 * cells * LANE * (t2.shape[2] + LANE)
                 + 2 * cells * LANE * LANE)
    transcendentals = b * (r1 + 2 * cells) * LANE
    bytes_accessed = (sum(int(np.prod(a.shape)) * a.dtype.itemsize
                          for a in operands)
                      + 2 * b * cells * LANE * 4)

    head, z = pl.pallas_call(
        functools.partial(_yolo_fused_kernel, det_stride=float(det_stride)),
        out_shape=out_shape,
        grid_spec=pltpu.PrefetchScalarGridSpec(
            num_scalar_prefetch=0,
            grid=(b,),
            in_specs=in_specs,
            out_specs=out_specs,
        ),
        compiler_params=pltpu.CompilerParams(
            dimension_semantics=("parallel",)),   # b=2 programs -> 2 TCs on v7x
        cost_estimate=pl.CostEstimate(
            flops=flops, transcendentals=transcendentals,
            bytes_accessed=bytes_accessed),
    )(*operands)

    # Tiny (<4 KB) layout fix-ups outside the hot path: strip the 128-lane
    # padding and emit the module's expected (z, y) layouts.
    nch = na * no
    y = head[:, :, :nch].reshape(b, ny, nx, na, no).transpose(0, 3, 1, 2, 4)
    z = (z[:, :, :nch].reshape(b, cells, na, no)
         .transpose(0, 2, 1, 3).reshape(b, na * cells, no))
    return z, y


# ----------------------------------------------------------------------------
# Pure-JAX reference (lax.conv) mirroring the kernel's bf16 casts — parity only.
# ----------------------------------------------------------------------------
def _reference_forward(ref, im, *, na, no, det_stride):
    f32 = jnp.float32
    x = jnp.transpose(im, (0, 2, 3, 1)).astype(jnp.bfloat16).astype(f32)

    def conv(x, w_oihw, bias, stride, pad, act):
        w_hwio = jnp.transpose(w_oihw, (2, 3, 1, 0))
        y = jax.lax.conv_general_dilated(
            x, w_hwio, (stride, stride), ((pad, pad), (pad, pad)),
            dimension_numbers=("NHWC", "HWIO", "NHWC"),
            precision=jax.lax.Precision.HIGHEST)
        y = y + bias
        if act == "silu":
            return y * jax.nn.sigmoid(y)
        return jax.nn.sigmoid(y)

    h = conv(x, ref["w1"], ref["b1"], 2, 1, "silu").astype(jnp.bfloat16).astype(f32)
    h = conv(h, ref["w2"], ref["b2"], 2, 1, "silu").astype(jnp.bfloat16).astype(f32)
    p = conv(h, ref["w3"], ref["b3"], 1, 0, "sigmoid")

    b, ny, nx, _ = p.shape
    y = p.reshape(b, ny, nx, na, no).transpose(0, 3, 1, 2, 4)
    gy, gx = jnp.meshgrid(jnp.arange(ny, dtype=f32), jnp.arange(nx, dtype=f32),
                          indexing="ij")
    grid = jnp.stack((gx, gy), axis=-1)[None, None]
    anchor_grid = ref["anchors"][None, :, None, None, :]
    xy = (y[..., 0:2] * 2.0 - 0.5 + grid) * float(det_stride)
    wh = (y[..., 2:4] * 2.0) ** 2 * anchor_grid
    z = jnp.concatenate((xy, wh, y[..., 4:]), axis=-1).reshape(b, -1, no)
    return z, y


# ----------------------------------------------------------------------------
# DetectMultiBackend stand-in (pt backend, jit=False)
# ----------------------------------------------------------------------------
class DetectMultiBackendPallas:
    """JAX/Pallas stand-in for DetectMultiBackend (pt backend).

    forward(im) -> (pred, [raw_head_output])   (YOLOv5 Detect inference output)
    forward(im, val=True) -> (out, train_out)  as in the PyTorch wrapper.
    """

    def __init__(self, nc=2, na=3, imgsz=16):
        self.pt = True
        self.jit = False
        self.stride = 4            # overall downsample of the tiny backbone
        self.nc = nc
        self.na = na
        self.no = nc + 5
        self.names = [f"class{i}" for i in range(nc)]
        self.imgsz = imgsz
        self.ny = self.nx = imgsz // self.stride

        key = jax.random.PRNGKey(0)
        kw1, kb1, kw2, kb2, kw3, kb3 = jax.random.split(key, 6)

        c_in, c1, c2 = 3, 8, 16
        cout_head = self.na * self.no
        anchors = np.array([[10.0, 13.0], [16.0, 30.0], [33.0, 23.0]], np.float32)

        w1_oihw, b1v = self._init_conv(kw1, kb1, c1, c_in, 3)
        w2_oihw, b2v = self._init_conv(kw2, kb2, c2, c1, 3)
        w3_oihw, b3v = self._init_conv(kw3, kb3, cout_head, c2, 1)

        hp = imgsz + 2             # layer-1 spatial after pad=1
        s1 = imgsz // 2            # layer-1 output spatial (stride 2)
        k1cols = _round_up(hp * hp, LANE)

        params = dict(
            # constant 0/1 patch-gather matrices (bf16, exact)
            t1=self._gather_mats(hp, hp, s1, s1, 3, 2, off=0, cols=k1cols),
            t2=self._gather_mats(s1, s1, self.ny, self.nx, 3, 2, off=-1),
            # weights as per-tap (Cin_pad=128, Cout_pad=128) bf16 matrices
            w1=self._pack_taps(w1_oihw), b1=self._pack_bias(b1v),
            w2=self._pack_taps(w2_oihw), b2=self._pack_bias(b2v),
            w3=self._pack_taps(w3_oihw)[0], b3=self._pack_bias(b3v),
        )
        params.update(self._decode_consts(anchors))
        self.params = params

        # bf16-rounded f32 copies for the pure-JAX parity reference.
        rnd = lambda a: jnp.asarray(a, jnp.bfloat16).astype(jnp.float32)
        self.ref_params = dict(w1=rnd(w1_oihw), b1=jnp.asarray(b1v),
                               w2=rnd(w2_oihw), b2=jnp.asarray(b2v),
                               w3=rnd(w3_oihw), b3=jnp.asarray(b3v),
                               anchors=jnp.asarray(anchors))

        self._forward_jit = jax.jit(functools.partial(
            _fused_forward, na=self.na, no=self.no, ny=self.ny, nx=self.nx,
            det_stride=self.stride))

    # ---- parameter builders -------------------------------------------------
    @staticmethod
    def _init_conv(kw, kb, cout, cin, k):
        fan_in = cin * k * k
        w = np.asarray(jax.random.normal(kw, (cout, cin, k, k), jnp.float32))
        w = (w / math.sqrt(fan_in)).astype(np.float32)
        b = (0.01 * np.asarray(jax.random.normal(kb, (cout,), jnp.float32))
             ).astype(np.float32)
        return w, b

    @staticmethod
    def _pack_taps(w_oihw):
        cout, cin, kh, kw = w_oihw.shape
        taps = np.zeros((kh * kw, LANE, LANE), np.float32)
        for ky in range(kh):
            for kx in range(kw):
                taps[ky * kw + kx, :cin, :cout] = w_oihw[:, :, ky, kx].T
        return jnp.asarray(taps, jnp.bfloat16)

    @staticmethod
    def _pack_bias(b):
        out = np.zeros((1, LANE), np.float32)
        out[0, :b.shape[0]] = b
        return jnp.asarray(out)

    @staticmethod
    def _gather_mats(in_h, in_w, out_h, out_w, k, stride, off, cols=None):
        """T[tap] @ flat_input == im2col column for that tap (0/1 constants)."""
        cols_real = in_h * in_w
        cols = cols_real if cols is None else cols
        mats = np.zeros((k * k, out_h * out_w, cols), np.float32)
        for ky in range(k):
            for kx in range(k):
                t = ky * k + kx
                for ho in range(out_h):
                    for wo in range(out_w):
                        r = stride * ho + ky + off
                        c = stride * wo + kx + off
                        if 0 <= r < in_h and 0 <= c < in_w:
                            mats[t, ho * out_w + wo, r * in_w + c] = 1.0
        return jnp.asarray(mats, jnp.bfloat16)

    def _decode_consts(self, anchors):
        cells = self.ny * self.nx
        ga = np.zeros((cells, LANE), np.float32)
        am = np.zeros((1, LANE), np.float32)
        xym = np.zeros((1, LANE), np.float32)
        whm = np.zeros((1, LANE), np.float32)
        o = np.arange(cells)
        for a in range(self.na):
            base = a * self.no
            ga[:, base + 0] = o % self.nx            # gx
            ga[:, base + 1] = o // self.nx           # gy
            am[0, base + 2] = anchors[a, 0]
            am[0, base + 3] = anchors[a, 1]
            xym[0, base + 0] = xym[0, base + 1] = 1.0
            whm[0, base + 2] = whm[0, base + 3] = 1.0
        return dict(grid_add=jnp.asarray(ga), anchor_mul=jnp.asarray(am),
                    xy_mask=jnp.asarray(xym), wh_mask=jnp.asarray(whm))

    # ---- forward ------------------------------------------------------------
    def forward(self, im, augment=False, visualize=False, val=False):
        b, ch, h, w = im.shape
        if not self.pt:
            # TODO(synk): onnx/tflite/pb/coreml backend dispatch is not
            # translatable in-script; only the .pt path is implemented.
            raise NotImplementedError("only the .pt backend path is implemented")
        z, y = self._forward_jit(self.params, im)
        if val:
            # TODO(synk): multi-head (FTInfer) val unpacking not exercised;
            # single-head case mirrors the (out, train_out) split.
            return [z], [y]
        return z, [y]

    __call__ = forward


# ----------------------------------------------------------------------------
if __name__ == "__main__":
    model = DetectMultiBackendPallas(nc=2, na=3, imgsz=16)

    key = jax.random.PRNGKey(0)
    im = jax.random.normal(key, (2, 3, 16, 16), jnp.float32)  # NCHW like PyTorch

    pred, train_out = model(im)
    pred = jax.block_until_ready(pred)
    train_out = [jax.block_until_ready(t) for t in train_out]

    assert pred.shape == (2, 3 * 4 * 4, 7), pred.shape
    assert train_out[0].shape == (2, 3, 4, 4, 7), train_out[0].shape
    assert bool(jnp.all(jnp.isfinite(pred)))

    # Parity vs a pure-JAX lax.conv reference (same bf16-rounded weights/casts).
    z_ref, y_ref = _reference_forward(model.ref_params, im, na=model.na,
                                      no=model.no, det_stride=model.stride)
    np.testing.assert_allclose(np.asarray(pred), np.asarray(z_ref),
                               rtol=2e-2, atol=2e-2)
    np.testing.assert_allclose(np.asarray(train_out[0]), np.asarray(y_ref),
                               rtol=2e-2, atol=2e-2)

    print("KERNEL_OK")
</pallas_src>

<mosaic_0001>
module attributes {stable_mosaic.version = 11 : i64} {
  func.func @_yolo_fused_kernel(%arg0: i32, %arg1: memref<1x384x128xbf16, #tpu.memory_space<vmem>>, %arg2: memref<9x64x384xbf16, #tpu.memory_space<vmem>>, %arg3: memref<9x128x128xbf16, #tpu.memory_space<vmem>>, %arg4: memref<1x128xf32, #tpu.memory_space<vmem>>, %arg5: memref<9x16x64xbf16, #tpu.memory_space<vmem>>, %arg6: memref<9x128x128xbf16, #tpu.memory_space<vmem>>, %arg7: memref<1x128xf32, #tpu.memory_space<vmem>>, %arg8: memref<128x128xbf16, #tpu.memory_space<vmem>>, %arg9: memref<1x128xf32, #tpu.memory_space<vmem>>, %arg10: memref<16x128xf32, #tpu.memory_space<vmem>>, %arg11: memref<1x128xf32, #tpu.memory_space<vmem>>, %arg12: memref<1x128xf32, #tpu.memory_space<vmem>>, %arg13: memref<1x128xf32, #tpu.memory_space<vmem>>, %arg14: memref<1x16x128xf32, #tpu.memory_space<vmem>>, %arg15: memref<1x16x128xf32, #tpu.memory_space<vmem>>) attributes {dimension_semantics = [#tpu.dimension_semantics<parallel>], iteration_bounds = array<i64: 2>, scalar_prefetch = 0 : i64, scratch_operands = 0 : i64, tpu.core_type = #tpu.core_type<tc>, window_params = [{transform_indices = @transform_0, window_bounds = array<i64: 1, 384, 128>}, {pipeline_mode = #tpu.pipeline_mode<synchronous>, transform_indices = @transform_1, window_bounds = array<i64: 9, 64, 384>}, {pipeline_mode = #tpu.pipeline_mode<synchronous>, transform_indices = @transform_2, window_bounds = array<i64: 9, 128, 128>}, {pipeline_mode = #tpu.pipeline_mode<synchronous>, transform_indices = @transform_3, window_bounds = array<i64: 1, 128>}, {pipeline_mode = #tpu.pipeline_mode<synchronous>, transform_indices = @transform_4, window_bounds = array<i64: 9, 16, 64>}, {pipeline_mode = #tpu.pipeline_mode<synchronous>, transform_indices = @transform_5, window_bounds = array<i64: 9, 128, 128>}, {pipeline_mode = #tpu.pipeline_mode<synchronous>, transform_indices = @transform_6, window_bounds = array<i64: 1, 128>}, {pipeline_mode = #tpu.pipeline_mode<synchronous>, transform_indices = @transform_7, window_bounds = array<i64: 128, 128>}, {pipeline_mode = #tpu.pipeline_mode<synchronous>, transform_indices = @transform_8, window_bounds = array<i64: 1, 128>}, {pipeline_mode = #tpu.pipeline_mode<synchronous>, transform_indices = @transform_9, window_bounds = array<i64: 16, 128>}, {pipeline_mode = #tpu.pipeline_mode<synchronous>, transform_indices = @transform_10, window_bounds = array<i64: 1, 128>}, {pipeline_mode = #tpu.pipeline_mode<synchronous>, transform_indices = @transform_11, window_bounds = array<i64: 1, 128>}, {pipeline_mode = #tpu.pipeline_mode<synchronous>, transform_indices = @transform_12, window_bounds = array<i64: 1, 128>}, {transform_indices = @transform_13, window_bounds = array<i64: 1, 16, 128>}, {transform_indices = @transform_14, window_bounds = array<i64: 1, 16, 128>}]} {
    %c0 = arith.constant 0 : index
    %c0_0 = arith.constant 0 : index
    %c0_1 = arith.constant 0 : index
    %0 = vector.load %arg1[%c0, %c0_0, %c0_1] : memref<1x384x128xbf16, #tpu.memory_space<vmem>>, vector<1x384x128xbf16>
    %1 = vector.shape_cast %0 : vector<1x384x128xbf16> to vector<384x128xbf16>
    %cst = arith.constant 0.000000e+00 : f32
    %2 = vector.broadcast %cst : f32 to vector<64x128xf32>
    %c0_2 = arith.constant 0 : index
    %c0_3 = arith.constant 0 : index
    %c0_4 = arith.constant 0 : index
    %3 = vector.load %arg2[%c0_2, %c0_3, %c0_4] : memref<9x64x384xbf16, #tpu.memory_space<vmem>>, vector<1x64x384xbf16>
    %4 = vector.shape_cast %3 : vector<1x64x384xbf16> to vector<64x384xbf16>
    %cst_5 = arith.constant dense<0.000000e+00> : vector<64x128xf32>
    %5 = tpu.matmul %4, %1, %cst_5 {dimension_numbers = #tpu.dot_dimension_numbers<[1], [0], [0], [1], [0, 0, 1, 1], [], []>} : vector<64x384xbf16>, vector<384x128xbf16>, vector<64x128xf32> -> vector<64x128xf32>
    %6 = arith.truncf %5 : vector<64x128xf32> to vector<64x128xbf16>
    %c0_6 = arith.constant 0 : index
    %c0_7 = arith.constant 0 : index
    %c0_8 = arith.constant 0 : index
    %7 = vector.load %arg3[%c0_6, %c0_7, %c0_8] : memref<9x128x128xbf16, #tpu.memory_space<vmem>>, vector<1x128x128xbf16>
    %8 = vector.shape_cast %7 : vector<1x128x128xbf16> to vector<128x128xbf16>
    %cst_9 = arith.constant dense<0.000000e+00> : vector<64x128xf32>
    %9 = tpu.matmul %6, %8, %cst_9 {dimension_numbers = #tpu.dot_dimension_numbers<[1], [0], [0], [1], [0, 0, 1, 1], [], []>} : vector<64x128xbf16>, vector<128x128xbf16>, vector<64x128xf32> -> vector<64x128xf32>
    %10 = arith.addf %2, %9 : vector<64x128xf32>
    %c1 = arith.constant 1 : index
    %c0_10 = arith.constant 0 : index
    %c0_11 = arith.constant 0 : index
    %11 = vector.load %arg2[%c1, %c0_10, %c0_11] : memref<9x64x384xbf16, #tpu.memory_space<vmem>>, vector<1x64x384xbf16>
    %12 = vector.shape_cast %11 : vector<1x64x384xbf16> to vector<64x384xbf16>
    %cst_12 = arith.constant dense<0.000000e+00> : vector<64x128xf32>
    %13 = tpu.matmul %12, %1, %cst_12 {dimension_numbers = #tpu.dot_dimension_numbers<[1], [0], [0], [1], [0, 0, 1, 1], [], []>} : vector<64x384xbf16>, vector<384x128xbf16>, vector<64x128xf32> -> vector<64x128xf32>
    %14 = arith.truncf %13 : vector<64x128xf32> to vector<64x128xbf16>
    %c1_13 = arith.constant 1 : index
    %c0_14 = arith.constant 0 : index
    %c0_15 = arith.constant 0 : index
    %15 = vector.load %arg3[%c1_13, %c0_14, %c0_15] : memref<9x128x128xbf16, #tpu.memory_space<vmem>>, vector<1x128x128xbf16>
    %16 = vector.shape_cast %15 : vector<1x128x128xbf16> to vector<128x128xbf16>
    %cst_16 = arith.constant dense<0.000000e+00> : vector<64x128xf32>
    %17 = tpu.matmul %14, %16, %cst_16 {dimension_numbers = #tpu.dot_dimension_numbers<[1], [0], [0], [1], [0, 0, 1, 1], [], []>} : vector<64x128xbf16>, vector<128x128xbf16>, vector<64x128xf32> -> vector<64x128xf32>
    %18 = arith.addf %10, %17 : vector<64x128xf32>
    %c2 = arith.constant 2 : index
    %c0_17 = arith.constant 0 : index
    %c0_18 = arith.constant 0 : index
    %19 = vector.load %arg2[%c2, %c0_17, %c0_18] : memref<9x64x384xbf16, #tpu.memory_space<vmem>>, vector<1x64x384xbf16>
    %20 = vector.shape_cast %19 : vector<1x64x384xbf16> to vector<64x384xbf16>
    %cst_19 = arith.constant dense<0.000000e+00> : vector<64x128xf32>
    %21 = tpu.matmul %20, %1, %cst_19 {dimension_numbers = #tpu.dot_dimension_numbers<[1], [0], [0], [1], [0, 0, 1, 1], [], []>} : vector<64x384xbf16>, vector<384x128xbf16>, vector<64x128xf32> -> vector<64x128xf32>
    %22 = arith.truncf %21 : vector<64x128xf32> to vector<64x128xbf16>
    %c2_20 = arith.constant 2 : index
    %c0_21 = arith.constant 0 : index
    %c0_22 = arith.constant 0 : index
    %23 = vector.load %arg3[%c2_20, %c0_21, %c0_22] : memref<9x128x128xbf16, #tpu.memory_space<vmem>>, vector<1x128x128xbf16>
    %24 = vector.shape_cast %23 : vector<1x128x128xbf16> to vector<128x128xbf16>
    %cst_23 = arith.constant dense<0.000000e+00> : vector<64x128xf32>
    %25 = tpu.matmul %22, %24, %cst_23 {dimension_numbers = #tpu.dot_dimension_numbers<[1], [0], [0], [1], [0, 0, 1, 1], [], []>} : vector<64x128xbf16>, vector<128x128xbf16>, vector<64x128xf32> -> vector<64x128xf32>
    %26 = arith.addf %18, %25 : vector<64x128xf32>
    %c3 = arith.constant 3 : index
    %c0_24 = arith.constant 0 : index
    %c0_25 = arith.constant 0 : index
    %27 = vector.load %arg2[%c3, %c0_24, %c0_25] : memref<9x64x384xbf16, #tpu.memory_space<vmem>>, vector<1x64x384xbf16>
    %28 = vector.shape_cast %27 : vector<1x64x384xbf16> to vector<64x384xbf16>
    %cst_26 = arith.constant dense<0.000000e+00> : vector<64x128xf32>
    %29 = tpu.matmul %28, %1, %cst_26 {dimension_numbers = #tpu.dot_dimension_numbers<[1], [0], [0], [1], [0, 0, 1, 1], [], []>} : vector<64x384xbf16>, vector<384x128xbf16>, vector<64x128xf32> -> vector<64x128xf32>
    %30 = arith.truncf %29 : vector<64x128xf32> to vector<64x128xbf16>
    %c3_27 = arith.constant 3 : index
    %c0_28 = arith.constant 0 : index
    %c0_29 = arith.constant 0 : index
    %31 = vector.load %arg3[%c3_27, %c0_28, %c0_29] : memref<9x128x128xbf16, #tpu.memory_space<vmem>>, vector<1x128x128xbf16>
    %32 = vector.shape_cast %31 : vector<1x128x128xbf16> to vector<128x128xbf16>
    %cst_30 = arith.constant dense<0.000000e+00> : vector<64x128xf32>
    %33 = tpu.matmul %30, %32, %cst_30 {dimension_numbers = #tpu.dot_dimension_numbers<[1], [0], [0], [1], [0, 0, 1, 1], [], []>} : vector<64x128xbf16>, vector<128x128xbf16>, vector<64x128xf32> -> vector<64x128xf32>
    %34 = arith.addf %26, %33 : vector<64x128xf32>
    %c4 = arith.constant 4 : index
    %c0_31 = arith.constant 0 : index
    %c0_32 = arith.constant 0 : index
    %35 = vector.load %arg2[%c4, %c0_31, %c0_32] : memref<9x64x384xbf16, #tpu.memory_space<vmem>>, vector<1x64x384xbf16>
    %36 = vector.shape_cast %35 : vector<1x64x384xbf16> to vector<64x384xbf16>
    %cst_33 = arith.constant dense<0.000000e+00> : vector<64x128xf32>
    %37 = tpu.matmul %36, %1, %cst_33 {dimension_numbers = #tpu.dot_dimension_numbers<[1], [0], [0], [1], [0, 0, 1, 1], [], []>} : vector<64x384xbf16>, vector<384x128xbf16>, vector<64x128xf32> -> vector<64x128xf32>
    %38 = arith.truncf %37 : vector<64x128xf32> to vector<64x128xbf16>
    %c4_34 = arith.constant 4 : index
    %c0_35 = arith.constant 0 : index
    %c0_36 = arith.constant 0 : index
    %39 = vector.load %arg3[%c4_34, %c0_35, %c0_36] : memref<9x128x128xbf16, #tpu.memory_space<vmem>>, vector<1x128x128xbf16>
    %40 = vector.shape_cast %39 : vector<1x128x128xbf16> to vector<128x128xbf16>
    %cst_37 = arith.constant dense<0.000000e+00> : vector<64x128xf32>
    %41 = tpu.matmul %38, %40, %cst_37 {dimension_numbers = #tpu.dot_dimension_numbers<[1], [0], [0], [1], [0, 0, 1, 1], [], []>} : vector<64x128xbf16>, vector<128x128xbf16>, vector<64x128xf32> -> vector<64x128xf32>
    %42 = arith.addf %34, %41 : vector<64x128xf32>
    %c5 = arith.constant 5 : index
    %c0_38 = arith.constant 0 : index
    %c0_39 = arith.constant 0 : index
    %43 = vector.load %arg2[%c5, %c0_38, %c0_39] : memref<9x64x384xbf16, #tpu.memory_space<vmem>>, vector<1x64x384xbf16>
    %44 = vector.shape_cast %43 : vector<1x64x384xbf16> to vector<64x384xbf16>
    %cst_40 = arith.constant dense<0.000000e+00> : vector<64x128xf32>
    %45 = tpu.matmul %44, %1, %cst_40 {dimension_numbers = #tpu.dot_dimension_numbers<[1], [0], [0], [1], [0, 0, 1, 1], [], []>} : vector<64x384xbf16>, vector<384x128xbf16>, vector<64x128xf32> -> vector<64x128xf32>
    %46 = arith.truncf %45 : vector<64x128xf32> to vector<64x128xbf16>
    %c5_41 = arith.constant 5 : index
    %c0_42 = arith.constant 0 : index
    %c0_43 = arith.constant 0 : index
    %47 = vector.load %arg3[%c5_41, %c0_42, %c0_43] : memref<9x128x128xbf16, #tpu.memory_space<vmem>>, vector<1x128x128xbf16>
    %48 = vector.shape_cast %47 : vector<1x128x128xbf16> to vector<128x128xbf16>
    %cst_44 = arith.constant dense<0.000000e+00> : vector<64x128xf32>
    %49 = tpu.matmul %46, %48, %cst_44 {dimension_numbers = #tpu.dot_dimension_numbers<[1], [0], [0], [1], [0, 0, 1, 1], [], []>} : vector<64x128xbf16>, vector<128x128xbf16>, vector<64x128xf32> -> vector<64x128xf32>
    %50 = arith.addf %42, %49 : vector<64x128xf32>
    %c6 = arith.constant 6 : index
    %c0_45 = arith.constant 0 : index
    %c0_46 = arith.constant 0 : index
    %51 = vector.load %arg2[%c6, %c0_45, %c0_46] : memref<9x64x384xbf16, #tpu.memory_space<vmem>>, vector<1x64x384xbf16>
    %52 = vector.shape_cast %51 : vector<1x64x384xbf16> to vector<64x384xbf16>
    %cst_47 = arith.constant dense<0.000000e+00> : vector<64x128xf32>
    %53 = tpu.matmul %52, %1, %cst_47 {dimension_numbers = #tpu.dot_dimension_numbers<[1], [0], [0], [1], [0, 0, 1, 1], [], []>} : vector<64x384xbf16>, vector<384x128xbf16>, vector<64x128xf32> -> vector<64x128xf32>
    %54 = arith.truncf %53 : vector<64x128xf32> to vector<64x128xbf16>
    %c6_48 = arith.constant 6 : index
    %c0_49 = arith.constant 0 : index
    %c0_50 = arith.constant 0 : index
    %55 = vector.load %arg3[%c6_48, %c0_49, %c0_50] : memref<9x128x128xbf16, #tpu.memory_space<vmem>>, vector<1x128x128xbf16>
    %56 = vector.shape_cast %55 : vector<1x128x128xbf16> to vector<128x128xbf16>
    %cst_51 = arith.constant dense<0.000000e+00> : vector<64x128xf32>
    %57 = tpu.matmul %54, %56, %cst_51 {dimension_numbers = #tpu.dot_dimension_numbers<[1], [0], [0], [1], [0, 0, 1, 1], [], []>} : vector<64x128xbf16>, vector<128x128xbf16>, vector<64x128xf32> -> vector<64x128xf32>
    %58 = arith.addf %50, %57 : vector<64x128xf32>
    %c7 = arith.constant 7 : index
    %c0_52 = arith.constant 0 : index
    %c0_53 = arith.constant 0 : index
    %59 = vector.load %arg2[%c7, %c0_52, %c0_53] : memref<9x64x384xbf16, #tpu.memory_space<vmem>>, vector<1x64x384xbf16>
    %60 = vector.shape_cast %59 : vector<1x64x384xbf16> to vector<64x384xbf16>
    %cst_54 = arith.constant dense<0.000000e+00> : vector<64x128xf32>
    %61 = tpu.matmul %60, %1, %cst_54 {dimension_numbers = #tpu.dot_dimension_numbers<[1], [0], [0], [1], [0, 0, 1, 1], [], []>} : vector<64x384xbf16>, vector<384x128xbf16>, vector<64x128xf32> -> vector<64x128xf32>
    %62 = arith.truncf %61 : vector<64x128xf32> to vector<64x128xbf16>
    %c7_55 = arith.constant 7 : index
    %c0_56 = arith.constant 0 : index
    %c0_57 = arith.constant 0 : index
    %63 = vector.load %arg3[%c7_55, %c0_56, %c0_57] : memref<9x128x128xbf16, #tpu.memory_space<vmem>>, vector<1x128x128xbf16>
    %64 = vector.shape_cast %63 : vector<1x128x128xbf16> to vector<128x128xbf16>
    %cst_58 = arith.constant dense<0.000000e+00> : vector<64x128xf32>
    %65 = tpu.matmul %62, %64, %cst_58 {dimension_numbers = #tpu.dot_dimension_numbers<[1], [0], [0], [1], [0, 0, 1, 1], [], []>} : vector<64x128xbf16>, vector<128x128xbf16>, vector<64x128xf32> -> vector<64x128xf32>
    %66 = arith.addf %58, %65 : vector<64x128xf32>
    %c8 = arith.constant 8 : index
    %c0_59 = arith.constant 0 : index
    %c0_60 = arith.constant 0 : index
    %67 = vector.load %arg2[%c8, %c0_59, %c0_60] : memref<9x64x384xbf16, #tpu.memory_space<vmem>>, vector<1x64x384xbf16>
    %68 = vector.shape_cast %67 : vector<1x64x384xbf16> to vector<64x384xbf16>
    %cst_61 = arith.constant dense<0.000000e+00> : vector<64x128xf32>
    %69 = tpu.matmul %68, %1, %cst_61 {dimension_numbers = #tpu.dot_dimension_numbers<[1], [0], [0], [1], [0, 0, 1, 1], [], []>} : vector<64x384xbf16>, vector<384x128xbf16>, vector<64x128xf32> -> vector<64x128xf32>
    %70 = arith.truncf %69 : vector<64x128xf32> to vector<64x128xbf16>
    %c8_62 = arith.constant 8 : index
    %c0_63 = arith.constant 0 : index
    %c0_64 = arith.constant 0 : index
    %71 = vector.load %arg3[%c8_62, %c0_63, %c0_64] : memref<9x128x128xbf16, #tpu.memory_space<vmem>>, vector<1x128x128xbf16>
    %72 = vector.shape_cast %71 : vector<1x128x128xbf16> to vector<128x128xbf16>
    %cst_65 = arith.constant dense<0.000000e+00> : vector<64x128xf32>
    %73 = tpu.matmul %70, %72, %cst_65 {dimension_numbers = #tpu.dot_dimension_numbers<[1], [0], [0], [1], [0, 0, 1, 1], [], []>} : vector<64x128xbf16>, vector<128x128xbf16>, vector<64x128xf32> -> vector<64x128xf32>
    %74 = arith.addf %66, %73 : vector<64x128xf32>
    %c0_66 = arith.constant 0 : index
    %c0_67 = arith.constant 0 : index
    %75 = vector.load %arg4[%c0_66, %c0_67] : memref<1x128xf32, #tpu.memory_space<vmem>>, vector<1x128xf32>
    %76 = vector.broadcast %75 : vector<1x128xf32> to vector<64x128xf32>
    %77 = arith.addf %74, %76 : vector<64x128xf32>
    %78 = arith.negf %77 : vector<64x128xf32>
    %79 = math.exp %78 : vector<64x128xf32>
    %cst_68 = arith.constant 1.000000e+00 : f32
    %80 = vector.broadcast %cst_68 : f32 to vector<64x128xf32>
    %81 = arith.addf %80, %79 : vector<64x128xf32>
    %82 = arith.divf %80, %81 : vector<64x128xf32>
    %83 = arith.mulf %77, %82 : vector<64x128xf32>
    %84 = arith.truncf %83 : vector<64x128xf32> to vector<64x128xbf16>
    %cst_69 = arith.constant 0.000000e+00 : f32
    %85 = vector.broadcast %cst_69 : f32 to vector<16x128xf32>
    %c0_70 = arith.constant 0 : index
    %c0_71 = arith.constant 0 : index
    %c0_72 = arith.constant 0 : index
    %86 = vector.load %arg5[%c0_70, %c0_71, %c0_72] : memref<9x16x64xbf16, #tpu.memory_space<vmem>>, vector<1x16x64xbf16>
    %87 = vector.shape_cast %86 : vector<1x16x64xbf16> to vector<16x64xbf16>
    %cst_73 = arith.constant dense<0.000000e+00> : vector<16x128xf32>
    %88 = tpu.matmul %87, %84, %cst_73 {dimension_numbers = #tpu.dot_dimension_numbers<[1], [0], [0], [1], [0, 0, 1, 1], [], []>} : vector<16x64xbf16>, vector<64x128xbf16>, vector<16x128xf32> -> vector<16x128xf32>
    %89 = arith.truncf %88 : vector<16x128xf32> to vector<16x128xbf16>
    %c0_74 = arith.constant 0 : index
    %c0_75 = arith.constant 0 : index
    %c0_76 = arith.constant 0 : index
    %90 = vector.load %arg6[%c0_74, %c0_75, %c0_76] : memref<9x128x128xbf16, #tpu.memory_space<vmem>>, vector<1x128x128xbf16>
    %91 = vector.shape_cast %90 : vector<1x128x128xbf16> to vector<128x128xbf16>
    %cst_77 = arith.constant dense<0.000000e+00> : vector<16x128xf32>
    %92 = tpu.matmul %89, %91, %cst_77 {dimension_numbers = #tpu.dot_dimension_numbers<[1], [0], [0], [1], [0, 0, 1, 1], [], []>} : vector<16x128xbf16>, vector<128x128xbf16>, vector<16x128xf32> -> vector<16x128xf32>
    %93 = arith.addf %85, %92 : vector<16x128xf32>
    %c1_78 = arith.constant 1 : index
    %c0_79 = arith.constant 0 : index
    %c0_80 = arith.constant 0 : index
    %94 = vector.load %arg5[%c1_78, %c0_79, %c0_80] : memref<9x16x64xbf16, #tpu.memory_space<vmem>>, vector<1x16x64xbf16>
    %95 = vector.shape_cast %94 : vector<1x16x64xbf16> to vector<16x64xbf16>
    %cst_81 = arith.constant dense<0.000000e+00> : vector<16x128xf32>
    %96 = tpu.matmul %95, %84, %cst_81 {dimension_numbers = #tpu.dot_dimension_numbers<[1], [0], [0], [1], [0, 0, 1, 1], [], []>} : vector<16x64xbf16>, vector<64x128xbf16>, vector<16x128xf32> -> vector<16x128xf32>
    %97 = arith.truncf %96 : vector<16x128xf32> to vector<16x128xbf16>
    %c1_82 = arith.constant 1 : index
    %c0_83 = arith.constant 0 : index
    %c0_84 = arith.constant 0 : index
    %98 = vector.load %arg6[%c1_82, %c0_83, %c0_84] : memref<9x128x128xbf16, #tpu.memory_space<vmem>>, vector<1x128x128xbf16>
    %99 = vector.shape_cast %98 : vector<1x128x128xbf16> to vector<128x128xbf16>
    %cst_85 = arith.constant dense<0.000000e+00> : vector<16x128xf32>
    %100 = tpu.matmul %97, %99, %cst_85 {dimension_numbers = #tpu.dot_dimension_numbers<[1], [0], [0], [1], [0, 0, 1, 1], [], []>} : vector<16x128xbf16>, vector<128x128xbf16>, vector<16x128xf32> -> vector<16x128xf32>
    %101 = arith.addf %93, %100 : vector<16x128xf32>
    %c2_86 = arith.constant 2 : index
    %c0_87 = arith.constant 0 : index
    %c0_88 = arith.constant 0 : index
    %102 = vector.load %arg5[%c2_86, %c0_87, %c0_88] : memref<9x16x64xbf16, #tpu.memory_space<vmem>>, vector<1x16x64xbf16>
    %103 = vector.shape_cast %102 : vector<1x16x64xbf16> to vector<16x64xbf16>
    %cst_89 = arith.constant dense<0.000000e+00> : vector<16x128xf32>
    %104 = tpu.matmul %103, %84, %cst_89 {dimension_numbers = #tpu.dot_dimension_numbers<[1], [0], [0], [1], [0, 0, 1, 1], [], []>} : vector<16x64xbf16>, vector<64x128xbf16>, vector<16x128xf32> -> vector<16x128xf32>
    %105 = arith.truncf %104 : vector<16x128xf32> to vector<16x128xbf16>
    %c2_90 = arith.constant 2 : index
    %c0_91 = arith.constant 0 : index
    %c0_92 = arith.constant 0 : index
    %106 = vector.load %arg6[%c2_90, %c0_91, %c0_92] : memref<9x128x128xbf16, #tpu.memory_space<vmem>>, vector<1x128x128xbf16>
    %107 = vector.shape_cast %106 : vector<1x128x128xbf16> to vector<128x128xbf16>
    %cst_93 = arith.constant dense<0.000000e+00> : vector<16x128xf32>
    %108 = tpu.matmul %105, %107, %cst_93 {dimension_numbers = #tpu.dot_dimension_numbers<[1], [0], [0], [1], [0, 0, 1, 1], [], []>} : vector<16x128xbf16>, vector<128x128xbf16>, vector<16x128xf32> -> vector<16x128xf32>
    %109 = arith.addf %101, %108 : vector<16x128xf32>
    %c3_94 = arith.constant 3 : index
    %c0_95 = arith.constant 0 : index
    %c0_96 = arith.constant 0 : index
    %110 = vector.load %arg5[%c3_94, %c0_95, %c0_96] : memref<9x16x64xbf16, #tpu.memory_space<vmem>>, vector<1x16x64xbf16>
    %111 = vector.shape_cast %110 : vector<1x16x64xbf16> to vector<16x64xbf16>
    %cst_97 = arith.constant dense<0.000000e+00> : vector<16x128xf32>
    %112 = tpu.matmul %111, %84, %cst_97 {dimension_numbers = #tpu.dot_dimension_numbers<[1], [0], [0], [1], [0, 0, 1, 1], [], []>} : vector<16x64xbf16>, vector<64x128xbf16>, vector<16x128xf32> -> vector<16x128xf32>
    %113 = arith.truncf %112 : vector<16x128xf32> to vector<16x128xbf16>
    %c3_98 = arith.constant 3 : index
    %c0_99 = arith.constant 0 : index
    %c0_100 = arith.constant 0 : index
    %114 = vector.load %arg6[%c3_98, %c0_99, %c0_100] : memref<9x128x128xbf16, #tpu.memory_space<vmem>>, vector<1x128x128xbf16>
    %115 = vector.shape_cast %114 : vector<1x128x128xbf16> to vector<128x128xbf16>
    %cst_101 = arith.constant dense<0.000000e+00> : vector<16x128xf32>
    %116 = tpu.matmul %113, %115, %cst_101 {dimension_numbers = #tpu.dot_dimension_numbers<[1], [0], [0], [1], [0, 0, 1, 1], [], []>} : vector<16x128xbf16>, vector<128x128xbf16>, vector<16x128xf32> -> vector<16x128xf32>
    %117 = arith.addf %109, %116 : vector<16x128xf32>
    %c4_102 = arith.constant 4 : index
    %c0_103 = arith.constant 0 : index
    %c0_104 = arith.constant 0 : index
    %118 = vector.load %arg5[%c4_102, %c0_103, %c0_104] : memref<9x16x64xbf16, #tpu.memory_space<vmem>>, vector<1x16x64xbf16>
    %119 = vector.shape_cast %118 : vector<1x16x64xbf16> to vector<16x64xbf16>
    %cst_105 = arith.constant dense<0.000000e+00> : vector<16x128xf32>
    %120 = tpu.matmul %119, %84, %cst_105 {dimension_numbers = #tpu.dot_dimension_numbers<[1], [0], [0], [1], [0, 0, 1, 1], [], []>} : vector<16x64xbf16>, vector<64x128xbf16>, vector<16x128xf32> -> vector<16x128xf32>
    %121 = arith.truncf %120 : vector<16x128xf32> to vector<16x128xbf16>
    %c4_106 = arith.constant 4 : index
    %c0_107 = arith.constant 0 : index
    %c0_108 = arith.constant 0 : index
    %122 = vector.load %arg6[%c4_106, %c0_107, %c0_108] : memref<9x128x128xbf16, #tpu.memory_space<vmem>>, vector<1x128x128xbf16>
    %123 = vector.shape_cast %122 : vector<1x128x128xbf16> to vector<128x128xbf16>
    %cst_109 = arith.constant dense<0.000000e+00> : vector<16x128xf32>
    %124 = tpu.matmul %121, %123, %cst_109 {dimension_numbers = #tpu.dot_dimension_numbers<[1], [0], [0], [1], [0, 0, 1, 1], [], []>} : vector<16x128xbf16>, vector<128x128xbf16>, vector<16x128xf32> -> vector<16x128xf32>
    %125 = arith.addf %117, %124 : vector<16x128xf32>
    %c5_110 = arith.constant 5 : index
    %c0_111 = arith.constant 0 : index
    %c0_112 = arith.constant 0 : index
    %126 = vector.load %arg5[%c5_110, %c0_111, %c0_112] : memref<9x16x64xbf16, #tpu.memory_space<vmem>>, vector<1x16x64xbf16>
    %127 = vector.shape_cast %126 : vector<1x16x64xbf16> to vector<16x64xbf16>
    %cst_113 = arith.constant dense<0.000000e+00> : vector<16x128xf32>
    %128 = tpu.matmul %127, %84, %cst_113 {dimension_numbers = #tpu.dot_dimension_numbers<[1], [0], [0], [1], [0, 0, 1, 1], [], []>} : vector<16x64xbf16>, vector<64x128xbf16>, vector<16x128xf32> -> vector<16x128xf32>
    %129 = arith.truncf %128 : vector<16x128xf32> to vector<16x128xbf16>
    %c5_114 = arith.constant 5 : index
    %c0_115 = arith.constant 0 : index
    %c0_116 = arith.constant 0 : index
    %130 = vector.load %arg6[%c5_114, %c0_115, %c0_116] : memref<9x128x128xbf16, #tpu.memory_space<vmem>>, vector<1x128x128xbf16>
    %131 = vector.shape_cast %130 : vector<1x128x128xbf16> to vector<128x128xbf16>
    %cst_117 = arith.constant dense<0.000000e+00> : vector<16x128xf32>
    %132 = tpu.matmul %129, %131, %cst_117 {dimension_numbers = #tpu.dot_dimension_numbers<[1], [0], [0], [1], [0, 0, 1, 1], [], []>} : vector<16x128xbf16>, vector<128x128xbf16>, vector<16x128xf32> -> vector<16x128xf32>
    %133 = arith.addf %125, %132 : vector<16x128xf32>
    %c6_118 = arith.constant 6 : index
    %c0_119 = arith.constant 0 : index
    %c0_120 = arith.constant 0 : index
    %134 = vector.load %arg5[%c6_118, %c0_119, %c0_120] : memref<9x16x64xbf16, #tpu.memory_space<vmem>>, vector<1x16x64xbf16>
    %135 = vector.shape_cast %134 : vector<1x16x64xbf16> to vector<16x64xbf16>
    %cst_121 = arith.constant dense<0.000000e+00> : vector<16x128xf32>
    %136 = tpu.matmul %135, %84, %cst_121 {dimension_numbers = #tpu.dot_dimension_numbers<[1], [0], [0], [1], [0, 0, 1, 1], [], []>} : vector<16x64xbf16>, vector<64x128xbf16>, vector<16x128xf32> -> vector<16x128xf32>
    %137 = arith.truncf %136 : vector<16x128xf32> to vector<16x128xbf16>
    %c6_122 = arith.constant 6 : index
    %c0_123 = arith.constant 0 : index
    %c0_124 = arith.constant 0 : index
    %138 = vector.load %arg6[%c6_122, %c0_123, %c0_124] : memref<9x128x128xbf16, #tpu.memory_space<vmem>>, vector<1x128x128xbf16>
    %139 = vector.shape_cast %138 : vector<1x128x128xbf16> to vector<128x128xbf16>
    %cst_125 = arith.constant dense<0.000000e+00> : vector<16x128xf32>
    %140 = tpu.matmul %137, %139, %cst_125 {dimension_numbers = #tpu.dot_dimension_numbers<[1], [0], [0], [1], [0, 0, 1, 1], [], []>} : vector<16x128xbf16>, vector<128x128xbf16>, vector<16x128xf32> -> vector<16x128xf32>
    %141 = arith.addf %133, %140 : vector<16x128xf32>
    %c7_126 = arith.constant 7 : index
    %c0_127 = arith.constant 0 : index
    %c0_128 = arith.constant 0 : index
    %142 = vector.load %arg5[%c7_126, %c0_127, %c0_128] : memref<9x16x64xbf16, #tpu.memory_space<vmem>>, vector<1x16x64xbf16>
    %143 = vector.shape_cast %142 : vector<1x16x64xbf16> to vector<16x64xbf16>
    %cst_129 = arith.constant dense<0.000000e+00> : vector<16x128xf32>
    %144 = tpu.matmul %143, %84, %cst_129 {dimension_numbers = #tpu.dot_dimension_numbers<[1], [0], [0], [1], [0, 0, 1, 1], [], []>} : vector<16x64xbf16>, vector<64x128xbf16>, vector<16x128xf32> -> vector<16x128xf32>
    %145 = arith.truncf %144 : vector<16x128xf32> to vector<16x128xbf16>
    %c7_130 = arith.constant 7 : index
    %c0_131 = arith.constant 0 : index
    %c0_132 = arith.constant 0 : index
    %146 = vector.load %arg6[%c7_130, %c0_131, %c0_132] : memref<9x128x128xbf16, #tpu.memory_space<vmem>>, vector<1x128x128xbf16>
    %147 = vector.shape_cast %146 : vector<1x128x128xbf16> to vector<128x128xbf16>
    %cst_133 = arith.constant dense<0.000000e+00> : vector<16x128xf32>
    %148 = tpu.matmul %145, %147, %cst_133 {dimension_numbers = #tpu.dot_dimension_numbers<[1], [0], [0], [1], [0, 0, 1, 1], [], []>} : vector<16x128xbf16>, vector<128x128xbf16>, vector<16x128xf32> -> vector<16x128xf32>
    %149 = arith.addf %141, %148 : vector<16x128xf32>
    %c8_134 = arith.constant 8 : index
    %c0_135 = arith.constant 0 : index
    %c0_136 = arith.constant 0 : index
    %150 = vector.load %arg5[%c8_134, %c0_135, %c0_136] : memref<9x16x64xbf16, #tpu.memory_space<vmem>>, vector<1x16x64xbf16>
    %151 = vector.shape_cast %150 : vector<1x16x64xbf16> to vector<16x64xbf16>
    %cst_137 = arith.constant dense<0.000000e+00> : vector<16x128xf32>
    %152 = tpu.matmul %151, %84, %cst_137 {dimension_numbers = #tpu.dot_dimension_numbers<[1], [0], [0], [1], [0, 0, 1, 1], [], []>} : vector<16x64xbf16>, vector<64x128xbf16>, vector<16x128xf32> -> vector<16x128xf32>
    %153 = arith.truncf %152 : vector<16x128xf32> to vector<16x128xbf16>
    %c8_138 = arith.constant 8 : index
    %c0_139 = arith.constant 0 : index
    %c0_140 = arith.constant 0 : index
    %154 = vector.load %arg6[%c8_138, %c0_139, %c0_140] : memref<9x128x128xbf16, #tpu.memory_space<vmem>>, vector<1x128x128xbf16>
    %155 = vector.shape_cast %154 : vector<1x128x128xbf16> to vector<128x128xbf16>
    %cst_141 = arith.constant dense<0.000000e+00> : vector<16x128xf32>
    %156 = tpu.matmul %153, %155, %cst_141 {dimension_numbers = #tpu.dot_dimension_numbers<[1], [0], [0], [1], [0, 0, 1, 1], [], []>} : vector<16x128xbf16>, vector<128x128xbf16>, vector<16x128xf32> -> vector<16x128xf32>
    %157 = arith.addf %149, %156 : vector<16x128xf32>
    %c0_142 = arith.constant 0 : index
    %c0_143 = arith.constant 0 : index
    %158 = vector.load %arg7[%c0_142, %c0_143] : memref<1x128xf32, #tpu.memory_space<vmem>>, vector<1x128xf32>
    %159 = vector.broadcast %158 : vector<1x128xf32> to vector<16x128xf32>
    %160 = arith.addf %157, %159 : vector<16x128xf32>
    %161 = arith.negf %160 : vector<16x128xf32>
    %162 = math.exp %161 : vector<16x128xf32>
    %cst_144 = arith.constant 1.000000e+00 : f32
    %163 = vector.broadcast %cst_144 : f32 to vector<16x128xf32>
    %164 = arith.addf %163, %162 : vector<16x128xf32>
    %165 = arith.divf %163, %164 : vector<16x128xf32>
    %166 = arith.mulf %160, %165 : vector<16x128xf32>
    %167 = arith.truncf %166 : vector<16x128xf32> to vector<16x128xbf16>
    %c0_145 = arith.constant 0 : index
    %c0_146 = arith.constant 0 : index
    %168 = vector.load %arg8[%c0_145, %c0_146] : memref<128x128xbf16, #tpu.memory_space<vmem>>, vector<128x128xbf16>
    %cst_147 = arith.constant dense<0.000000e+00> : vector<16x128xf32>
    %169 = tpu.matmul %167, %168, %cst_147 {dimension_numbers = #tpu.dot_dimension_numbers<[1], [0], [0], [1], [0, 0, 1, 1], [], []>} : vector<16x128xbf16>, vector<128x128xbf16>, vector<16x128xf32> -> vector<16x128xf32>
    %c0_148 = arith.constant 0 : index
    %c0_149 = arith.constant 0 : index
    %170 = vector.load %arg9[%c0_148, %c0_149] : memref<1x128xf32, #tpu.memory_space<vmem>>, vector<1x128xf32>
    %171 = vector.broadcast %170 : vector<1x128xf32> to vector<16x128xf32>
    %172 = arith.addf %169, %171 : vector<16x128xf32>
    %173 = arith.negf %172 : vector<16x128xf32>
    %174 = math.exp %173 : vector<16x128xf32>
    %cst_150 = arith.constant 1.000000e+00 : f32
    %175 = vector.broadcast %cst_150 : f32 to vector<16x128xf32>
    %176 = arith.addf %175, %174 : vector<16x128xf32>
    %177 = arith.divf %175, %176 : vector<16x128xf32>
    %c0_151 = arith.constant 0 : index
    %c0_152 = arith.constant 0 : index
    %178 = vector.load %arg12[%c0_151, %c0_152] : memref<1x128xf32, #tpu.memory_space<vmem>>, vector<1x128xf32>
    %c0_153 = arith.constant 0 : index
    %c0_154 = arith.constant 0 : index
    %179 = vector.load %arg13[%c0_153, %c0_154] : memref<1x128xf32, #tpu.memory_space<vmem>>, vector<1x128xf32>
    %cst_155 = arith.constant 2.000000e+00 : f32
    %180 = vector.broadcast %cst_155 : f32 to vector<16x128xf32>
    %181 = arith.mulf %177, %180 : vector<16x128xf32>
    %cst_156 = arith.constant 5.000000e-01 : f32
    %182 = vector.broadcast %cst_156 : f32 to vector<16x128xf32>
    %183 = arith.subf %181, %182 : vector<16x128xf32>
    %c0_157 = arith.constant 0 : index
    %c0_158 = arith.constant 0 : index
    %184 = vector.load %arg10[%c0_157, %c0_158] : memref<16x128xf32, #tpu.memory_space<vmem>>, vector<16x128xf32>
    %185 = arith.addf %183, %184 : vector<16x128xf32>
    %cst_159 = arith.constant 4.000000e+00 : f32
    %186 = vector.broadcast %cst_159 : f32 to vector<16x128xf32>
    %187 = arith.mulf %185, %186 : vector<16x128xf32>
    %188 = arith.mulf %177, %177 : vector<16x128xf32>
    %cst_160 = arith.constant 4.000000e+00 : f32
    %189 = vector.broadcast %cst_160 : f32 to vector<16x128xf32>
    %190 = arith.mulf %188, %189 : vector<16x128xf32>
    %c0_161 = arith.constant 0 : index
    %c0_162 = arith.constant 0 : index
    %191 = vector.load %arg11[%c0_161, %c0_162] : memref<1x128xf32, #tpu.memory_space<vmem>>, vector<1x128xf32>
    %192 = vector.broadcast %191 : vector<1x128xf32> to vector<16x128xf32>
    %193 = arith.mulf %190, %192 : vector<16x128xf32>
    %194 = vector.broadcast %178 : vector<1x128xf32> to vector<16x128xf32>
    %195 = arith.mulf %194, %187 : vector<16x128xf32>
    %196 = vector.broadcast %179 : vector<1x128xf32> to vector<16x128xf32>
    %197 = arith.mulf %196, %193 : vector<16x128xf32>
    %198 = arith.addf %195, %197 : vector<16x128xf32>
    %cst_163 = arith.constant 1.000000e+00 : f32
    %199 = vector.broadcast %cst_163 : f32 to vector<1x128xf32>
    %200 = arith.subf %199, %178 : vector<1x128xf32>
    %201 = arith.subf %200, %179 : vector<1x128xf32>
    %202 = vector.broadcast %201 : vector<1x128xf32> to vector<16x128xf32>
    %203 = arith.mulf %202, %177 : vector<16x128xf32>
    %204 = arith.addf %198, %203 : vector<16x128xf32>
    %c0_164 = arith.constant 0 : index
    %c0_165 = arith.constant 0 : index
    %c0_166 = arith.constant 0 : index
    %205 = vector.load %arg14[%c0_164, %c0_165, %c0_166] : memref<1x16x128xf32, #tpu.memory_space<vmem>>, vector<1x16x128xf32>
    %206 = vector.shape_cast %205 : vector<1x16x128xf32> to vector<16x128xf32>
    %207 = vector.shape_cast %177 : vector<16x128xf32> to vector<1x16x128xf32>
    tpu.vector_store %arg14[%c0_164, %c0_165, %c0_166], %207 {strides = array<i32>} : memref<1x16x128xf32, #tpu.memory_space<vmem>>, vector<1x16x128xf32>,
    %c0_167 = arith.constant 0 : index
    %c0_168 = arith.constant 0 : index
    %c0_169 = arith.constant 0 : index
    %208 = vector.load %arg15[%c0_167, %c0_168, %c0_169] : memref<1x16x128xf32, #tpu.memory_space<vmem>>, vector<1x16x128xf32>
    %209 = vector.shape_cast %208 : vector<1x16x128xf32> to vector<16x128xf32>
    %210 = vector.shape_cast %204 : vector<16x128xf32> to vector<1x16x128xf32>
    tpu.vector_store %arg15[%c0_167, %c0_168, %c0_169], %210 {strides = array<i32>} : memref<1x16x128xf32, #tpu.memory_space<vmem>>, vector<1x16x128xf32>,
    return
  }
  func.func @transform_0(%arg0: i32) -> (i32, i32, i32) {
    %c0_i32 = arith.constant 0 : i32
    %c0_i32_0 = arith.constant 0 : i32
    %c0_i32_1 = arith.constant 0 : i32
    return %arg0, %c0_i32, %c0_i32_0 : i32, i32, i32
  }
  func.func @transform_1(%arg0: i32) -> (i32, i32, i32) {
    %c0_i32 = arith.constant 0 : i32
    %c0_i32_0 = arith.constant 0 : i32
    %c0_i32_1 = arith.constant 0 : i32
    %c0_i32_2 = arith.constant 0 : i32
    return %c0_i32, %c0_i32_0, %c0_i32_1 : i32, i32, i32
  }
  func.func @transform_2(%arg0: i32) -> (i32, i32, i32) {
    %c0_i32 = arith.constant 0 : i32
    %c0_i32_0 = arith.constant 0 : i32
    %c0_i32_1 = arith.constant 0 : i32
    %c0_i32_2 = arith.constant 0 : i32
    return %c0_i32, %c0_i32_0, %c0_i32_1 : i32, i32, i32
  }
  func.func @transform_3(%arg0: i32) -> (i32, i32) {
    %c0_i32 = arith.constant 0 : i32
    %c0_i32_0 = arith.constant 0 : i32
    %c0_i32_1 = arith.constant 0 : i32
    return %c0_i32, %c0_i32_0 : i32, i32
  }
  func.func @transform_4(%arg0: i32) -> (i32, i32, i32) {
    %c0_i32 = arith.constant 0 : i32
    %c0_i32_0 = arith.constant 0 : i32
    %c0_i32_1 = arith.constant 0 : i32
    %c0_i32_2 = arith.constant 0 : i32
    return %c0_i32, %c0_i32_0, %c0_i32_1 : i32, i32, i32
  }
  func.func @transform_5(%arg0: i32) -> (i32, i32, i32) {
    %c0_i32 = arith.constant 0 : i32
    %c0_i32_0 = arith.constant 0 : i32
    %c0_i32_1 = arith.constant 0 : i32
    %c0_i32_2 = arith.constant 0 : i32
    return %c0_i32, %c0_i32_0, %c0_i32_1 : i32, i32, i32
  }
  func.func @transform_6(%arg0: i32) -> (i32, i32) {
    %c0_i32 = arith.constant 0 : i32
    %c0_i32_0 = arith.constant 0 : i32
    %c0_i32_1 = arith.constant 0 : i32
    return %c0_i32, %c0_i32_0 : i32, i32
  }
  func.func @transform_7(%arg0: i32) -> (i32, i32) {
    %c0_i32 = arith.constant 0 : i32
    %c0_i32_0 = arith.constant 0 : i32
    %c0_i32_1 = arith.constant 0 : i32
    return %c0_i32, %c0_i32_0 : i32, i32
  }
  func.func @transform_8(%arg0: i32) -> (i32, i32) {
    %c0_i32 = arith.constant 0 : i32
    %c0_i32_0 = arith.constant 0 : i32
    %c0_i32_1 = arith.constant 0 : i32
    return %c0_i32, %c0_i32_0 : i32, i32
  }
  func.func @transform_9(%arg0: i32) -> (i32, i32) {
    %c0_i32 = arith.constant 0 : i32
    %c0_i32_0 = arith.constant 0 : i32
    %c0_i32_1 = arith.constant 0 : i32
    return %c0_i32, %c0_i32_0 : i32, i32
  }
  func.func @transform_10(%arg0: i32) -> (i32, i32) {
    %c0_i32 = arith.constant 0 : i32
    %c0_i32_0 = arith.constant 0 : i32
    %c0_i32_1 = arith.constant 0 : i32
    return %c0_i32, %c0_i32_0 : i32, i32
  }
  func.func @transform_11(%arg0: i32) -> (i32, i32) {
    %c0_i32 = arith.constant 0 : i32
    %c0_i32_0 = arith.constant 0 : i32
    %c0_i32_1 = arith.constant 0 : i32
    return %c0_i32, %c0_i32_0 : i32, i32
  }
  func.func @transform_12(%arg0: i32) -> (i32, i32) {
    %c0_i32 = arith.constant 0 : i32
    %c0_i32_0 = arith.constant 0 : i32
    %c0_i32_1 = arith.constant 0 : i32
    return %c0_i32, %c0_i32_0 : i32, i32
  }
  func.func @transform_13(%arg0: i32) -> (i32, i32, i32) {
    %c0_i32 = arith.constant 0 : i32
    %c0_i32_0 = arith.constant 0 : i32
    %c0_i32_1 = arith.constant 0 : i32
    return %arg0, %c0_i32, %c0_i32_0 : i32, i32, i32
  }
  func.func @transform_14(%arg0: i32) -> (i32, i32, i32) {
    %c0_i32 = arith.constant 0 : i32
    %c0_i32_0 = arith.constant 0 : i32
    %c0_i32_1 = arith.constant 0 : i32
    return %arg0, %c0_i32, %c0_i32_0 : i32, i32, i32
  }
}

</mosaic_0001>

<bundles_post_ra>
// kernel: _fused_forward.1
= control target key start
LH: loop header
LB: loop body
LE: loop exit
PB: predicated region body
PF: predicated region fallthrough
CT: control target
= control target key end

     0   :  { %s8417_s29 = smov 0   ;;  %s10195_s0 = inlined_call_operand.vmem [shape: bf16[2,384,128], index: 0, kind: input, shape index: {}]   ;;  %s10196_s1 = inlined_call_operand.vmem [shape: bf16[9,64,384], index: 1, kind: input, shape index: {}]   ;;  %s10197_s2 = inlined_call_operand.vmem [shape: bf16[9,128,128], index: 2, kind: input, shape index: {}]   ;;  %s10198_s3 = inlined_call_operand.vmem [shape: f32[1,128], index: 3, kind: input, shape index: {}]   ;;  %s10199_s4 = inlined_call_operand.vmem [shape: bf16[9,16,64], index: 4, kind: input, shape index: {}]   ;;  %s10200_s5 = inlined_call_operand.vmem [shape: bf16[9,128,128], index: 5, kind: input, shape index: {}]   ;;  %s10201_s6 = inlined_call_operand.vmem [shape: f32[1,128], index: 6, kind: input, shape index: {}]   ;;  %s10202_s7 = inlined_call_operand.vmem [shape: bf16[128,128], index: 7, kind: input, shape index: {}]   ;;  %s10203_s8 = inlined_call_operand.vmem [shape: f32[1,128], index: 8, kind: input, shape index: {}]   ;;  %s10204_s9 = inlined_call_operand.vmem [shape: f32[16,128], index: 9, kind: input, shape index: {}]   ;;  %s10205_s10 = inlined_call_operand.vmem [shape: f32[1,128], index: 10, kind: input, shape index: {}]   ;;  %s10206_s11 = inlined_call_operand.vmem [shape: f32[1,128], index: 11, kind: input, shape index: {}]   ;;  %s10207_s12 = inlined_call_operand.vmem [shape: f32[1,128], index: 12, kind: input, shape index: {}]   ;;  %s10208_s13 = inlined_call_operand.vmem [shape: f32[2,16,128], index: 13, kind: output, shape index: {0}]   ;;  %s10209_s14 = inlined_call_operand.vmem [shape: f32[2,16,128], index: 14, kind: output, shape index: {1}]  }
   0x1 LB: > { %s5647_s30 = sadd.s32 4294967295, %s8338_s29   ;;  %p5651_p0 = scmp.ge.s32.totalorder %s8338_s29, 1  ;;  %s8338_s29 = sphi %s8417_s29, %s25_s29  }
   0x2   : > { %p415_p1 = scmp.lt.s32.totalorder %s8338_s29, 3 }
   0x4   : > { %p416_p2 = pnand %p5651_p0, %p415_p1 }
   0x5   : > { %p466_p3 = scmp.lt.s32.totalorder (!%p416_p2), %s5647_s30, 1  ;;  %v7933_v0 = vld [vmem:[%s10196_s1 + $0x4] ss:$12 sps:$4 sm:$0xff] (!%p416_p2)   ;;  %v7934_v1 = vld [vmem:[%s10196_s1 + $0x8] ss:$12 sps:$4 sm:$0xff] (!%p416_p2)   ;;  %vm8341_vm0 = vmmov (!%p416_p2), 0  }
   0x6   : > { %419 = sbr.rel (%p416_p2) target bundleno = 3155 (0xc53), region = 72  ;;  %786 = vmatprep.mubr.bf16.mxu0 (!%p416_p2), %v7933_v0  ;;  %7108 = vmatprep.mubr.bf16.mxu1 (!%p416_p2), %v7934_v1  ;;  %v7931_v26 = vld [vmem:[%s10196_s1] ss:$12 sps:$4 sm:$0xff] (!%p416_p2)   ;;  %v7936_v28 = vld [vmem:[%s10196_s1 + $0x1c] ss:$12 sps:$4 sm:$0xff] (!%p416_p2)   ;;  %vm3915_vm1 = vcmask (!%p416_p2), 523264  }
   0x7   : > { %v7935_v27 = vld [vmem:[%s10196_s1 + $0x20] ss:$12 sps:$4 sm:$0xff] (!%p416_p2)   ;;  %v7942_v29 = vld [vmem:[%s10196_s1 + $0x38] ss:$12 sps:$4 sm:$0xff] (!%p416_p2)   ;;  %v7943_v31 = vld [vmem:[%s10196_s1 + $0x50] ss:$12 sps:$4 sm:$0xff] (!%p416_p2)  }
   0x8   : > { %v7938_v30 = vld [vmem:[%s10196_s1 + $0x18] ss:$12 sps:$4 sm:$0xff] (!%p416_p2)   ;;  %v7939_v32 = vld [vmem:[%s10196_s1 + $0x34] ss:$12 sps:$4 sm:$0xff] (!%p416_p2)   ;;  %v7941_v34 = vld [vmem:[%s10196_s1 + $0x30] ss:$12 sps:$4 sm:$0xff] (!%p416_p2)  }
   0x9   : > { %v7950_v33 = vld [vmem:[%s10196_s1 + $0x68] ss:$12 sps:$4 sm:$0xff] (!%p416_p2)   ;;  %v7944_v35 = vld [vmem:[%s10196_s1 + $0x4c] ss:$12 sps:$4 sm:$0xff] (!%p416_p2)   ;;  %v7949_v37 = vld [vmem:[%s10196_s1 + $0x64] ss:$12 sps:$4 sm:$0xff] (!%p416_p2)  }
   0xa   : > { %v7946_v36 = vld [vmem:[%s10196_s1 + $0x48] ss:$12 sps:$4 sm:$0xff] (!%p416_p2)   ;;  %v7947_v38 = vld [vmem:[%s10196_s1 + $0x60] ss:$12 sps:$4 sm:$0xff] (!%p416_p2)   ;;  %v7960_v41 = vld [vmem:[%s10196_s1 + $0x98] ss:$12 sps:$4 sm:$0xff] (!%p416_p2)  }
   0xb   : > { %v7951_v39 = vld [vmem:[%s10196_s1 + $0x80] ss:$12 sps:$4 sm:$0xff] (!%p416_p2)   ;;  %v7952_v40 = vld [vmem:[%s10196_s1 + $0x7c] ss:$12 sps:$4 sm:$0xff] (!%p416_p2)   ;;  %v7954_v42 = vld [vmem:[%s10196_s1 + $0x78] ss:$12 sps:$4 sm:$0xff] (!%p416_p2)  }
   0xc   : > { %v7962_v43 = vld [vmem:[%s10196_s1 + $0xb0] ss:$12 sps:$4 sm:$0xff] (!%p416_p2)   ;;  %v7955_v44 = vld [vmem:[%s10196_s1 + $0x94] ss:$12 sps:$4 sm:$0xff] (!%p416_p2)   ;;  %v7958_v47 = vld [vmem:[%s10196_s1 + $0xac] ss:$12 sps:$4 sm:$0xff] (!%p416_p2)  }
   0xd   : > { %s10211_s30 = smov (!%p466_p3, %s5647_s30), 1  ;;  %v7965_v45 = vld [vmem:[%s10196_s1 + $0xc4] ss:$12 sps:$4 sm:$0xff]   ;;  %v7961_v48 = vld [vmem:[%s10196_s1 + $0xa8] ss:$12 sps:$4 sm:$0xff]  }
   0xe   : > { %s7896_s19 = smul.u32 192, %s10211_s30  ;;  %v7957_v46 = vld [vmem:[%s10196_s1 + $0x90] ss:$12 sps:$4 sm:$0xff]   ;;  %v7963_v49 = vld [vmem:[%s10196_s1 + $0xc0] ss:$12 sps:$4 sm:$0xff]   ;;  %s6379_s25 = sshll.u32 %s10211_s30, 4 }
   0xf   : > { %v7966_v50 = vld [vmem:[%s10196_s1 + $0xdc] ss:$12 sps:$4 sm:$0xff]   ;;  %v7968_v51 = vld [vmem:[%s10196_s1 + $0xd8] ss:$12 sps:$4 sm:$0xff]   ;;  %v7969_v52 = vld [vmem:[%s10196_s1 + $0xf4] ss:$12 sps:$4 sm:$0xff]   ;;  %s475_s16 = scalar_lea.vmem %s10208_s13, %s6379_s25  ;;  %s480_s28 = scalar_lea.vmem %s10209_s14, %s6379_s25 }
  0x10   : > { %s8437_s22 = scalar_lea.vmem %s10195_s0, %s7896_s19  ;;  %v7971_v53 = vld [vmem:[%s10196_s1 + $0xf0] ss:$12 sps:$4 sm:$0xff]   ;;  %v7972_v54 = vld [vmem:[%s10196_s1 + $0x10c] ss:$12 sps:$4 sm:$0xff]   ;;  %v7974_v55 = vld [vmem:[%s10196_s1 + $0x108] ss:$12 sps:$4 sm:$0xff]  }
  0x11   : > { %v8440_v2 = vld [vmem:[%s8437_s22 + $0x40] sm:$0xff]   ;;  %v8451_v5 = vld [vmem:[%s8437_s22 + $0x48] sm:$0xff]   ;;  %v8464_v8 = vld [vmem:[%s8437_s22 + $0x50] sm:$0xff]  }
  0x12   : > { %v8443_v3 = vld [vmem:[%s8437_s22 + $0x80] sm:$0xff]   ;;  %6381 = vmatprep.subr.bf16.mxu0 %v8440_v2  ;;  %v8456_v6 = vld [vmem:[%s8437_s22 + $0x88] sm:$0xff]   ;;  %v8467_v9 = vld [vmem:[%s8437_s22 + $0x90] sm:$0xff]  }
  0x13   : > { %v8447_v4 = vld [vmem:[%s8437_s22] sm:$0xff]   ;;  %7092 = vmatprep.subr.bf16.mxu1 %v8443_v3  ;;  %v8460_v7 = vld [vmem:[%s8437_s22 + $0x8] sm:$0xff]   ;;  %v8472_v10 = vld [vmem:[%s8437_s22 + $0x10] sm:$0xff]  }
  0x14   : > { %6382 = vmatpush3.bf16.msra.mxu0 %v8447_v4  ;;  %7093 = vmatpush3.bf16.msra.mxu1 %v8443_v3  ;;  %v8477_v11 = vld [vmem:[%s8437_s22 + $0x58] sm:$0xff]   ;;  %v8488_v14 = vld [vmem:[%s8437_s22 + $0x60] sm:$0xff]   ;;  %v8501_v17 = vld [vmem:[%s8437_s22 + $0x68] sm:$0xff]  }
  0x15   : > { %6383 = vmatprep.subr.bf16.mxu0 %v8451_v5  ;;  %7094 = vmatprep.subr.bf16.mxu1 %v8456_v6  ;;  %v8480_v12 = vld [vmem:[%s8437_s22 + $0x98] sm:$0xff]   ;;  %v8493_v15 = vld [vmem:[%s8437_s22 + $0xa0] sm:$0xff]   ;;  %v8506_v18 = vld [vmem:[%s8437_s22 + $0xa8] sm:$0xff]  }
  0x16   : > { %v8483_v13 = vld [vmem:[%s8437_s22 + $0x18] sm:$0xff]   ;;  %v8496_v16 = vld [vmem:[%s8437_s22 + $0x20] sm:$0xff]   ;;  %v8509_v19 = vld [vmem:[%s8437_s22 + $0x28] sm:$0xff]  }
  0x17   : > { %v8514_v20 = vld [vmem:[%s8437_s22 + $0x70] sm:$0xff]   ;;  %v8527_v23 = vld [vmem:[%s8437_s22 + $0x78] sm:$0xff]   ;;  %v7976_v57 = vld [vmem:[%s10196_s1 + $0xe0] ss:$12 sps:$4 sm:$0xff]  }
  0x18   : > { %6384 = vmatpush3.bf16.msra.mxu0 %v8460_v7  ;;  %7095 = vmatpush3.bf16.msra.mxu1 %v8456_v6  ;;  %v8519_v21 = vld [vmem:[%s8437_s22 + $0xb0] sm:$0xff]   ;;  %v8532_v24 = vld [vmem:[%s8437_s22 + $0xb8] sm:$0xff]   ;;  %v8707_v59 = vld [vmem:[%s8437_s22 + $0x40] sm:$0xff]  }
  0x19   : > { %6385 = vmatprep.subr.bf16.mxu0 %v8464_v8  ;;  %7096 = vmatprep.subr.bf16.mxu1 %v8467_v9  ;;  %v8522_v22 = vld [vmem:[%s8437_s22 + $0x30] sm:$0xff]   ;;  %v8537_v25 = vld [vmem:[%s8437_s22 + $0x38] sm:$0xff]   ;;  %v8711_v60 = vld [vmem:[%s8437_s22] sm:$0xff]  }
  0x1a   : > { %v7975_v56 = vld [vmem:[%s10196_s1 + $0xc8] ss:$12 sps:$4 sm:$0xff]   ;;  %v7977_v58 = vld [vmem:[%s10196_s1 + $0xf8] ss:$12 sps:$4 sm:$0xff]   ;;  %v7978_v61 = vld [vmem:[%s10196_s1 + $0x110] ss:$12 sps:$4 sm:$0xff]  }
  0x1b   : > { %v7979_v62 = vld [vmem:[%s10197_s2 + $0x40] sm:$0xff]   ;;  %v8721_v63 = vld [vmem:[%s8437_s22 + $0x48] sm:$0xff]  }
  0x1c   : > { %6386 = vmatpush3.bf16.msra.mxu0 %v8472_v10  ;;  %7097 = vmatpush3.bf16.msra.mxu1 %v8467_v9  ;;  %v8725_v0 = vld [vmem:[%s8437_s22 + $0x8] sm:$0xff]  }
  0x1d   : > { %6387 = vmatprep.subr.bf16.mxu0 %v8477_v11  ;;  %7098 = vmatprep.subr.bf16.mxu1 %v8480_v12  ;;  %v7980_v1 = vld [vmem:[%s10197_s2 + $0x48] sm:$0xff]  }
  0x20   : > { %6388 = vmatpush3.bf16.msra.mxu0 %v8483_v13  ;;  %7099 = vmatpush3.bf16.msra.mxu1 %v8480_v12 }
  0x21   : > { %6389 = vmatprep.subr.bf16.mxu0 %v8488_v14  ;;  %7100 = vmatprep.subr.bf16.mxu1 %v8493_v15 }
  0x24   : > { %6390 = vmatpush3.bf16.msra.mxu0 %v8496_v16  ;;  %7101 = vmatpush3.bf16.msra.mxu1 %v8493_v15 }
  0x25   : > { %6391 = vmatprep.subr.bf16.mxu0 %v8501_v17  ;;  %7102 = vmatprep.subr.bf16.mxu1 %v8506_v18 }
  0x28   : > { %6392 = vmatpush3.bf16.msra.mxu0 %v8509_v19  ;;  %7103 = vmatpush3.bf16.msra.mxu1 %v8506_v18 }
  0x29   : > { %6393 = vmatprep.subr.bf16.mxu0 %v8514_v20  ;;  %7104 = vmatprep.subr.bf16.mxu1 %v8519_v21 }
  0x2c   : > { %6394 = vmatpush3.bf16.msra.mxu0 %v8522_v22  ;;  %7105 = vmatpush3.bf16.msra.mxu1 %v8519_v21 }
  0x2d   : > { %6395 = vmatprep.subr.bf16.mxu0 %v8527_v23  ;;  %7106 = vmatprep.subr.bf16.mxu1 %v8532_v24 }
  0x30   : > { %6396 = vmatpush3.bf16.msra.mxu0 %v8537_v25  ;;  %7107 = vmatpush3.bf16.msra.mxu1 %v8532_v24 }
  0x31   : > { %6433 = vmatprep.subr.bf16.mxu0 %v8440_v2  ;;  %7116 = vmatprep.subr.bf16.mxu1 %v8443_v3 }
  0x33   : > { %787 = vmatmul.mubr.bf16.vlgmr.msra.gmra.mrb[0].mxu0 %v7931_v26  ;;  %7109 = vmatmul.mubr.bf16.vlgmr.msra.gmra.mrb[0].mxu1 %v7935_v27  ;;  %v8008_v26 = vld [vmem:[%s10196_s1 + $0x150] ss:$12 sps:$4 sm:$0xff]   ;;  %v8010_v27 = vld [vmem:[%s10196_s1 + $0x16c] ss:$12 sps:$4 sm:$0xff]  }
  0x34   : > { %6434 = vmatpush3.bf16.msra.mxu0 %v8447_v4  ;;  %7117 = vmatpush3.bf16.msra.mxu1 %v8443_v3 }
  0x35   : > { %6435 = vmatprep.subr.bf16.mxu0 %v8451_v5  ;;  %7118 = vmatprep.subr.bf16.mxu1 %v8456_v6 }
  0x36   : > { %794 = vmatprep.mubr.bf16.mxu0 %v7936_v28  ;;  %7112 = vmatprep.mubr.bf16.mxu1 %v7942_v29  ;;  %v8013_v28 = vld [vmem:[%s10196_s1 + $0x168] ss:$12 sps:$4 sm:$0xff]   ;;  %v8017_v29 = vld [vmem:[%s10196_s1 + $0x184] ss:$12 sps:$4 sm:$0xff]  }
  0x38   : > { %6436 = vmatpush3.bf16.msra.mxu0 %v8460_v7  ;;  %7119 = vmatpush3.bf16.msra.mxu1 %v8456_v6 }
  0x39   : > { %6437 = vmatprep.subr.bf16.mxu0 %v8464_v8  ;;  %7120 = vmatprep.subr.bf16.mxu1 %v8467_v9 }
  0x3b   : > { %795 = vmatmul.mubr.bf16.gmra.mrb[4].mxu0 %v7938_v30  ;;  %7113 = vmatmul.mubr.bf16.gmra.mrb[4].mxu1 %v7943_v31  ;;  %v8015_v30 = vld [vmem:[%s10196_s1 + $0x180] ss:$12 sps:$4 sm:$0xff]  }
  0x3c   : > { %6438 = vmatpush3.bf16.msra.mxu0 %v8472_v10  ;;  %7121 = vmatpush3.bf16.msra.mxu1 %v8467_v9  ;;  %v8850_v31 = vld [vmem:[%s8437_s22 + $0x80] sm:$0xff]  }
  0x3d   : > { %6439 = vmatprep.subr.bf16.mxu0 %v8477_v11  ;;  %7122 = vmatprep.subr.bf16.mxu1 %v8480_v12 }
  0x3e   : > { %802 = vmatprep.mubr.bf16.mxu0 %v7939_v32  ;;  %7132 = vmatprep.mubr.bf16.mxu1 %v7950_v33  ;;  %v8855_v32 = vld [vmem:[%s8437_s22 + $0x88] sm:$0xff]  }
  0x3f   : > { %v8018_v33 = vld [vmem:[%s10196_s1 + $0x19c] ss:$12 sps:$4 sm:$0xff]  }
  0x40   : > { %6440 = vmatpush3.bf16.msra.mxu0 %v8483_v13  ;;  %7123 = vmatpush3.bf16.msra.mxu1 %v8480_v12 }
  0x41   : > { %6441 = vmatprep.subr.bf16.mxu0 %v8488_v14  ;;  %7124 = vmatprep.subr.bf16.mxu1 %v8493_v15 }
  0x43   : > { %803 = vmatmul.mubr.bf16.gmra.mrb[8].mxu0 %v7941_v34  ;;  %v8020_v34 = vld [vmem:[%s10196_s1 + $0x198] ss:$12 sps:$4 sm:$0xff]  }
  0x44   : > { %6442 = vmatpush3.bf16.msra.mxu0 %v8496_v16  ;;  %7125 = vmatpush3.bf16.msra.mxu1 %v8493_v15 }
  0x45   : > { %6443 = vmatprep.subr.bf16.mxu0 %v8501_v17  ;;  %7126 = vmatprep.subr.bf16.mxu1 %v8506_v18 }
  0x46   : > { %810 = vmatprep.mubr.bf16.mxu0 %v7944_v35  ;;  %v8866_v35 = vld [vmem:[%s8437_s22 + $0x90] sm:$0xff]  }
  0x48   : > { %6444 = vmatpush3.bf16.msra.mxu0 %v8509_v19  ;;  %7127 = vmatpush3.bf16.msra.mxu1 %v8506_v18 }
  0x49   : > { %6445 = vmatprep.subr.bf16.mxu0 %v8514_v20  ;;  %7128 = vmatprep.subr.bf16.mxu1 %v8519_v21 }
  0x4b   : > { %811 = vmatmul.mubr.bf16.gmra.mrb[12].mxu0 %v7946_v36  ;;  %v8871_v36 = vld [vmem:[%s8437_s22 + $0x98] sm:$0xff]  }
  0x4c   : > { %6446 = vmatpush3.bf16.msra.mxu0 %v8522_v22  ;;  %7129 = vmatpush3.bf16.msra.mxu1 %v8519_v21 }
  0x4d   : > { %6447 = vmatprep.subr.bf16.mxu0 %v8527_v23  ;;  %7130 = vmatprep.subr.bf16.mxu1 %v8532_v24 }
  0x4e   : > { %1017 = vmatprep.mubr.bf16.mxu0 %v7949_v37  ;;  %v8021_v37 = vld [vmem:[%s10196_s1 + $0x1b4] ss:$12 sps:$4 sm:$0xff]  }
  0x50   : > { %6448 = vmatpush3.bf16.msra.mxu0 %v8537_v25  ;;  %7131 = vmatpush3.bf16.msra.mxu1 %v8532_v24 }
  0x51   : > { %6509 = vmatprep.subr.bf16.mxu1 %v8440_v2  ;;  %7140 = vmatprep.subr.bf16.mxu0 %v7979_v62  ;;  %v8732_v2 = vld [vmem:[%s8437_s22 + $0x50] sm:$0xff]  }
  0x53   : > { %1018 = vmatmul.mubr.bf16.vlgmr.msra.gmra.mrb[16].mxu0 %v7947_v38  ;;  %7133 = vmatmul.mubr.bf16.vlgmr.msra.gmra.mrb[8].mxu1 %v7951_v39  ;;  %v8023_v38 = vld [vmem:[%s10196_s1 + $0x1b0] ss:$12 sps:$4 sm:$0xff]   ;;  %v8882_v39 = vld [vmem:[%s8437_s22 + $0xa0] sm:$0xff]  }
  0x54   : > { %6510 = vmatpush3.bf16.msra.mxu1 %v8447_v4  ;;  %1025 = vmatprep.mubr.bf16.mxu0 %v7952_v40  ;;  %v7981_v4 = vld [vmem:[%s10197_s2 + $0x50] sm:$0xff]  }
  0x55   : > { %6511 = vmatprep.subr.bf16.mxu1 %v8451_v5  ;;  %7136 = vmatprep.mubr.bf16.mxu1 %v7960_v41  ;;  %v8743_v5 = vld [vmem:[%s8437_s22 + $0x58] sm:$0xff]  }
  0x56   : > { %7141 = vmatpush3.bf16.msra.mxu0 %v7979_v62 }
  0x57   : > { %7142 = vmatprep.subr.bf16.mxu0 %v7980_v1 }
  0x58   : > { %6512 = vmatpush3.bf16.msra.mxu1 %v8460_v7  ;;  %v7982_v7 = vld [vmem:[%s10197_s2 + $0x58] sm:$0xff]  }
  0x59   : > { %6513 = vmatprep.subr.bf16.mxu1 %v8464_v8  ;;  %v8754_v8 = vld [vmem:[%s8437_s22 + $0x60] sm:$0xff]  }
  0x5a   : > { %7143 = vmatpush3.bf16.msra.mxu0 %v7980_v1 }
  0x5b   : > { %1026 = vmatmul.mubr.bf16.gmra.mrb[20].mxu0 %v7954_v42  ;;  %7137 = vmatmul.mubr.bf16.gmra.mrb[12].mxu1 %v7962_v43 }
  0x5c   : > { %6514 = vmatpush3.bf16.msra.mxu1 %v8472_v10  ;;  %1033 = vmatprep.mubr.bf16.mxu0 %v7955_v44  ;;  %v7983_v10 = vld [vmem:[%s10197_s2 + $0x60] sm:$0xff]  }
  0x5d   : > { %6515 = vmatprep.subr.bf16.mxu1 %v8477_v11  ;;  %1475 = vmatprep.mubr.bf16.mxu1 %v7965_v45  ;;  %v8765_v11 = vld [vmem:[%s8437_s22 + $0x68] sm:$0xff]  }
  0x5e   : > { %7144 = vmatprep.subr.bf16.mxu0 %v7981_v4 }
  0x5f   : > { %7145 = vmatpush3.bf16.msra.mxu0 %v7981_v4 }
  0x60   : > { %6516 = vmatpush3.bf16.msra.mxu1 %v8483_v13  ;;  %7146 = vmatprep.subr.bf16.mxu0 %v7982_v7  ;;  %v7984_v13 = vld [vmem:[%s10197_s2 + $0x68] sm:$0xff]  }
  0x61   : > { %6517 = vmatprep.subr.bf16.mxu1 %v8488_v14  ;;  %v8776_v14 = vld [vmem:[%s8437_s22 + $0x70] sm:$0xff]  }
  0x63   : > { %1034 = vmatmul.mubr.bf16.gmra.mrb[24].mxu0 %v7957_v46 }
  0x64   : > { %6518 = vmatpush3.bf16.msra.mxu1 %v8496_v16  ;;  %1041 = vmatprep.mubr.bf16.mxu0 %v7958_v47  ;;  %v7985_v16 = vld [vmem:[%s10197_s2 + $0x70] sm:$0xff]  }
  0x65   : > { %6519 = vmatprep.subr.bf16.mxu1 %v8501_v17  ;;  %7147 = vmatpush3.bf16.msra.mxu0 %v7982_v7  ;;  %v8787_v17 = vld [vmem:[%s8437_s22 + $0x78] sm:$0xff]  }
  0x66   : > { %7148 = vmatprep.subr.bf16.mxu0 %v7983_v10 }
  0x68   : > { %6520 = vmatpush3.bf16.msra.mxu1 %v8509_v19  ;;  %v7986_v19 = vld [vmem:[%s10197_s2 + $0x78] sm:$0xff]  }
  0x69   : > { %6521 = vmatprep.subr.bf16.mxu1 %v8514_v20  ;;  %7149 = vmatpush3.bf16.msra.mxu0 %v7983_v10  ;;  %v8801_v20 = vld [vmem:[%s10197_s2] sm:$0xff]  }
  0x6a   : > { %7150 = vmatprep.subr.bf16.mxu0 %v7984_v13 }
  0x6b   : > { %1042 = vmatmul.mubr.bf16.gmra.mrb[28].mxu0 %v7961_v48 }
  0x6c   : > { %6522 = vmatpush3.bf16.msra.mxu1 %v8522_v22  ;;  %v7995_v22 = vld [vmem:[%s10196_s1 + $0x120] ss:$12 sps:$4 sm:$0xff]  }
  0x6d   : > { %6523 = vmatprep.subr.bf16.mxu1 %v8527_v23  ;;  %7151 = vmatpush3.bf16.msra.mxu0 %v7984_v13  ;;  %v8000_v23 = vld [vmem:[%s10196_s1 + $0x13c] ss:$12 sps:$4 sm:$0xff]  }
  0x6e   : > { %7152 = vmatprep.subr.bf16.mxu0 %v7985_v16 }
  0x70   : > { %6524 = vmatpush3.bf16.msra.mxu1 %v8537_v25  ;;  %v8005_v25 = vld [vmem:[%s10196_s1 + $0x154] ss:$12 sps:$4 sm:$0xff]  }
  0x71   : > { %7188 = vmatprep.subr.bf16.mxu1 %v8443_v3  ;;  %7153 = vmatpush3.bf16.msra.mxu0 %v7985_v16  ;;  %v8909_v16 = vld [vmem:[%s8437_s22 + $0xb8] sm:$0xff]  }
  0x72   : > { %7154 = vmatprep.subr.bf16.mxu0 %v7986_v19 }
  0x73   : > { %1476 = vmatmul.mubr.bf16.vlgmr.msra.gmra.mrb[16].mxu1 %v7963_v49  ;;  %v8887_v49 = vld [vmem:[%s8437_s22 + $0xa8] sm:$0xff]  }
  0x74   : > { %7189 = vmatpush3.bf16.msra.mxu1 %v8443_v3  ;;  %1483 = vmatprep.mubr.bf16.mxu1 %v7966_v50  ;;  %v8736_v3 = vld [vmem:[%s8437_s22 + $0x10] sm:$0xff]  }
  0x75   : > { %7190 = vmatprep.subr.bf16.mxu1 %v8456_v6  ;;  %7155 = vmatpush3.bf16.msra.mxu0 %v7986_v19 }
  0x76   : > { %7164 = vmatprep.subr.bf16.mxu0 %v8801_v20 }
  0x78   : > { %7191 = vmatpush3.bf16.msra.mxu1 %v8456_v6  ;;  %v8747_v6 = vld [vmem:[%s8437_s22 + $0x18] sm:$0xff]  }
  0x79   : > { %7192 = vmatprep.subr.bf16.mxu1 %v8467_v9 }
  0x7b   : > { %1484 = vmatmul.mubr.bf16.gmra.mrb[20].mxu1 %v7968_v51 }
  0x7c   : > { %7193 = vmatpush3.bf16.msra.mxu1 %v8467_v9  ;;  %1491 = vmatprep.mubr.bf16.mxu1 %v7969_v52  ;;  %v8758_v9 = vld [vmem:[%s8437_s22 + $0x20] sm:$0xff]  }
  0x7d   : > { %7194 = vmatprep.subr.bf16.mxu1 %v8480_v12 }
  0x80   : > { %7195 = vmatpush3.bf16.msra.mxu1 %v8480_v12  ;;  %v8769_v12 = vld [vmem:[%s8437_s22 + $0x28] sm:$0xff]  }
  0x81   : > { %7196 = vmatprep.subr.bf16.mxu1 %v8493_v15 }
  0x83   : > { %1492 = vmatmul.mubr.bf16.gmra.mrb[24].mxu1 %v7971_v53  ;;  %v8024_v53 = vld [vmem:[%s10196_s1 + $0x1cc] ss:$12 sps:$4 sm:$0xff]  }
  0x84   : > { %7197 = vmatpush3.bf16.msra.mxu1 %v8493_v15  ;;  %1499 = vmatprep.mubr.bf16.mxu1 %v7972_v54  ;;  %v8780_v15 = vld [vmem:[%s8437_s22 + $0x30] sm:$0xff]  }
  0x85   : > { %7198 = vmatprep.subr.bf16.mxu1 %v8506_v18  ;;  %v8026_v54 = vld [vmem:[%s10196_s1 + $0x1c8] ss:$12 sps:$4 sm:$0xff]  }
  0x88   : > { %7199 = vmatpush3.bf16.msra.mxu1 %v8506_v18  ;;  %v8791_v18 = vld [vmem:[%s8437_s22 + $0x38] sm:$0xff]  }
  0x89   : > { %7200 = vmatprep.subr.bf16.mxu1 %v8519_v21 }
  0x8b   : > { %1500 = vmatmul.mubr.bf16.gmra.mrb[28].mxu1 %v7974_v55  ;;  %v8902_v55 = vld [vmem:[%s8437_s22 + $0xb0] sm:$0xff]  }
  0x8c   : > { %7201 = vmatpush3.bf16.msra.mxu1 %v8519_v21  ;;  %7204 = vmatprep.mubr.bf16.mxu1 %v7975_v56  ;;  %v7997_v21 = vld [vmem:[%s10196_s1 + $0x124] ss:$12 sps:$4 sm:$0xff]  }
  0x8d   : > { %7202 = vmatprep.subr.bf16.mxu1 %v8532_v24 }
  0x90   : > { %7203 = vmatpush3.bf16.msra.mxu1 %v8532_v24  ;;  %v8003_v24 = vld [vmem:[%s10196_s1 + $0x138] ss:$12 sps:$4 sm:$0xff]  }
  0x91   : > { %6573 = vmatprep.subr.bf16.mxu1 %v8707_v59 }
  0x93   : > { %7205 = vmatmul.mubr.bf16.vlgmr.msra.gmra.mrb[32].mxu1 %v7976_v57 }
  0x94   : > { %7208 = vmatprep.mubr.bf16.mxu1 %v7977_v58  ;;  %6574 = vmatpush3.bf16.msra.mxu1 %v8711_v60 }
  0x95   : > { %6575 = vmatprep.subr.bf16.mxu1 %v8721_v63 }
  0x98   : > { %6576 = vmatpush3.bf16.msra.mxu1 %v8725_v0 }
  0x99   : > { %6577 = vmatprep.subr.bf16.mxu1 %v8732_v2 }
  0x9b   : > { %7209 = vmatmul.mubr.bf16.gmra.mrb[36].mxu1 %v7978_v61 }
  0x9c   : > { %6578 = vmatpush3.bf16.msra.mxu1 %v8736_v3  ;;  %1828 = vmatprep.mubr.bf16.mxu1 %v7997_v21 }
  0x9d   : > { %6579 = vmatprep.subr.bf16.mxu1 %v8743_v5 }
  0xa0   : > { %6580 = vmatpush3.bf16.msra.mxu1 %v8747_v6 }
  0xa1   : > { %6581 = vmatprep.subr.bf16.mxu1 %v8754_v8 }
  0xa4   : > { %6582 = vmatpush3.bf16.msra.mxu1 %v8758_v9 }
  0xa5   : > { %6583 = vmatprep.subr.bf16.mxu1 %v8765_v11 }
  0xa8   : > { %6584 = vmatpush3.bf16.msra.mxu1 %v8769_v12 }
  0xa9   : > { %6585 = vmatprep.subr.bf16.mxu1 %v8776_v14 }
  0xac   : > { %6586 = vmatpush3.bf16.msra.mxu1 %v8780_v15 }
  0xad   : > { %6587 = vmatprep.subr.bf16.mxu1 %v8787_v17 }
  0xb0   : > { %6588 = vmatpush3.bf16.msra.mxu1 %v8791_v18 }
  0xb1   : > { %6637 = vmatprep.subr.bf16.mxu1 %v8707_v59 }
  0xb3   : > { %1829 = vmatmul.mubr.bf16.vlgmr.msra.gmra.mrb[40].mxu1 %v7995_v22 }
  0xb4   : > { %6638 = vmatpush3.bf16.msra.mxu1 %v8711_v60  ;;  %1836 = vmatprep.mubr.bf16.mxu1 %v8000_v23  ;;  %v8028_v23 = vld [vmem:[%s10196_s1 + $0x188] ss:$12 sps:$4 sm:$0xff]  }
  0xb5   : > { %6639 = vmatprep.subr.bf16.mxu1 %v8721_v63 }
  0xb8   : > { %6640 = vmatpush3.bf16.msra.mxu1 %v8725_v0 }
  0xb9   : > { %6641 = vmatprep.subr.bf16.mxu1 %v8732_v2 }
  0xbb   : > { %1837 = vmatmul.mubr.bf16.gmra.mrb[44].mxu1 %v8003_v24  ;;  %v8030_v24 = vld [vmem:[%s10196_s1 + $0x1a0] ss:$12 sps:$4 sm:$0xff]  }
  0xbc   : > { %6642 = vmatpush3.bf16.msra.mxu1 %v8736_v3  ;;  %1844 = vmatprep.mubr.bf16.mxu1 %v8005_v25 }
  0xbd   : > { %6643 = vmatprep.subr.bf16.mxu1 %v8743_v5 }
  0xc0   : > { %6644 = vmatpush3.bf16.msra.mxu1 %v8747_v6 }
  0xc1   : > { %6645 = vmatprep.subr.bf16.mxu1 %v8754_v8 }
  0xc3   : > { %1845 = vmatmul.mubr.bf16.gmra.mrb[48].mxu1 %v8008_v26 }
  0xc4   : > { %6646 = vmatpush3.bf16.msra.mxu1 %v8758_v9  ;;  %1852 = vmatprep.mubr.bf16.mxu1 %v8010_v27 }
  0xc5   : > { %6647 = vmatprep.subr.bf16.mxu1 %v8765_v11 }
  0xc8   : > { %6648 = vmatpush3.bf16.msra.mxu1 %v8769_v12 }
  0xc9   : > { %6649 = vmatprep.subr.bf16.mxu1 %v8776_v14 }
  0xcb   : > { %1853 = vmatmul.mubr.bf16.gmra.mrb[52].mxu1 %v8013_v28 }
  0xcc   : > { %6650 = vmatpush3.bf16.msra.mxu1 %v8780_v15  ;;  %2181 = vmatprep.mubr.bf16.mxu1 %v8017_v29 }
  0xcd   : > { %6651 = vmatprep.subr.bf16.mxu1 %v8787_v17 }
  0xd0   : > { %6652 = vmatpush3.bf16.msra.mxu1 %v8791_v18 }
  0xd1   : > { %7284 = vmatprep.subr.bf16.mxu1 %v8850_v31 }
  0xd3   : > { %2182 = vmatmul.mubr.bf16.vlgmr.msra.gmra.mrb[56].mxu1 %v8015_v30 }
  0xd4   : > { %7285 = vmatpush3.bf16.msra.mxu1 %v8850_v31  ;;  %2189 = vmatprep.mubr.bf16.mxu1 %v8018_v33 }
  0xd5   : > { %7286 = vmatprep.subr.bf16.mxu1 %v8855_v32 }
  0xd8   : > { %7287 = vmatpush3.bf16.msra.mxu1 %v8855_v32 }
  0xd9   : > { %7288 = vmatprep.subr.bf16.mxu1 %v8866_v35 }
  0xdb   : > { %2190 = vmatmul.mubr.bf16.gmra.mrb[60].mxu1 %v8020_v34 }
  0xdc   : > { %7289 = vmatpush3.bf16.msra.mxu1 %v8866_v35  ;;  %2197 = vmatprep.mubr.bf16.mxu1 %v8021_v37 }
  0xdd   : > { %7290 = vmatprep.subr.bf16.mxu1 %v8871_v36 }
  0xe0   : > { %7291 = vmatpush3.bf16.msra.mxu1 %v8871_v36 }
  0xe1   : > { %7292 = vmatprep.subr.bf16.mxu1 %v8882_v39 }
  0xe3   : > { %2198 = vmatmul.mubr.bf16.gmra.mrb[64].mxu1 %v8023_v38 }
  0xe4   : > { %7293 = vmatpush3.bf16.msra.mxu1 %v8882_v39  ;;  %2205 = vmatprep.mubr.bf16.mxu1 %v8024_v53 }
  0xe5   : > { %7294 = vmatprep.subr.bf16.mxu1 %v8887_v49 }
  0xe8   : > { %7295 = vmatpush3.bf16.msra.mxu1 %v8887_v49 }
  0xe9   : > { %7296 = vmatprep.subr.bf16.mxu1 %v8902_v55 }
  0xeb   : > { %2206 = vmatmul.mubr.bf16.gmra.mrb[68].mxu1 %v8026_v54 }
  0xec   : > { %7297 = vmatpush3.bf16.msra.mxu1 %v8902_v55  ;;  %7300 = vmatprep.mubr.bf16.mxu1 %v8028_v23 }
  0xed   : > { %7298 = vmatprep.subr.bf16.mxu1 %v8909_v16 }
  0xf0   : > { %7299 = vmatpush3.bf16.msra.mxu1 %v8909_v16 }
  0xf1   : > { %6701 = vmatprep.subr.bf16.mxu1 %v8707_v59 }
  0xf3   : > { %7301 = vmatmul.mubr.bf16.vlgmr.msra.gmra.mrb[72].mxu1 %v8030_v24 }
  0xf4   : > { %6702 = vmatpush3.bf16.msra.mxu1 %v8711_v60  ;;  %v8033_v60 = vld [vmem:[%s10196_s1 + $0x1b8] ss:$12 sps:$4 sm:$0xff]  }
  0xf5   : > { %6703 = vmatprep.subr.bf16.mxu1 %v8721_v63  ;;  %v8034_v63 = vld [vmem:[%s10196_s1 + $0x1d0] ss:$12 sps:$4 sm:$0xff]   ;;  %7304 = vmatprep.mubr.bf16.mxu1 %v8033_v60 }
  0xf8   : > { %6704 = vmatpush3.bf16.msra.mxu1 %v8725_v0 }
  0xf9   : > { %6705 = vmatprep.subr.bf16.mxu1 %v8732_v2 }
  0xfb   : > { %7305 = vmatmul.mubr.bf16.gmra.mrb[76].mxu1 %v8034_v63 }
  0xfc   : > { %6706 = vmatpush3.bf16.msra.mxu1 %v8736_v3 }
  0xfd   : > { %6707 = vmatprep.subr.bf16.mxu1 %v8743_v5 }
 0x100   : > { %6708 = vmatpush3.bf16.msra.mxu1 %v8747_v6 }
 0x101   : > { %6709 = vmatprep.subr.bf16.mxu1 %v8754_v8 }
 0x104   : > { %6710 = vmatpush3.bf16.msra.mxu1 %v8758_v9 }
 0x105   : > { %6711 = vmatprep.subr.bf16.mxu1 %v8765_v11 }
 0x106   : > { %v6397_v40 = vpop.f32.mrb[0].mxu0  ;;  %v7110_v41 = vpop.f32.mrb[0].mxu1 }
 0x107   : > { %v6398_v42 = vpop.f32.mrb[1].mxu0  ;;  %v853_v43 = vpop.f32.mrb[1].mxu1 }
 0x108   : > { %v6399_v44 = vadd.f32 %v6398_v42, %v6397_v40  ;;  %v6400_v45 = vpop.f32.mrb[2].mxu0  ;;  %v7111_v46 = vpop.f32.mrb[2].mxu1  ;;  %6712 = vmatpush3.bf16.msra.mxu1 %v8769_v12 }
 0x109   : > { %v6401_v47 = vpop.f32.mrb[3].mxu0  ;;  %v856_v48 = vpop.f32.mrb[3].mxu1  ;;  %6713 = vmatprep.subr.bf16.mxu1 %v8776_v14 }
 0x10a   : > { %v6402_v50 = vadd.f32 %v6401_v47, %v6400_v45  ;;  %v8890_v51 = vadd.f32 %v6399_v44, %v853_v43 }
 0x10c   : > { %v8892_v52 = vadd.f32 %v6402_v50, %v856_v48  ;;  %6714 = vmatpush3.bf16.msra.mxu1 %v8780_v15 }
 0x10d   : > { %6715 = vmatprep.subr.bf16.mxu1 %v8787_v17 }
 0x10e   : > { %v884_v56 = vpack.c.bf16 %v8892_v52, %v8890_v51  ;;  %v6403_v57 = vpop.f32.mrb[4].mxu0  ;;  %v7114_v58 = vpop.f32.mrb[4].mxu1  ;;  %v7998_v52 = vld [vmem:[%s10197_s2 + $0x80] sm:$0xff]  }
 0x10f   : > { %v6404_v61 = vpop.f32.mrb[5].mxu0  ;;  %v869_v62 = vpop.f32.mrb[5].mxu1 }
 0x110   : > { %v6405_v1 = vadd.f32 %v6404_v61, %v6403_v57  ;;  %v6406_v4 = vpop.f32.mrb[6].mxu0  ;;  %v7115_v7 = vpop.f32.mrb[6].mxu1  ;;  %6716 = vmatpush3.bf16.msra.mxu1 %v8791_v18 }
 0x111   : > { %v6407_v10 = vpop.f32.mrb[7].mxu0  ;;  %v872_v13 = vpop.f32.mrb[7].mxu1  ;;  %6765 = vmatprep.subr.bf16.mxu1 %v8707_v59  ;;  %v7989_v59 = vld [vmem:[%s10197_s2 + $0x10] sm:$0xff]  }
 0x112   : > { %v8912_v19 = vadd.f32 %v7110_v41, %v6405_v1  ;;  %v6408_v21 = vadd.f32 %v6407_v10, %v6406_v4 }
 0x114   : > { %v8914_v22 = vadd.f32 %v7111_v46, %v6408_v21 }
 0x116   : > { %v885_v25 = vpack.c.bf16 %v8914_v22, %v8912_v19  ;;  %v6409_v26 = vpop.f32.mrb[8].mxu0  ;;  %v8004_v19 = vld [vmem:[%s10197_s2 + $0x98] sm:$0xff]  }
 0x117   : > { %v6410_v27 = vpop.f32.mrb[9].mxu0 }
 0x118   : > { %v6411_v28 = vadd.f32 %v6410_v27, %v6409_v26  ;;  %v6412_v29 = vpop.f32.mrb[10].mxu0 }
 0x119   : > { %v6413_v30 = vpop.f32.mrb[11].mxu0 }
 0x11a   : > { %v6414_v33 = vadd.f32 %v6413_v30, %v6412_v29  ;;  %v8928_v34 = vadd.f32 %v6411_v28, %v869_v62  ;;  %v7988_v28 = vld [vmem:[%s10197_s2 + $0x8] sm:$0xff]  }
 0x11c   : > { %v8930_v37 = vadd.f32 %v6414_v33, %v872_v13 }
 0x11e   : > { %v886_v38 = vpack.c.bf16 %v8930_v37, %v8928_v34  ;;  %v6415_v40 = vpop.f32.mrb[12].mxu0 }
 0x11f   : > { %v6416_v41 = vpop.f32.mrb[13].mxu0 }
 0x120   : > { %v6417_v42 = vadd.f32 %v6416_v41, %v6415_v40  ;;  %v6418_v43 = vpop.f32.mrb[14].mxu0 }
 0x121   : > { %v6419_v0 = vpop.f32.mrb[15].mxu0 }
 0x122   : > { %v8944_v2 = vadd.f32 %v7114_v58, %v6417_v42  ;;  %v6420_v44 = vadd.f32 %v6419_v0, %v6418_v43  ;;  %v7990_v43 = vld [vmem:[%s10197_s2 + $0x18] sm:$0xff]  }
 0x124   : > { %v8946_v45 = vadd.f32 %v7115_v7, %v6420_v44 }
 0x126   : > { %v6449_v46 = vpop.f32.mrb[16].mxu0  ;;  %v7134_v47 = vpop.f32.mrb[8].mxu1  ;;  %v887_v48 = vpack.c.bf16 %v8946_v45, %v8944_v2 }
 0x127   : > { %v6450_v3 = vpop.f32.mrb[17].mxu0  ;;  %v1084_v50 = vpop.f32.mrb[9].mxu1 }
 0x128   : > { %v6451_v53 = vadd.f32 %v6450_v3, %v6449_v46  ;;  %v6452_v5 = vpop.f32.mrb[18].mxu0  ;;  %v7135_v54 = vpop.f32.mrb[10].mxu1 }
 0x129   : > { %v6453_v57 = vpop.f32.mrb[19].mxu0  ;;  %v1087_v58 = vpop.f32.mrb[11].mxu1 }
 0x12a   : > { %v6454_v61 = vadd.f32 %v6453_v57, %v6452_v5  ;;  %v1085_v6 = vadd.f32 %v6451_v53, %v1084_v50  ;;  %v7992_v53 = vld [vmem:[%s10197_s2 + $0x28] sm:$0xff]  }
 0x12c   : > { %v1088_v62 = vadd.f32 %v6454_v61, %v1087_v58 }
 0x12e   : > { %v1115_v8 = vpack.c.bf16 %v1088_v62, %v1085_v6  ;;  %v6455_v1 = vpop.f32.mrb[20].mxu0  ;;  %v7138_v4 = vpop.f32.mrb[12].mxu1  ;;  %v7993_v6 = vld [vmem:[%s10197_s2 + $0x30] sm:$0xff]  }
 0x12f   : > { %v6456_v7 = vpop.f32.mrb[21].mxu0  ;;  %v1100_v10 = vpop.f32.mrb[13].mxu1 }
 0x130   : > { %v6457_v13 = vadd.f32 %v6456_v7, %v6455_v1  ;;  %v6458_v21 = vpop.f32.mrb[22].mxu0  ;;  %7156 = vmatprep.mubr.bf16.mxu0 %v1115_v8  ;;  %v7139_v9 = vpop.f32.mrb[14].mxu1  ;;  %v7994_v8 = vld [vmem:[%s10197_s2 + $0x38] sm:$0xff]  }
 0x131   : > { %v6459_v23 = vpop.f32.mrb[23].mxu0  ;;  %v1103_v11 = vpop.f32.mrb[15].mxu1 }
 0x132   : > { %v1093_v24 = vadd.f32 %v7134_v47, %v6457_v13  ;;  %v6460_v26 = vadd.f32 %v6459_v23, %v6458_v21  ;;  %v7991_v47 = vld [vmem:[%s10197_s2 + $0x20] sm:$0xff]   ;;  %v7999_v13 = vld [vmem:[%s10197_s2 + $0x88] sm:$0xff]  }
 0x134   : > { %v1096_v12 = vadd.f32 %v7135_v54, %v6460_v26  ;;  %v8002_v26 = vld [vmem:[%s10197_s2 + $0x90] sm:$0xff]  }
 0x136   : > { %v1116_v14 = vpack.c.bf16 %v1096_v12, %v1093_v24  ;;  %v6461_v27 = vpop.f32.mrb[24].mxu0 }
 0x137   : > { %v6462_v29 = vpop.f32.mrb[25].mxu0 }
 0x138   : > { %7157 = vmatmul.mubr.bf16.vlgmr.msra.gmra.mrb[32].mxu0 %v1116_v14  ;;  %v6463_v15 = vadd.f32 %v6462_v29, %v6461_v27  ;;  %v6464_v30 = vpop.f32.mrb[26].mxu0  ;;  %v8007_v27 = vld [vmem:[%s10197_s2 + $0xa0] sm:$0xff]   ;;  %v8009_v29 = vld [vmem:[%s10197_s2 + $0xa8] sm:$0xff]  }
 0x139   : > { %7165 = vmatpush3.bf16.msra.mxu0 %v8801_v20  ;;  %v6465_v17 = vpop.f32.mrb[27].mxu0 }
 0x13a   : > { %7166 = vmatprep.subr.bf16.mxu0 %v7988_v28  ;;  %v6466_v33 = vadd.f32 %v6465_v17, %v6464_v30  ;;  %v1101_v40 = vadd.f32 %v6463_v15, %v1100_v10 }
 0x13c   : > { %v1104_v18 = vadd.f32 %v6466_v33, %v1103_v11 }
 0x13d   : > { %7167 = vmatpush3.bf16.msra.mxu0 %v7988_v28 }
 0x13e   : > { %v6467_v41 = vpop.f32.mrb[28].mxu0  ;;  %7168 = vmatprep.subr.bf16.mxu0 %v7989_v59  ;;  %v1117_v42 = vpack.c.bf16 %v1104_v18, %v1101_v40  ;;  %v8012_v40 = vld [vmem:[%s10197_s2 + $0xb0] sm:$0xff]  }
 0x13f   : > { %v6468_v60 = vpop.f32.mrb[29].mxu0 }
 0x140   : > { %v6469_v63 = vadd.f32 %v6468_v60, %v6467_v41  ;;  %v6470_v20 = vpop.f32.mrb[30].mxu0  ;;  %7160 = vmatprep.mubr.bf16.mxu0 %v1117_v42  ;;  %v8014_v42 = vld [vmem:[%s10197_s2 + $0xb8] sm:$0xff]  }
 0x141   : > { %7169 = vmatpush3.bf16.msra.mxu0 %v7989_v59  ;;  %v6471_v0 = vpop.f32.mrb[31].mxu0 }
 0x142   : > { %v1109_v44 = vadd.f32 %v7138_v4, %v6469_v63  ;;  %v6472_v46 = vadd.f32 %v6471_v0, %v6470_v20  ;;  %7170 = vmatprep.subr.bf16.mxu0 %v7990_v43 }
 0x144   : > { %v1112_v3 = vadd.f32 %v7139_v9, %v6472_v46 }
 0x145   : > { %7171 = vmatpush3.bf16.msra.mxu0 %v7990_v43 }
 0x146   : > { %7172 = vmatprep.subr.bf16.mxu0 %v7991_v47  ;;  %v1118_v50 = vpack.c.bf16 %v1112_v3, %v1109_v44  ;;  %v6525_v5 = vpop.f32.mrb[16].mxu1 }
 0x147   : > { %v6526_v54 = vpop.f32.mrb[17].mxu1 }
 0x148   : > { %7161 = vmatmul.mubr.bf16.gmra.mrb[36].mxu0 %v1118_v50  ;;  %v6527_v57 = vadd.f32 %v6526_v54, %v6525_v5  ;;  %v6528_v58 = vpop.f32.mrb[18].mxu1  ;;  %v8027_v50 = vld [vmem:[%s10196_s1 + $0x128] ss:$12 sps:$4 sm:$0xff]   ;;  %v8029_v5 = vld [vmem:[%s10196_s1 + $0x140] ss:$12 sps:$4 sm:$0xff]  }
 0x149   : > { %7173 = vmatpush3.bf16.msra.mxu0 %v7991_v47  ;;  %7180 = vmatprep.mubr.bf16.mxu0 %v884_v56  ;;  %v6529_v61 = vpop.f32.mrb[19].mxu1  ;;  %v8031_v54 = vld [vmem:[%s10196_s1 + $0x158] ss:$12 sps:$4 sm:$0xff]  }
 0x14a   : > { %7174 = vmatprep.subr.bf16.mxu0 %v7992_v53  ;;  %v6530_v62 = vadd.f32 %v6529_v61, %v6528_v58  ;;  %v8037_v58 = vld [vmem:[%s10197_s2 + $0xd0] sm:$0xff]  }
 0x14b   : > { %v8032_v61 = vld [vmem:[%s10196_s1 + $0x170] ss:$12 sps:$4 sm:$0xff]  }
 0x14d   : > { %7175 = vmatpush3.bf16.msra.mxu0 %v7992_v53  ;;  %v8035_v53 = vld [vmem:[%s10197_s2 + $0xc0] sm:$0xff]  }
 0x14e   : > { %7176 = vmatprep.subr.bf16.mxu0 %v7993_v6  ;;  %v6531_v1 = vpop.f32.mrb[20].mxu1 }
 0x14f   : > { %v6532_v4 = vpop.f32.mrb[21].mxu1 }
 0x150   : > { %v6533_v7 = vadd.f32 %v6532_v4, %v6531_v1  ;;  %v6534_v10 = vpop.f32.mrb[22].mxu1 }
 0x151   : > { %7177 = vmatpush3.bf16.msra.mxu0 %v7993_v6  ;;  %v6535_v51 = vpop.f32.mrb[23].mxu1  ;;  %v8038_v6 = vld [vmem:[%s10197_s2 + $0xd8] sm:$0xff]  }
 0x152   : > { %7178 = vmatprep.subr.bf16.mxu0 %v7994_v8  ;;  %v6536_v56 = vadd.f32 %v6535_v51, %v6534_v10 }
 0x155   : > { %7179 = vmatpush3.bf16.msra.mxu0 %v7994_v8  ;;  %v8040_v8 = vld [vmem:[%s10197_s2 + $0xe8] sm:$0xff]  }
 0x156   : > { %7212 = vmatprep.subr.bf16.mxu0 %v7998_v52  ;;  %v6537_v21 = vpop.f32.mrb[24].mxu1 }
 0x157   : > { %v6538_v9 = vpop.f32.mrb[25].mxu1 }
 0x158   : > { %7181 = vmatmul.mubr.bf16.vlgmr.msra.gmra.mrb[32].mxu0 %v885_v25  ;;  %v6539_v23 = vadd.f32 %v6538_v9, %v6537_v21  ;;  %v6540_v11 = vpop.f32.mrb[26].mxu1 }
 0x159   : > { %7184 = vmatprep.mubr.bf16.mxu0 %v886_v38  ;;  %7213 = vmatpush3.bf16.msra.mxu0 %v7998_v52  ;;  %v6541_v24 = vpop.f32.mrb[27].mxu1 }
 0x15a   : > { %7214 = vmatprep.subr.bf16.mxu0 %v7999_v13  ;;  %v6542_v12 = vadd.f32 %v6541_v24, %v6540_v11 }
 0x15d   : > { %7215 = vmatpush3.bf16.msra.mxu0 %v7999_v13 }
 0x15e   : > { %7216 = vmatprep.subr.bf16.mxu0 %v8002_v26  ;;  %v6543_v14 = vpop.f32.mrb[28].mxu1 }
 0x15f   : > { %v6544_v22 = vpop.f32.mrb[29].mxu1 }
 0x160   : > { %7185 = vmatmul.mubr.bf16.gmra.mrb[36].mxu0 %v887_v48  ;;  %v6545_v25 = vadd.f32 %v6544_v22, %v6543_v14  ;;  %v6546_v34 = vpop.f32.mrb[30].mxu1 }
 0x161   : > { %7217 = vmatpush3.bf16.msra.mxu0 %v8002_v26  ;;  %v6547_v37 = vpop.f32.mrb[31].mxu1 }
 0x162   : > { %7218 = vmatprep.subr.bf16.mxu0 %v8004_v19  ;;  %v6548_v38 = vadd.f32 %v6547_v37, %v6546_v34 }
 0x165   : > { %7219 = vmatpush3.bf16.msra.mxu0 %v8004_v19 }
 0x166   : > { %v7206_v28 = vpop.f32.mrb[32].mxu1  ;;  %7220 = vmatprep.subr.bf16.mxu0 %v8007_v27 }
 0x167   : > { %v1551_v15 = vadd.f32 %v7206_v28, %v6533_v7  ;;  %v1542_v2 = vpop.f32.mrb[33].mxu1 }
 0x168   : > { %v1543_v45 = vadd.f32 %v6527_v57, %v1542_v2  ;;  %v7207_v48 = vpop.f32.mrb[34].mxu1  ;;  %v8036_v57 = vld [vmem:[%s10197_s2 + $0xc8] sm:$0xff]  }
 0x169   : > { %v1554_v30 = vadd.f32 %v7207_v48, %v6536_v56  ;;  %7221 = vmatpush3.bf16.msra.mxu0 %v8007_v27  ;;  %v1545_v17 = vpop.f32.mrb[35].mxu1 }
 0x16a   : > { %v1546_v33 = vadd.f32 %v6530_v62, %v1545_v17  ;;  %7222 = vmatprep.subr.bf16.mxu0 %v8009_v29  ;;  %v8039_v62 = vld [vmem:[%s10197_s2 + $0xe0] sm:$0xff]  }
 0x16b   : > { %v1574_v59 = vpack.c.bf16 %v1554_v30, %v1551_v15 }
 0x16c   : > { %v1573_v18 = vpack.c.bf16 %v1546_v33, %v1543_v45 }
 0x16d   : > { %7223 = vmatpush3.bf16.msra.mxu0 %v8009_v29 }
 0x16e   : > { %v7210_v41 = vpop.f32.mrb[36].mxu1  ;;  %7228 = vmatprep.mubr.bf16.mxu0 %v1573_v18  ;;  %7224 = vmatprep.subr.bf16.mxu0 %v8012_v40 }
 0x16f   : > { %v1567_v43 = vadd.f32 %v7210_v41, %v6545_v25  ;;  %v1558_v60 = vpop.f32.mrb[37].mxu1 }
 0x170   : > { %v1559_v63 = vadd.f32 %v6539_v23, %v1558_v60  ;;  %v7211_v20 = vpop.f32.mrb[38].mxu1 }
 0x171   : > { %v1570_v0 = vadd.f32 %v7211_v20, %v6548_v38  ;;  %7225 = vmatpush3.bf16.msra.mxu0 %v8012_v40  ;;  %v1561_v44 = vpop.f32.mrb[39].mxu1 }
 0x172   : > { %v1562_v46 = vadd.f32 %v6542_v12, %v1561_v44  ;;  %7226 = vmatprep.subr.bf16.mxu0 %v8014_v42 }
 0x173   : > { %v1576_v47 = vpack.c.bf16 %v1570_v0, %v1567_v43 }
 0x174   : > { %v1575_v3 = vpack.c.bf16 %v1562_v46, %v1559_v63 }
 0x175   : > { %7227 = vmatpush3.bf16.msra.mxu0 %v8014_v42 }
 0x176   : > { %7236 = vmatprep.subr.bf16.mxu0 %v8850_v31 }
 0x178   : > { %7229 = vmatmul.mubr.bf16.vlgmr.msra.gmra.mrb[32].mxu0 %v1574_v59 }
 0x179   : > { %7232 = vmatprep.mubr.bf16.mxu0 %v1575_v3  ;;  %7237 = vmatpush3.bf16.msra.mxu0 %v8850_v31 }
 0x17a   : > { %7238 = vmatprep.subr.bf16.mxu0 %v8855_v32 }
 0x17d   : > { %7239 = vmatpush3.bf16.msra.mxu0 %v8855_v32 }
 0x17e   : > { %7240 = vmatprep.subr.bf16.mxu0 %v8866_v35 }
 0x180   : > { %7233 = vmatmul.mubr.bf16.gmra.mrb[36].mxu0 %v1576_v47 }
 0x181   : > { %7241 = vmatpush3.bf16.msra.mxu0 %v8866_v35  ;;  %7252 = vmatprep.mubr.bf16.mxu0 %v8027_v50 }
 0x182   : > { %7242 = vmatprep.subr.bf16.mxu0 %v8871_v36 }
 0x185   : > { %7243 = vmatpush3.bf16.msra.mxu0 %v8871_v36 }
 0x186   : > { %7244 = vmatprep.subr.bf16.mxu0 %v8882_v39  ;;  %v6589_v1 = vpop.f32.mrb[40].mxu1 }
 0x187   : > { %v6590_v4 = vpop.f32.mrb[41].mxu1 }
 0x188   : > { %v9064_v7 = vadd.f32 %v6590_v4, %v6589_v1  ;;  %v6592_v10 = vpop.f32.mrb[42].mxu1  ;;  %v8045_v4 = vld [vmem:[%s10196_s1 + $0x1e4] ss:$12 sps:$4 sm:$0xff]  }
 0x189   : > { %7245 = vmatpush3.bf16.msra.mxu0 %v8882_v39  ;;  %v6593_v51 = vpop.f32.mrb[43].mxu1  ;;  %2534 = vmatprep.mubr.bf16.mxu1 %v8045_v4  ;;  %v8076_v4 = vld [vmem:[%s10196_s1 + $0x248] ss:$12 sps:$4 sm:$0xff]  }
 0x18a   : > { %7246 = vmatprep.subr.bf16.mxu0 %v8887_v49  ;;  %v9066_v52 = vadd.f32 %v6593_v51, %v6592_v10 }
 0x18d   : > { %7247 = vmatpush3.bf16.msra.mxu0 %v8887_v49 }
 0x18e   : > { %7248 = vmatprep.subr.bf16.mxu0 %v8902_v55  ;;  %v6595_v56 = vpop.f32.mrb[44].mxu1 }
 0x18f   : > { %v6596_v13 = vpop.f32.mrb[45].mxu1 }
 0x190   : > { %v9068_v21 = vadd.f32 %v6596_v13, %v6595_v56  ;;  %v6598_v9 = vpop.f32.mrb[46].mxu1  ;;  %v8043_v56 = vld [vmem:[%s10196_s1 + $0x1e0] ss:$12 sps:$4 sm:$0xff]  }
 0x191   : > { %7249 = vmatpush3.bf16.msra.mxu0 %v8902_v55  ;;  %v6599_v23 = vpop.f32.mrb[47].mxu1  ;;  %v9105_v13 = vld [vmem:[%s10197_s2 + $0x100] sm:$0xff]   ;;  %2535 = vmatmul.mubr.bf16.vlgmr.msra.gmra.mrb[80].mxu1 %v8043_v56 }
 0x192   : > { %7250 = vmatprep.subr.bf16.mxu0 %v8909_v16  ;;  %v9070_v11 = vadd.f32 %v6599_v23, %v6598_v9  ;;  %v9111_v23 = vld [vmem:[%s8437_s22] sm:$0xff]  }
 0x193   : > { %6766 = vmatpush3.bf16.msra.mxu1 %v9111_v23  ;;  %v8078_v56 = vld [vmem:[%s10196_s1 + $0x260] ss:$12 sps:$4 sm:$0xff]  }
 0x195   : > { %7251 = vmatpush3.bf16.msra.mxu0 %v8909_v16 }
 0x196   : > { %7260 = vmatprep.subr.bf16.mxu0 %v8035_v53  ;;  %v6601_v24 = vpop.f32.mrb[48].mxu1 }
 0x197   : > { %v6602_v26 = vpop.f32.mrb[49].mxu1 }
 0x198   : > { %7253 = vmatmul.mubr.bf16.vlgmr.msra.gmra.mrb[40].mxu0 %v8029_v5  ;;  %v9072_v12 = vadd.f32 %v6602_v26, %v6601_v24  ;;  %v6604_v14 = vpop.f32.mrb[50].mxu1  ;;  %v8041_v5 = vld [vmem:[%s10197_s2 + $0xf0] sm:$0xff]   ;;  %v9115_v24 = vld [vmem:[%s8437_s22 + $0x48] sm:$0xff]  }
 0x199   : > { %7256 = vmatprep.mubr.bf16.mxu0 %v8031_v54  ;;  %7261 = vmatpush3.bf16.msra.mxu0 %v8035_v53  ;;  %v6605_v19 = vpop.f32.mrb[51].mxu1  ;;  %v9119_v26 = vld [vmem:[%s8437_s22 + $0x8] sm:$0xff]  }
 0x19a   : > { %7262 = vmatprep.subr.bf16.mxu0 %v8036_v57  ;;  %v9074_v22 = vadd.f32 %v6605_v19, %v6604_v14  ;;  %6767 = vmatprep.subr.bf16.mxu1 %v9115_v24  ;;  %v8048_v14 = vld [vmem:[%s10196_s1 + $0x1fc] ss:$12 sps:$4 sm:$0xff]   ;;  %v9126_v19 = vld [vmem:[%s8437_s22 + $0x50] sm:$0xff]  }
 0x19b   : > { %6768 = vmatpush3.bf16.msra.mxu1 %v9119_v26  ;;  %2542 = vmatprep.mubr.bf16.mxu1 %v8048_v14  ;;  %v8323_v14 = vld [vmem:[%s8437_s22 + $0x40] sm:$0xff]  }
 0x19c   : > { %6769 = vmatprep.subr.bf16.mxu1 %v9126_v19 }
 0x19d   : > { %7263 = vmatpush3.bf16.msra.mxu0 %v8036_v57 }
 0x19e   : > { %7264 = vmatprep.subr.bf16.mxu0 %v8037_v58  ;;  %v6607_v25 = vpop.f32.mrb[52].mxu1 }
 0x19f   : > { %v6608_v34 = vpop.f32.mrb[53].mxu1 }
 0x1a0   : > { %7257 = vmatmul.mubr.bf16.gmra.mrb[44].mxu0 %v8032_v61  ;;  %v9076_v37 = vadd.f32 %v6608_v34, %v6607_v25  ;;  %v6610_v38 = vpop.f32.mrb[54].mxu1  ;;  %v8051_v25 = vld [vmem:[%s10196_s1 + $0x1f8] ss:$12 sps:$4 sm:$0xff]  }
 0x1a1   : > { %7265 = vmatpush3.bf16.msra.mxu0 %v8037_v58  ;;  %v6611_v27 = vpop.f32.mrb[55].mxu1  ;;  %2543 = vmatmul.mubr.bf16.gmra.mrb[84].mxu1 %v8051_v25  ;;  %v8081_v25 = vld [vmem:[%s10196_s1 + $0x278] ss:$12 sps:$4 sm:$0xff]  }
 0x1a2   : > { %7266 = vmatprep.subr.bf16.mxu0 %v8038_v6  ;;  %v9078_v28 = vadd.f32 %v6611_v27, %v6610_v38 }
 0x1a5   : > { %7267 = vmatpush3.bf16.msra.mxu0 %v8038_v6 }
 0x1a6   : > { %7268 = vmatprep.subr.bf16.mxu0 %v8039_v62  ;;  %v6653_v29 = vpop.f32.mrb[56].mxu1 }
 0x1a7   : > { %v6654_v15 = vpop.f32.mrb[57].mxu1 }
 0x1a8   : > { %v6655_v2 = vadd.f32 %v6654_v15, %v6653_v29  ;;  %v6656_v45 = vpop.f32.mrb[58].mxu1  ;;  %v9135_v29 = vld [vmem:[%s8437_s22 + $0x10] sm:$0xff]  }
 0x1a9   : > { %7269 = vmatpush3.bf16.msra.mxu0 %v8039_v62  ;;  %v6657_v48 = vpop.f32.mrb[59].mxu1  ;;  %6770 = vmatpush3.bf16.msra.mxu1 %v9135_v29 }
 0x1aa   : > { %7270 = vmatprep.subr.bf16.mxu0 %v8040_v8  ;;  %v6658_v30 = vadd.f32 %v6657_v48, %v6656_v45  ;;  %v9141_v45 = vld [vmem:[%s8437_s22 + $0x58] sm:$0xff]  }
 0x1ab   : > { %6771 = vmatprep.subr.bf16.mxu1 %v9141_v45 }
 0x1ad   : > { %7271 = vmatpush3.bf16.msra.mxu0 %v8040_v8  ;;  %v8042_v8 = vld [vmem:[%s10197_s2 + $0xf8] sm:$0xff]  }
 0x1ae   : > { %v6659_v17 = vpop.f32.mrb[60].mxu1  ;;  %7272 = vmatprep.subr.bf16.mxu0 %v8041_v5 }
 0x1af   : > { %v6660_v33 = vpop.f32.mrb[61].mxu1 }
 0x1b0   : > { %v6661_v40 = vadd.f32 %v6660_v33, %v6659_v17  ;;  %v6662_v59 = vpop.f32.mrb[62].mxu1 }
 0x1b1   : > { %v6663_v18 = vpop.f32.mrb[63].mxu1  ;;  %7273 = vmatpush3.bf16.msra.mxu0 %v8041_v5  ;;  %v8066_v5 = vld [vmem:[%s10196_s1 + $0x25c] ss:$12 sps:$4 sm:$0xff]  }
 0x1b2   : > { %v6664_v41 = vadd.f32 %v6663_v18, %v6662_v59  ;;  %7274 = vmatprep.subr.bf16.mxu0 %v8042_v8  ;;  %v8053_v59 = vld [vmem:[%s10196_s1 + $0x214] ss:$12 sps:$4 sm:$0xff]  }
 0x1b3   : > { %2550 = vmatprep.mubr.bf16.mxu1 %v8053_v59 }
 0x1b5   : > { %7275 = vmatpush3.bf16.msra.mxu0 %v8042_v8  ;;  %v8074_v8 = vld [vmem:[%s10196_s1 + $0x288] ss:$12 sps:$4 sm:$0xff]  }
 0x1b6   : > { %v6665_v42 = vpop.f32.mrb[64].mxu1  ;;  %7308 = vmatprep.subr.bf16.mxu0 %v9105_v13 }
 0x1b7   : > { %v6666_v43 = vpop.f32.mrb[65].mxu1 }
 0x1b8   : > { %v6667_v60 = vadd.f32 %v6666_v43, %v6665_v42  ;;  %v6668_v63 = vpop.f32.mrb[66].mxu1  ;;  %v9163_v42 = vld [vmem:[%s8437_s22 + $0x60] sm:$0xff]  }
 0x1b9   : > { %v6669_v20 = vpop.f32.mrb[67].mxu1  ;;  %v9167_v43 = vld [vmem:[%s8437_s22 + $0x20] sm:$0xff]  }
 0x1ba   : > { %v6670_v0 = vadd.f32 %v6669_v20, %v6668_v63  ;;  %v9175_v63 = vld [vmem:[%s8437_s22 + $0x28] sm:$0xff]  }
 0x1bb   : > { %v8058_v20 = vld [vmem:[%s10196_s1 + $0x22c] ss:$12 sps:$4 sm:$0xff]  }
 0x1be   : > { %v6671_v44 = vpop.f32.mrb[68].mxu1 }
 0x1bf   : > { %v6672_v46 = vpop.f32.mrb[69].mxu1 }
 0x1c0   : > { %v6673_v47 = vadd.f32 %v6672_v46, %v6671_v44  ;;  %v6674_v3 = vpop.f32.mrb[70].mxu1  ;;  %v9185_v44 = vld [vmem:[%s8437_s22 + $0x70] sm:$0xff]  }
 0x1c1   : > { %v6675_v50 = vpop.f32.mrb[71].mxu1  ;;  %v9189_v46 = vld [vmem:[%s8437_s22 + $0x30] sm:$0xff]  }
 0x1c2   : > { %v6676_v53 = vadd.f32 %v6675_v50, %v6674_v3  ;;  %v9197_v3 = vld [vmem:[%s8437_s22 + $0x38] sm:$0xff]   ;;  %v8065_v50 = vld [vmem:[%s10196_s1 + $0x244] ss:$12 sps:$4 sm:$0xff]  }
 0x1c6   : > { %v7302_v54 = vpop.f32.mrb[72].mxu1 }
 0x1c7   : > { %v2248_v57 = vpop.f32.mrb[73].mxu1  ;;  %v9083_v58 = vadd.f32 %v7302_v54, %v6661_v40  ;;  %v9151_v40 = vld [vmem:[%s8437_s22 + $0x18] sm:$0xff]  }
 0x1c8   : > { %v7303_v61 = vpop.f32.mrb[74].mxu1  ;;  %v9085_v6 = vadd.f32 %v6655_v2, %v2248_v57  ;;  %6772 = vmatpush3.bf16.msra.mxu1 %v9151_v40  ;;  %v8068_v54 = vld [vmem:[%s10196_s1 + $0x258] ss:$12 sps:$4 sm:$0xff]   ;;  %v8069_v57 = vld [vmem:[%s10196_s1 + $0x274] ss:$12 sps:$4 sm:$0xff]  }
 0x1c9   : > { %v2251_v62 = vpop.f32.mrb[75].mxu1  ;;  %v9095_v10 = vadd.f32 %v7303_v61, %v6664_v41  ;;  %v8056_v41 = vld [vmem:[%s10196_s1 + $0x210] ss:$12 sps:$4 sm:$0xff]   ;;  %6773 = vmatprep.subr.bf16.mxu1 %v9163_v42 }
 0x1ca   : > { %v9090_v1 = vadd.f32 %v6658_v30, %v2251_v62  ;;  %2551 = vmatmul.mubr.bf16.gmra.mrb[88].mxu1 %v8056_v41  ;;  %v8071_v61 = vld [vmem:[%s10196_s1 + $0x270] ss:$12 sps:$4 sm:$0xff]   ;;  %v8072_v62 = vld [vmem:[%s10196_s1 + $0x28c] ss:$12 sps:$4 sm:$0xff]  }
 0x1cb   : > { %v2280_v9 = vpack.c.bf16 %v9095_v10, %v9083_v58  ;;  %2558 = vmatprep.mubr.bf16.mxu1 %v8058_v20  ;;  %v8088_v58 = vld [vmem:[%s10197_s2 + $0x168] sm:$0xff]  }
 0x1cc   : > { %v2279_v51 = vpack.c.bf16 %v9090_v1, %v9085_v6  ;;  %6774 = vmatpush3.bf16.msra.mxu1 %v9167_v43  ;;  %v8062_v6 = vld [vmem:[%s10197_s2 + $0x138] sm:$0xff]   ;;  %v8075_v1 = vld [vmem:[%s10196_s1 + $0x1e8] ss:$12 sps:$4 sm:$0xff]  }
 0x1ce   : > { %v7306_v34 = vpop.f32.mrb[76].mxu1 }
 0x1cf   : > { %v9132_v38 = vadd.f32 %v7306_v34, %v6673_v47  ;;  %v2264_v27 = vpop.f32.mrb[77].mxu1  ;;  %v9193_v47 = vld [vmem:[%s8437_s22 + $0x78] sm:$0xff]  }
 0x1d0   : > { %v9138_v15 = vadd.f32 %v6667_v60, %v2264_v27  ;;  %v7307_v2 = vpop.f32.mrb[78].mxu1  ;;  %v9171_v60 = vld [vmem:[%s8437_s22 + $0x68] sm:$0xff]   ;;  %v8082_v34 = vld [vmem:[%s10196_s1 + $0x290] ss:$12 sps:$4 sm:$0xff]  }
 0x1d1   : > { %v9144_v48 = vadd.f32 %v7307_v2, %v6676_v53  ;;  %v2267_v30 = vpop.f32.mrb[79].mxu1  ;;  %6775 = vmatprep.subr.bf16.mxu1 %v9171_v60  ;;  %v8063_v53 = vld [vmem:[%s10196_s1 + $0x240] ss:$12 sps:$4 sm:$0xff]  }
 0x1d2   : > { %v9146_v17 = vadd.f32 %v6670_v0, %v2267_v30  ;;  %6776 = vmatpush3.bf16.msra.mxu1 %v9175_v63  ;;  %v8061_v0 = vld [vmem:[%s10196_s1 + $0x228] ss:$12 sps:$4 sm:$0xff]  }
 0x1d3   : > { %v2282_v33 = vpack.c.bf16 %v9144_v48, %v9132_v38  ;;  %6777 = vmatprep.subr.bf16.mxu1 %v9185_v44  ;;  %2559 = vmatmul.mubr.bf16.gmra.mrb[92].mxu1 %v8061_v0 }
 0x1d4   : > { %v2281_v18 = vpack.c.bf16 %v9146_v17, %v9138_v15  ;;  %2887 = vmatprep.mubr.bf16.mxu1 %v8065_v50 }
 0x1d6   : > { %6778 = vmatpush3.bf16.msra.mxu1 %v9189_v46 }
 0x1d7   : > { %6779 = vmatprep.subr.bf16.mxu1 %v9193_v47 }
 0x1da   : > { %6780 = vmatpush3.bf16.msra.mxu1 %v9197_v3 }
 0x1db   : > { %7380 = vmatprep.subr.bf16.mxu1 %v8850_v31 }
 0x1dd   : > { %2888 = vmatmul.mubr.bf16.vlgmr.msra.gmra.mrb[96].mxu1 %v8063_v53 }
 0x1de   : > { %7381 = vmatpush3.bf16.msra.mxu1 %v8850_v31  ;;  %2895 = vmatprep.mubr.bf16.mxu1 %v8066_v5 }
 0x1df   : > { %7382 = vmatprep.subr.bf16.mxu1 %v8855_v32 }
 0x1e2   : > { %7383 = vmatpush3.bf16.msra.mxu1 %v8855_v32 }
 0x1e3   : > { %7384 = vmatprep.subr.bf16.mxu1 %v8866_v35 }
 0x1e5   : > { %2896 = vmatmul.mubr.bf16.gmra.mrb[100].mxu1 %v8068_v54  ;;  %v8047_v54 = vld [vmem:[%s10197_s2 + $0x108] sm:$0xff]  }
 0x1e6   : > { %7385 = vmatpush3.bf16.msra.mxu1 %v8866_v35  ;;  %2903 = vmatprep.mubr.bf16.mxu1 %v8069_v57 }
 0x1e7   : > { %7386 = vmatprep.subr.bf16.mxu1 %v8871_v36 }
 0x1ea   : > { %7387 = vmatpush3.bf16.msra.mxu1 %v8871_v36 }
 0x1eb   : > { %7388 = vmatprep.subr.bf16.mxu1 %v8882_v39 }
 0x1ed   : > { %2904 = vmatmul.mubr.bf16.gmra.mrb[104].mxu1 %v8071_v61 }
 0x1ee   : > { %7389 = vmatpush3.bf16.msra.mxu1 %v8882_v39  ;;  %2911 = vmatprep.mubr.bf16.mxu1 %v8072_v62 }
 0x1ef   : > { %7390 = vmatprep.subr.bf16.mxu1 %v8887_v49 }
 0x1f2   : > { %7391 = vmatpush3.bf16.msra.mxu1 %v8887_v49 }
 0x1f3   : > { %7392 = vmatprep.subr.bf16.mxu1 %v8902_v55 }
 0x1f5   : > { %2912 = vmatmul.mubr.bf16.gmra.mrb[108].mxu1 %v8074_v8  ;;  %v8050_v8 = vld [vmem:[%s10197_s2 + $0x110] sm:$0xff]  }
 0x1f6   : > { %7393 = vmatpush3.bf16.msra.mxu1 %v8902_v55  ;;  %7396 = vmatprep.mubr.bf16.mxu1 %v8076_v4 }
 0x1f7   : > { %7394 = vmatprep.subr.bf16.mxu1 %v8909_v16 }
 0x1fa   : > { %7395 = vmatpush3.bf16.msra.mxu1 %v8909_v16 }
 0x1fb   : > { %6829 = vmatprep.subr.bf16.mxu1 %v8323_v14 }
 0x1fd   : > { %7397 = vmatmul.mubr.bf16.vlgmr.msra.gmra.mrb[112].mxu1 %v8078_v56 }
 0x1fe   : > { %6830 = vmatpush3.bf16.msra.mxu1 %v9111_v23  ;;  %7400 = vmatprep.mubr.bf16.mxu1 %v8081_v25 }
 0x1ff   : > { %6831 = vmatprep.subr.bf16.mxu1 %v9115_v24 }
 0x202   : > { %6832 = vmatpush3.bf16.msra.mxu1 %v9119_v26 }
 0x203   : > { %6833 = vmatprep.subr.bf16.mxu1 %v9126_v19 }
 0x205   : > { %7401 = vmatmul.mubr.bf16.gmra.mrb[116].mxu1 %v8082_v34 }
 0x206   : > { %6834 = vmatpush3.bf16.msra.mxu1 %v9135_v29 }
 0x207   : > { %6835 = vmatprep.subr.bf16.mxu1 %v9141_v45 }
 0x20a   : > { %6836 = vmatpush3.bf16.msra.mxu1 %v9151_v40 }
 0x20b   : > { %6837 = vmatprep.subr.bf16.mxu1 %v9163_v42 }
 0x20e   : > { %6838 = vmatpush3.bf16.msra.mxu1 %v9167_v43 }
 0x20f   : > { %6839 = vmatprep.subr.bf16.mxu1 %v9171_v60 }
 0x212   : > { %6840 = vmatpush3.bf16.msra.mxu1 %v9175_v63 }
 0x213   : > { %6841 = vmatprep.subr.bf16.mxu1 %v9185_v44 }
 0x216   : > { %6842 = vmatpush3.bf16.msra.mxu1 %v9189_v46 }
 0x217   : > { %6843 = vmatprep.subr.bf16.mxu1 %v9193_v47 }
 0x21a   : > { %6844 = vmatpush3.bf16.msra.mxu1 %v9197_v3 }
 0x21b   : > { %6893 = vmatprep.subr.bf16.mxu1 %v8323_v14 }
 0x264   : > { %v6717_v10 = vpop.f32.mrb[80].mxu1 }
 0x26b   : > { %v7254_v27 = vpop.f32.mrb[40].mxu0 }
 0x26c   : > { %v1904_v2 = vadd.f32 %v7254_v27, %v9068_v21  ;;  %v1895_v30 = vpop.f32.mrb[41].mxu0 }
 0x26d   : > { %v1896_v59 = vadd.f32 %v9064_v7, %v1895_v30  ;;  %v7255_v41 = vpop.f32.mrb[42].mxu0 }
 0x26e   : > { %v1907_v20 = vadd.f32 %v7255_v41, %v9070_v11  ;;  %v1898_v0 = vpop.f32.mrb[43].mxu0 }
 0x26f   : > { %v1899_v50 = vadd.f32 %v9066_v52, %v1898_v0 }
 0x270   : > { %v1927_v53 = vpack.c.bf16 %v1907_v20, %v1904_v2 }
 0x271   : > { %v1926_v5 = vpack.c.bf16 %v1899_v50, %v1896_v59 }
 0x273   : > { %v7258_v57 = vpop.f32.mrb[44].mxu0  ;;  %7276 = vmatprep.mubr.bf16.mxu0 %v1926_v5 }
 0x274   : > { %v1920_v61 = vadd.f32 %v7258_v57, %v9076_v37  ;;  %v1911_v21 = vpop.f32.mrb[45].mxu0  ;;  %7277 = vmatmul.mubr.bf16.vlgmr.msra.gmra.mrb[32].mxu0 %v1927_v53  ;;  %v8057_v37 = vld [vmem:[%s10197_s2 + $0x128] sm:$0xff]  }
 0x275   : > { %v1912_v7 = vadd.f32 %v9072_v12, %v1911_v21  ;;  %7309 = vmatpush3.bf16.msra.mxu0 %v9105_v13  ;;  %v7259_v11 = vpop.f32.mrb[46].mxu0  ;;  %v8052_v12 = vld [vmem:[%s10197_s2 + $0x118] sm:$0xff]  }
 0x276   : > { %v1923_v62 = vadd.f32 %v7259_v11, %v9078_v28  ;;  %v1914_v52 = vpop.f32.mrb[47].mxu0  ;;  %7310 = vmatprep.subr.bf16.mxu0 %v8047_v54  ;;  %v8060_v28 = vld [vmem:[%s10197_s2 + $0x130] sm:$0xff]  }
 0x277   : > { %v1915_v4 = vadd.f32 %v9074_v22, %v1914_v52  ;;  %v8055_v22 = vld [vmem:[%s10197_s2 + $0x120] sm:$0xff]  }
 0x278   : > { %v1929_v56 = vpack.c.bf16 %v1923_v62, %v1920_v61 }
 0x279   : > { %v1928_v14 = vpack.c.bf16 %v1915_v4, %v1912_v7  ;;  %7311 = vmatpush3.bf16.msra.mxu0 %v8047_v54 }
 0x27a   : > { %7312 = vmatprep.subr.bf16.mxu0 %v8050_v8 }
 0x27b   : > { %7280 = vmatprep.mubr.bf16.mxu0 %v1928_v14 }
 0x27c   : > { %7281 = vmatmul.mubr.bf16.gmra.mrb[36].mxu0 %v1929_v56 }
 0x27d   : > { %7313 = vmatpush3.bf16.msra.mxu0 %v8050_v8  ;;  %7324 = vmatprep.mubr.bf16.mxu0 %v2279_v51  ;;  %v6718_v51 = vpop.f32.mrb[81].mxu1 }
 0x27e   : > { %7314 = vmatprep.subr.bf16.mxu0 %v8052_v12  ;;  %v9356_v13 = vadd.f32 %v6718_v51, %v6717_v10 }
 0x281   : > { %7315 = vmatpush3.bf16.msra.mxu0 %v8052_v12 }
 0x282   : > { %7316 = vmatprep.subr.bf16.mxu0 %v8055_v22 }
 0x285   : > { %7317 = vmatpush3.bf16.msra.mxu0 %v8055_v22 }
 0x286   : > { %7318 = vmatprep.subr.bf16.mxu0 %v8057_v37 }
 0x289   : > { %7319 = vmatpush3.bf16.msra.mxu0 %v8057_v37 }
 0x28a   : > { %7320 = vmatprep.subr.bf16.mxu0 %v8060_v28 }
 0x28d   : > { %7321 = vmatpush3.bf16.msra.mxu0 %v8060_v28 }
 0x28e   : > { %7322 = vmatprep.subr.bf16.mxu0 %v8062_v6 }
 0x291   : > { %7323 = vmatpush3.bf16.msra.mxu0 %v8062_v6 }
 0x292   : > { %7332 = vmatprep.subr.bf16.mxu0 %v8850_v31 }
 0x294   : > { %7325 = vmatmul.mubr.bf16.vlgmr.msra.gmra.mrb[32].mxu0 %v2280_v9  ;;  %v6720_v9 = vpop.f32.mrb[82].mxu1 }
 0x295   : > { %7328 = vmatprep.mubr.bf16.mxu0 %v2281_v18  ;;  %7333 = vmatpush3.bf16.msra.mxu0 %v8850_v31  ;;  %v8083_v31 = vld [vmem:[%s10197_s2 + $0x140] sm:$0xff]   ;;  %v6721_v38 = vpop.f32.mrb[83].mxu1 }
 0x296   : > { %7334 = vmatprep.subr.bf16.mxu0 %v8855_v32  ;;  %v9358_v15 = vadd.f32 %v6721_v38, %v6720_v9  ;;  %v6723_v48 = vpop.f32.mrb[84].mxu1 }
 0x297   : > { %v6724_v17 = vpop.f32.mrb[85].mxu1 }
 0x298   : > { %v6726_v18 = vpop.f32.mrb[86].mxu1 }
 0x299   : > { %7335 = vmatpush3.bf16.msra.mxu0 %v8855_v32  ;;  %v8077_v32 = vld [vmem:[%s10196_s1 + $0x200] ss:$12 sps:$4 sm:$0xff]   ;;  %v6727_v25 = vpop.f32.mrb[87].mxu1 }
 0x29a   : > { %7336 = vmatprep.subr.bf16.mxu0 %v8866_v35  ;;  %v9362_v34 = vadd.f32 %v6727_v25, %v6726_v18  ;;  %v8090_v18 = vld [vmem:[%s10197_s2 + $0x178] sm:$0xff]  }
 0x29c   : > { %7329 = vmatmul.mubr.bf16.gmra.mrb[36].mxu0 %v2282_v33  ;;  %v9360_v33 = vadd.f32 %v6724_v17, %v6723_v48 }
 0x29d   : > { %7337 = vmatpush3.bf16.msra.mxu0 %v8866_v35  ;;  %7348 = vmatprep.mubr.bf16.mxu0 %v8075_v1  ;;  %v8079_v35 = vld [vmem:[%s10196_s1 + $0x218] ss:$12 sps:$4 sm:$0xff]   ;;  %v6729_v27 = vpop.f32.mrb[88].mxu1 }
 0x29e   : > { %7338 = vmatprep.subr.bf16.mxu0 %v8871_v36  ;;  %v6730_v2 = vpop.f32.mrb[89].mxu1 }
 0x29f   : > { %v9364_v30 = vadd.f32 %v6730_v2, %v6729_v27  ;;  %v6732_v59 = vpop.f32.mrb[90].mxu1  ;;  %v8093_v27 = vld [vmem:[%s10196_s1 + $0x2a4] ss:$12 sps:$4 sm:$0xff]   ;;  %v8091_v2 = vld [vmem:[%s10196_s1 + $0x2a0] ss:$12 sps:$4 sm:$0xff]  }
 0x2a0   : > { %v6733_v41 = vpop.f32.mrb[91].mxu1  ;;  %3240 = vmatprep.mubr.bf16.mxu1 %v8093_v27 }
 0x2a1   : > { %7339 = vmatpush3.bf16.msra.mxu0 %v8871_v36  ;;  %v8084_v36 = vld [vmem:[%s10197_s2 + $0x148] sm:$0xff]   ;;  %v9366_v20 = vadd.f32 %v6733_v41, %v6732_v59  ;;  %3241 = vmatmul.mubr.bf16.vlgmr.msra.gmra.mrb[120].mxu1 %v8091_v2 }
 0x2a2   : > { %7340 = vmatprep.subr.bf16.mxu0 %v8882_v39  ;;  %6894 = vmatpush3.bf16.msra.mxu1 %v9111_v23 }
 0x2a3   : > { %6895 = vmatprep.subr.bf16.mxu1 %v9115_v24 }
 0x2a5   : > { %7341 = vmatpush3.bf16.msra.mxu0 %v8882_v39  ;;  %v8085_v39 = vld [vmem:[%s10197_s2 + $0x150] sm:$0xff]  }
 0x2a6   : > { %7342 = vmatprep.subr.bf16.mxu0 %v8887_v49  ;;  %v6735_v0 = vpop.f32.mrb[92].mxu1  ;;  %6896 = vmatpush3.bf16.msra.mxu1 %v9119_v26 }
 0x2a7   : > { %v6736_v50 = vpop.f32.mrb[93].mxu1  ;;  %6897 = vmatprep.subr.bf16.mxu1 %v9126_v19 }
 0x2a8   : > { %v9368_v53 = vadd.f32 %v6736_v50, %v6735_v0  ;;  %v6738_v5 = vpop.f32.mrb[94].mxu1  ;;  %v9397_v0 = vld [vmem:[%s10197_s2 + $0x180] sm:$0xff]  }
 0x2a9   : > { %7343 = vmatpush3.bf16.msra.mxu0 %v8887_v49  ;;  %v8080_v49 = vld [vmem:[%s10196_s1 + $0x230] ss:$12 sps:$4 sm:$0xff]   ;;  %v6739_v54 = vpop.f32.mrb[95].mxu1 }
 0x2aa   : > { %7344 = vmatprep.subr.bf16.mxu0 %v8902_v55  ;;  %v9370_v57 = vadd.f32 %v6739_v54, %v6738_v5  ;;  %v8096_v5 = vld [vmem:[%s10196_s1 + $0x2bc] ss:$12 sps:$4 sm:$0xff]   ;;  %v8098_v54 = vld [vmem:[%s10196_s1 + $0x2b8] ss:$12 sps:$4 sm:$0xff]   ;;  %6898 = vmatpush3.bf16.msra.mxu1 %v9135_v29 }
 0x2ab   : > { %3248 = vmatprep.mubr.bf16.mxu1 %v8096_v5  ;;  %6899 = vmatprep.subr.bf16.mxu1 %v9141_v45  ;;  %v8103_v45 = vld [vmem:[%s10196_s1 + $0x2d0] ss:$12 sps:$4 sm:$0xff]  }
 0x2ac   : > { %3249 = vmatmul.mubr.bf16.gmra.mrb[124].mxu1 %v8098_v54  ;;  %v8099_v54 = vld [vmem:[%s10197_s2 + $0x190] sm:$0xff]  }
 0x2ad   : > { %7345 = vmatpush3.bf16.msra.mxu0 %v8902_v55  ;;  %v8086_v55 = vld [vmem:[%s10197_s2 + $0x158] sm:$0xff]  }
 0x2ae   : > { %7346 = vmatprep.subr.bf16.mxu0 %v8909_v16  ;;  %6900 = vmatpush3.bf16.msra.mxu1 %v9151_v40  ;;  %v8106_v40 = vld [vmem:[%s10196_s1 + $0x2ec] ss:$12 sps:$4 sm:$0xff]  }
 0x2af   : > { %6901 = vmatprep.subr.bf16.mxu1 %v9163_v42  ;;  %v8108_v42 = vld [vmem:[%s10196_s1 + $0x2e8] ss:$12 sps:$4 sm:$0xff]  }
 0x2b0   : > { %v6781_v61 = vpop.f32.mrb[96].mxu1 }
 0x2b1   : > { %7347 = vmatpush3.bf16.msra.mxu0 %v8909_v16  ;;  %v8087_v16 = vld [vmem:[%s10197_s2 + $0x160] sm:$0xff]   ;;  %v6782_v21 = vpop.f32.mrb[97].mxu1 }
 0x2b2   : > { %7356 = vmatprep.subr.bf16.mxu0 %v8083_v31  ;;  %v6783_v7 = vadd.f32 %v6782_v21, %v6781_v61  ;;  %v6784_v11 = vpop.f32.mrb[98].mxu1  ;;  %6902 = vmatpush3.bf16.msra.mxu1 %v9167_v43  ;;  %v8113_v43 = vld [vmem:[%s10196_s1 + $0x304] ss:$12 sps:$4 sm:$0xff]  }
 0x2b3   : > { %v6785_v62 = vpop.f32.mrb[99].mxu1  ;;  %6903 = vmatprep.subr.bf16.mxu1 %v9171_v60  ;;  %v8111_v60 = vld [vmem:[%s10196_s1 + $0x300] ss:$12 sps:$4 sm:$0xff]  }
 0x2b4   : > { %7349 = vmatmul.mubr.bf16.vlgmr.msra.gmra.mrb[48].mxu0 %v8077_v32  ;;  %v6786_v52 = vadd.f32 %v6785_v62, %v6784_v11  ;;  %v8101_v62 = vld [vmem:[%s10196_s1 + $0x2d4] ss:$12 sps:$4 sm:$0xff]  }
 0x2b5   : > { %7352 = vmatprep.mubr.bf16.mxu0 %v8079_v35  ;;  %7357 = vmatpush3.bf16.msra.mxu0 %v8083_v31 }
 0x2b6   : > { %7358 = vmatprep.subr.bf16.mxu0 %v8084_v36  ;;  %3256 = vmatprep.mubr.bf16.mxu1 %v8101_v62 }
 0x2b7   : > { %3257 = vmatmul.mubr.bf16.gmra.mrb[128].mxu1 %v8103_v45 }
 0x2b8   : > { %v6787_v8 = vpop.f32.mrb[100].mxu1  ;;  %6904 = vmatpush3.bf16.msra.mxu1 %v9175_v63  ;;  %3264 = vmatprep.mubr.bf16.mxu1 %v8106_v40  ;;  %v9454_v63 = vld [vmem:[%s8437_s22 + $0x80] sm:$0xff]  }
 0x2b9   : > { %7359 = vmatpush3.bf16.msra.mxu0 %v8084_v36  ;;  %v6788_v4 = vpop.f32.mrb[101].mxu1  ;;  %6905 = vmatprep.subr.bf16.mxu1 %v9185_v44  ;;  %v9459_v44 = vld [vmem:[%s8437_s22 + $0x88] sm:$0xff]  }
 0x2ba   : > { %7360 = vmatprep.subr.bf16.mxu0 %v8085_v39  ;;  %v6789_v56 = vadd.f32 %v6788_v4, %v6787_v8  ;;  %v6790_v14 = vpop.f32.mrb[102].mxu1  ;;  %v9475_v8 = vld [vmem:[%s8437_s22 + $0x98] sm:$0xff]   ;;  %v8117_v4 = vld [vmem:[%s10196_s1 + $0x334] ss:$12 sps:$4 sm:$0xff]  }
 0x2bb   : > { %v6791_v12 = vpop.f32.mrb[103].mxu1 }
 0x2bc   : > { %7353 = vmatmul.mubr.bf16.gmra.mrb[52].mxu0 %v8080_v49  ;;  %v6792_v22 = vadd.f32 %v6791_v12, %v6790_v14  ;;  %6906 = vmatpush3.bf16.msra.mxu1 %v9189_v46  ;;  %v8114_v46 = vld [vmem:[%s10196_s1 + $0x31c] ss:$12 sps:$4 sm:$0xff]   ;;  %v9486_v14 = vld [vmem:[%s8437_s22 + $0xa0] sm:$0xff]  }
 0x2bd   : > { %7361 = vmatpush3.bf16.msra.mxu0 %v8085_v39  ;;  %6907 = vmatprep.subr.bf16.mxu1 %v9193_v47  ;;  %v8116_v47 = vld [vmem:[%s10196_s1 + $0x318] ss:$12 sps:$4 sm:$0xff]   ;;  %v9491_v12 = vld [vmem:[%s8437_s22 + $0xa8] sm:$0xff]  }
 0x2be   : > { %7362 = vmatprep.subr.bf16.mxu0 %v8086_v55 }
 0x2bf   : > { %3265 = vmatmul.mubr.bf16.gmra.mrb[132].mxu1 %v8108_v42 }
 0x2c0   : > { %v6793_v37 = vpop.f32.mrb[104].mxu1  ;;  %6908 = vmatpush3.bf16.msra.mxu1 %v9197_v3  ;;  %3593 = vmatprep.mubr.bf16.mxu1 %v8113_v43  ;;  %v9470_v3 = vld [vmem:[%s8437_s22 + $0x90] sm:$0xff]  }
 0x2c1   : > { %7363 = vmatpush3.bf16.msra.mxu0 %v8086_v55  ;;  %v6794_v28 = vpop.f32.mrb[105].mxu1  ;;  %7476 = vmatprep.subr.bf16.mxu1 %v9454_v63 }
 0x2c2   : > { %7364 = vmatprep.subr.bf16.mxu0 %v8087_v16  ;;  %v6795_v6 = vadd.f32 %v6794_v28, %v6793_v37  ;;  %v6796_v1 = vpop.f32.mrb[106].mxu1  ;;  %v8122_v37 = vld [vmem:[%s10196_s1 + $0x348] ss:$12 sps:$4 sm:$0xff]  }
 0x2c3   : > { %v6797_v31 = vpop.f32.mrb[107].mxu1  ;;  %v9502_v28 = vld [vmem:[%s8437_s22 + $0xb0] sm:$0xff]  }
 0x2c4   : > { %v6798_v32 = vadd.f32 %v6797_v31, %v6796_v1  ;;  %v8123_v1 = vld [vmem:[%s10196_s1 + $0x308] ss:$12 sps:$4 sm:$0xff]   ;;  %v8125_v31 = vld [vmem:[%s10196_s1 + $0x320] ss:$12 sps:$4 sm:$0xff]  }
 0x2c5   : > { %7365 = vmatpush3.bf16.msra.mxu0 %v8087_v16 }
 0x2c6   : > { %7366 = vmatprep.subr.bf16.mxu0 %v8088_v58 }
 0x2c7   : > { %3594 = vmatmul.mubr.bf16.vlgmr.msra.gmra.mrb[136].mxu1 %v8111_v60 }
 0x2c8   : > { %v6799_v35 = vpop.f32.mrb[108].mxu1  ;;  %7477 = vmatpush3.bf16.msra.mxu1 %v9454_v63  ;;  %3601 = vmatprep.mubr.bf16.mxu1 %v8114_v46 }
 0x2c9   : > { %7367 = vmatpush3.bf16.msra.mxu0 %v8088_v58  ;;  %v6800_v36 = vpop.f32.mrb[109].mxu1  ;;  %v8089_v58 = vld [vmem:[%s10197_s2 + $0x170] sm:$0xff]   ;;  %7478 = vmatprep.subr.bf16.mxu1 %v9459_v44 }
 0x2ca   : > { %v6801_v39 = vadd.f32 %v6800_v36, %v6799_v35  ;;  %v6802_v49 = vpop.f32.mrb[110].mxu1  ;;  %7368 = vmatprep.subr.bf16.mxu0 %v8089_v58  ;;  %v8130_v35 = vld [vmem:[%s10196_s1 + $0x350] ss:$12 sps:$4 sm:$0xff]  }
 0x2cb   : > { %v6803_v55 = vpop.f32.mrb[111].mxu1 }
 0x2cc   : > { %v6804_v16 = vadd.f32 %v6803_v55, %v6802_v49  ;;  %7479 = vmatpush3.bf16.msra.mxu1 %v9459_v44 }
 0x2cd   : > { %7369 = vmatpush3.bf16.msra.mxu0 %v8089_v58  ;;  %7480 = vmatprep.subr.bf16.mxu1 %v9470_v3 }
 0x2ce   : > { %7370 = vmatprep.subr.bf16.mxu0 %v8090_v18 }
 0x2cf   : > { %3602 = vmatmul.mubr.bf16.gmra.mrb[140].mxu1 %v8116_v47 }
 0x2d0   : > { %v7398_v10 = vpop.f32.mrb[112].mxu1  ;;  %7481 = vmatpush3.bf16.msra.mxu1 %v9470_v3  ;;  %3609 = vmatprep.mubr.bf16.mxu1 %v8117_v4 }
 0x2d1   : > { %v2954_v51 = vpop.f32.mrb[113].mxu1  ;;  %v9375_v9 = vadd.f32 %v7398_v10, %v6789_v56  ;;  %7371 = vmatpush3.bf16.msra.mxu0 %v8090_v18  ;;  %7482 = vmatprep.subr.bf16.mxu1 %v9475_v8  ;;  %v8119_v56 = vld [vmem:[%s10196_s1 + $0x330] ss:$12 sps:$4 sm:$0xff]   ;;  %v8095_v18 = vld [vmem:[%s10197_s2 + $0x188] sm:$0xff]  }
 0x2d2   : > { %v7399_v38 = vpop.f32.mrb[114].mxu1  ;;  %v9377_v48 = vadd.f32 %v6783_v7, %v2954_v51  ;;  %7404 = vmatprep.subr.bf16.mxu0 %v9397_v0 }
 0x2d3   : > { %v2957_v17 = vpop.f32.mrb[115].mxu1  ;;  %v9390_v59 = vadd.f32 %v7399_v38, %v6792_v22  ;;  %v8120_v22 = vld [vmem:[%s10196_s1 + $0x34c] ss:$12 sps:$4 sm:$0xff]  }
 0x2d4   : > { %v9382_v25 = vadd.f32 %v6786_v52, %v2957_v17  ;;  %7483 = vmatpush3.bf16.msra.mxu1 %v9475_v8 }
 0x2d5   : > { %v2986_v50 = vpack.c.bf16 %v9390_v59, %v9375_v9  ;;  %7484 = vmatprep.subr.bf16.mxu1 %v9486_v14  ;;  %v8131_v9 = vld [vmem:[%s10197_s2 + $0x1c0] sm:$0xff]  }
 0x2d6   : > { %v2985_v41 = vpack.c.bf16 %v9382_v25, %v9377_v48  ;;  %v8110_v48 = vld [vmem:[%s10197_s2 + $0x1b8] sm:$0xff]   ;;  %v8124_v25 = vld [vmem:[%s10196_s1 + $0x2a8] ss:$12 sps:$4 sm:$0xff]   ;;  %v8126_v59 = vld [vmem:[%s10196_s1 + $0x2c0] ss:$12 sps:$4 sm:$0xff]  }
 0x2d7   : > { %3610 = vmatmul.mubr.bf16.gmra.mrb[144].mxu1 %v8119_v56 }
 0x2d8   : > { %v7402_v61 = vpop.f32.mrb[116].mxu1  ;;  %7485 = vmatpush3.bf16.msra.mxu1 %v9486_v14  ;;  %3617 = vmatprep.mubr.bf16.mxu1 %v8120_v22 }
 0x2d9   : > { %v9413_v23 = vadd.f32 %v7402_v61, %v6801_v39  ;;  %v2970_v24 = vpop.f32.mrb[117].mxu1  ;;  %7486 = vmatprep.subr.bf16.mxu1 %v9491_v12 }
 0x2da   : > { %v9416_v26 = vadd.f32 %v6795_v6, %v2970_v24  ;;  %v7403_v21 = vpop.f32.mrb[118].mxu1  ;;  %v9507_v6 = vld [vmem:[%s8437_s22 + $0xb8] sm:$0xff]  }
 0x2db   : > { %v9418_v7 = vadd.f32 %v7403_v21, %v6804_v16  ;;  %v2973_v19 = vpop.f32.mrb[119].mxu1 }
 0x2dc   : > { %v9420_v11 = vadd.f32 %v6798_v32, %v2973_v19  ;;  %7487 = vmatpush3.bf16.msra.mxu1 %v9491_v12  ;;  %v8129_v32 = vld [vmem:[%s10196_s1 + $0x338] ss:$12 sps:$4 sm:$0xff]   ;;  %v8136_v19 = vld [vmem:[%s10197_s2 + $0x1e8] sm:$0xff]  }
 0x2dd   : > { %v2988_v29 = vpack.c.bf16 %v9418_v7, %v9413_v23  ;;  %7488 = vmatprep.subr.bf16.mxu1 %v9502_v28  ;;  %v8128_v23 = vld [vmem:[%s10196_s1 + $0x2f0] ss:$12 sps:$4 sm:$0xff]   ;;  %v8135_v7 = vld [vmem:[%s10197_s2 + $0x1e0] sm:$0xff]  }
 0x2de   : > { %v2987_v52 = vpack.c.bf16 %v9420_v11, %v9416_v26  ;;  %v8134_v26 = vld [vmem:[%s10197_s2 + $0x1d8] sm:$0xff]  }
 0x2df   : > { %3618 = vmatmul.mubr.bf16.gmra.mrb[148].mxu1 %v8122_v37 }
 0x2e0   : > { %7489 = vmatpush3.bf16.msra.mxu1 %v9502_v28  ;;  %7492 = vmatprep.mubr.bf16.mxu1 %v8123_v1 }
 0x2e1   : > { %7490 = vmatprep.subr.bf16.mxu1 %v9507_v6 }
 0x2e4   : > { %7491 = vmatpush3.bf16.msra.mxu1 %v9507_v6 }
 0x2e7   : > { %7493 = vmatmul.mubr.bf16.vlgmr.msra.gmra.mrb[152].mxu1 %v8125_v31 }
 0x2e8   : > { %7496 = vmatprep.mubr.bf16.mxu1 %v8129_v32 }
 0x2ef   : > { %7497 = vmatmul.mubr.bf16.gmra.mrb[156].mxu1 %v8130_v35 }
 0x374   : > { %v6845_v11 = vpop.f32.mrb[120].mxu1 }
 0x375   : > { %v6846_v62 = vpop.f32.mrb[121].mxu1 }
 0x376   : > { %v6848_v45 = vpop.f32.mrb[122].mxu1 }
 0x387   : > { %v7350_v36 = vpop.f32.mrb[48].mxu0 }
 0x388   : > { %v2610_v39 = vadd.f32 %v7350_v36, %v9360_v33  ;;  %v2601_v49 = vpop.f32.mrb[49].mxu0 }
 0x389   : > { %v2602_v55 = vadd.f32 %v9356_v13, %v2601_v49  ;;  %v7351_v16 = vpop.f32.mrb[50].mxu0 }
 0x38a   : > { %v2613_v58 = vadd.f32 %v7351_v16, %v9362_v34  ;;  %v2604_v10 = vpop.f32.mrb[51].mxu0 }
 0x38b   : > { %v2605_v51 = vadd.f32 %v9358_v15, %v2604_v10 }
 0x38c   : > { %v2633_v38 = vpack.c.bf16 %v2613_v58, %v2610_v39 }
 0x38d   : > { %v2632_v17 = vpack.c.bf16 %v2605_v51, %v2602_v55 }
 0x38f   : > { %v7354_v27 = vpop.f32.mrb[52].mxu0  ;;  %7372 = vmatprep.mubr.bf16.mxu0 %v2632_v17 }
 0x390   : > { %v2626_v2 = vadd.f32 %v7354_v27, %v9368_v53  ;;  %v2617_v33 = vpop.f32.mrb[53].mxu0  ;;  %7373 = vmatmul.mubr.bf16.vlgmr.msra.gmra.mrb[32].mxu0 %v2633_v38  ;;  %v8105_v53 = vld [vmem:[%s10197_s2 + $0x1a8] sm:$0xff]  }
 0x391   : > { %v2618_v13 = vadd.f32 %v9364_v30, %v2617_v33  ;;  %7405 = vmatpush3.bf16.msra.mxu0 %v9397_v0  ;;  %v7355_v34 = vpop.f32.mrb[54].mxu0  ;;  %v8100_v30 = vld [vmem:[%s10197_s2 + $0x198] sm:$0xff]   ;;  %v8132_v0 = vld [vmem:[%s10197_s2 + $0x1c8] sm:$0xff]  }
 0x392   : > { %v2629_v5 = vadd.f32 %v7355_v34, %v9370_v57  ;;  %v2620_v15 = vpop.f32.mrb[55].mxu0  ;;  %7406 = vmatprep.subr.bf16.mxu0 %v8095_v18  ;;  %v8109_v57 = vld [vmem:[%s10197_s2 + $0x1b0] sm:$0xff]  }
 0x393   : > { %v2621_v61 = vadd.f32 %v9366_v20, %v2620_v15  ;;  %v8104_v20 = vld [vmem:[%s10197_s2 + $0x1a0] sm:$0xff]  }
 0x394   : > { %v2635_v24 = vpack.c.bf16 %v2629_v5, %v2626_v2 }
 0x395   : > { %v2634_v21 = vpack.c.bf16 %v2621_v61, %v2618_v13  ;;  %7407 = vmatpush3.bf16.msra.mxu0 %v8095_v18 }
 0x396   : > { %7408 = vmatprep.subr.bf16.mxu0 %v8099_v54 }
 0x397   : > { %7376 = vmatprep.mubr.bf16.mxu0 %v2634_v21 }
 0x398   : > { %7377 = vmatmul.mubr.bf16.gmra.mrb[36].mxu0 %v2635_v24 }
 0x399   : > { %7409 = vmatpush3.bf16.msra.mxu0 %v8099_v54  ;;  %7420 = vmatprep.mubr.bf16.mxu0 %v2985_v41  ;;  %v8127_v41 = vld [vmem:[%s10196_s1 + $0x2d8] ss:$12 sps:$4 sm:$0xff]  }
 0x39a   : > { %7410 = vmatprep.subr.bf16.mxu0 %v8100_v30 }
 0x39d   : > { %7411 = vmatpush3.bf16.msra.mxu0 %v8100_v30  ;;  %v8137_v30 = vld [vmem:[%s10197_s2 + $0x1f0] sm:$0xff]  }
 0x39e   : > { %7412 = vmatprep.subr.bf16.mxu0 %v8104_v20 }
 0x3a1   : > { %7413 = vmatpush3.bf16.msra.mxu0 %v8104_v20 }
 0x3a2   : > { %7414 = vmatprep.subr.bf16.mxu0 %v8105_v53 }
 0x3a5   : > { %7415 = vmatpush3.bf16.msra.mxu0 %v8105_v53 }
 0x3a6   : > { %7416 = vmatprep.subr.bf16.mxu0 %v8109_v57 }
 0x3a9   : > { %7417 = vmatpush3.bf16.msra.mxu0 %v8109_v57 }
 0x3aa   : > { %7418 = vmatprep.subr.bf16.mxu0 %v8110_v48 }
 0x3ad   : > { %7419 = vmatpush3.bf16.msra.mxu0 %v8110_v48 }
 0x3ae   : > { %7428 = vmatprep.subr.bf16.mxu0 %v9454_v63 }
 0x3b0   : > { %7421 = vmatmul.mubr.bf16.vlgmr.msra.gmra.mrb[32].mxu0 %v2986_v50  ;;  %v8133_v50 = vld [vmem:[%s10197_s2 + $0x1d0] sm:$0xff]  }
 0x3b1   : > { %7424 = vmatprep.mubr.bf16.mxu0 %v2987_v52  ;;  %7429 = vmatpush3.bf16.msra.mxu0 %v9454_v63  ;;  %v6849_v52 = vpop.f32.mrb[123].mxu1 }
 0x3b2   : > { %7430 = vmatprep.subr.bf16.mxu0 %v9459_v44  ;;  %v9613_v40 = vadd.f32 %v6849_v52, %v6848_v45  ;;  %v6851_v42 = vpop.f32.mrb[124].mxu1 }
 0x3b3   : > { %v6852_v43 = vpop.f32.mrb[125].mxu1 }
 0x3b4   : > { %v9615_v60 = vadd.f32 %v6852_v43, %v6851_v42  ;;  %v6854_v63 = vpop.f32.mrb[126].mxu1 }
 0x3b5   : > { %7431 = vmatpush3.bf16.msra.mxu0 %v9459_v44  ;;  %v6855_v44 = vpop.f32.mrb[127].mxu1 }
 0x3b6   : > { %7432 = vmatprep.subr.bf16.mxu0 %v9470_v3  ;;  %v9617_v46 = vadd.f32 %v6855_v44, %v6854_v63  ;;  %v6857_v47 = vpop.f32.mrb[128].mxu1 }
 0x3b8   : > { %7425 = vmatmul.mubr.bf16.gmra.mrb[36].mxu0 %v2988_v29  ;;  %v9611_v29 = vadd.f32 %v6846_v62, %v6845_v11 }
 0x3b9   : > { %7433 = vmatpush3.bf16.msra.mxu0 %v9470_v3  ;;  %7444 = vmatprep.mubr.bf16.mxu0 %v8124_v25  ;;  %v6858_v3 = vpop.f32.mrb[129].mxu1 }
 0x3ba   : > { %7434 = vmatprep.subr.bf16.mxu0 %v9475_v8  ;;  %v6860_v4 = vpop.f32.mrb[130].mxu1 }
 0x3bb   : > { %v6861_v56 = vpop.f32.mrb[131].mxu1 }
 0x3bd   : > { %7435 = vmatpush3.bf16.msra.mxu0 %v9475_v8  ;;  %v9619_v8 = vadd.f32 %v6858_v3, %v6857_v47 }
 0x3be   : > { %7436 = vmatprep.subr.bf16.mxu0 %v9486_v14 }
 0x3c1   : > { %7437 = vmatpush3.bf16.msra.mxu0 %v9486_v14  ;;  %v9621_v14 = vadd.f32 %v6861_v56, %v6860_v4 }
 0x3c2   : > { %7438 = vmatprep.subr.bf16.mxu0 %v9491_v12 }
 0x3c5   : > { %7439 = vmatpush3.bf16.msra.mxu0 %v9491_v12  ;;  %v6863_v12 = vpop.f32.mrb[132].mxu1 }
 0x3c6   : > { %7440 = vmatprep.subr.bf16.mxu0 %v9502_v28  ;;  %v6864_v22 = vpop.f32.mrb[133].mxu1 }
 0x3c7   : > { %v9623_v37 = vadd.f32 %v6864_v22, %v6863_v12 }
 0x3c9   : > { %7441 = vmatpush3.bf16.msra.mxu0 %v9502_v28  ;;  %v6866_v28 = vpop.f32.mrb[134].mxu1 }
 0x3ca   : > { %7442 = vmatprep.subr.bf16.mxu0 %v9507_v6 }
 0x3cd   : > { %7443 = vmatpush3.bf16.msra.mxu0 %v9507_v6  ;;  %v6867_v6 = vpop.f32.mrb[135].mxu1 }
 0x3ce   : > { %7452 = vmatprep.subr.bf16.mxu0 %v8131_v9  ;;  %v9625_v1 = vadd.f32 %v6867_v6, %v6866_v28  ;;  %v6909_v31 = vpop.f32.mrb[136].mxu1 }
 0x3cf   : > { %v6910_v32 = vpop.f32.mrb[137].mxu1 }
 0x3d0   : > { %7445 = vmatmul.mubr.bf16.vlgmr.msra.gmra.mrb[56].mxu0 %v8126_v59  ;;  %v6911_v35 = vadd.f32 %v6910_v32, %v6909_v31  ;;  %v6912_v36 = vpop.f32.mrb[138].mxu1  ;;  %v8140_v32 = vld [vmem:[%s10197_s2 + $0x208] sm:$0xff]  }
 0x3d1   : > { %7448 = vmatprep.mubr.bf16.mxu0 %v8127_v41  ;;  %7453 = vmatpush3.bf16.msra.mxu0 %v8131_v9  ;;  %v6913_v39 = vpop.f32.mrb[139].mxu1  ;;  %v8138_v41 = vld [vmem:[%s10197_s2 + $0x1f8] sm:$0xff]  }
 0x3d2   : > { %7454 = vmatprep.subr.bf16.mxu0 %v8132_v0  ;;  %v6914_v49 = vadd.f32 %v6913_v39, %v6912_v36  ;;  %v6915_v55 = vpop.f32.mrb[140].mxu1 }
 0x3d3   : > { %v6916_v16 = vpop.f32.mrb[141].mxu1 }
 0x3d4   : > { %v6917_v58 = vadd.f32 %v6916_v16, %v6915_v55  ;;  %v6918_v10 = vpop.f32.mrb[142].mxu1 }
 0x3d5   : > { %7455 = vmatpush3.bf16.msra.mxu0 %v8132_v0  ;;  %v6919_v51 = vpop.f32.mrb[143].mxu1 }
 0x3d6   : > { %7456 = vmatprep.subr.bf16.mxu0 %v8133_v50  ;;  %v6920_v38 = vadd.f32 %v6919_v51, %v6918_v10  ;;  %v6921_v17 = vpop.f32.mrb[144].mxu1  ;;  %v8146_v10 = vld [vmem:[%s10197_s2 + $0x238] sm:$0xff]   ;;  %v8340_v51 = vmov 0.0  }
 0x3d7   : > { %v6922_v18 = vpop.f32.mrb[145].mxu1  ;;  %7524 = vmatprep.subr.bf16.mxu1 %v8340_v51  ;;  %7532 = vmatprep.mubr.msk.bf16.mxu1 %vm8341_vm0, %v8340_v51 }
 0x3d8   : > { %7449 = vmatmul.mubr.bf16.gmra.mrb[60].mxu0 %v8128_v23  ;;  %v6923_v27 = vadd.f32 %v6922_v18, %v6921_v17  ;;  %v6924_v2 = vpop.f32.mrb[146].mxu1  ;;  %v8139_v23 = vld [vmem:[%s10197_s2 + $0x200] sm:$0xff]   ;;  %v8155_v17 = vld [vmem:[%s10200_s5 + $0x48] sm:$0xff]   ;;  %v8157_v18 = vld [vmem:[%s10200_s5 + $0x50] sm:$0xff]  }
 0x3d9   : > { %7457 = vmatpush3.bf16.msra.mxu0 %v8133_v50  ;;  %v6925_v33 = vpop.f32.mrb[147].mxu1 }
 0x3da   : > { %7458 = vmatprep.subr.bf16.mxu0 %v8134_v26  ;;  %v6926_v13 = vadd.f32 %v6925_v33, %v6924_v2  ;;  %v6927_v34 = vpop.f32.mrb[148].mxu1 }
 0x3db   : > { %v6928_v5 = vpop.f32.mrb[149].mxu1 }
 0x3dc   : > { %v6929_v15 = vadd.f32 %v6928_v5, %v6927_v34  ;;  %v6930_v54 = vpop.f32.mrb[150].mxu1 }
 0x3dd   : > { %7459 = vmatpush3.bf16.msra.mxu0 %v8134_v26  ;;  %v6931_v61 = vpop.f32.mrb[151].mxu1 }
 0x3de   : > { %7460 = vmatprep.subr.bf16.mxu0 %v8135_v7  ;;  %v6932_v24 = vadd.f32 %v6931_v61, %v6930_v54  ;;  %v7494_v21 = vpop.f32.mrb[152].mxu1 }
 0x3df   : > { %v9630_v20 = vadd.f32 %v7494_v21, %v6917_v58  ;;  %v3660_v53 = vpop.f32.mrb[153].mxu1 }
 0x3e0   : > { %v7495_v57 = vpop.f32.mrb[154].mxu1  ;;  %v3661_v48 = vadd.f32 %v6911_v35, %v3660_v53 }
 0x3e1   : > { %7461 = vmatpush3.bf16.msra.mxu0 %v8135_v7  ;;  %v3663_v25 = vpop.f32.mrb[155].mxu1  ;;  %v9632_v9 = vadd.f32 %v7495_v57, %v6920_v38  ;;  %v8153_v38 = vld [vmem:[%s10200_s5 + $0x40] sm:$0xff]  }
 0x3e2   : > { %7462 = vmatprep.subr.bf16.mxu0 %v8136_v19  ;;  %v3664_v59 = vadd.f32 %v6914_v49, %v3663_v25  ;;  %v7498_v26 = vpop.f32.mrb[156].mxu1 }
 0x3e3   : > { %v3692_v0 = vpack.c.bf16 %v9632_v9, %v9630_v20  ;;  %v3685_v7 = vadd.f32 %v7498_v26, %v6929_v15 }
 0x3e4   : > { %v3691_v50 = vpack.c.bf16 %v3664_v59, %v3661_v48 }
 0x3e5   : > { %7463 = vmatpush3.bf16.msra.mxu0 %v8136_v19  ;;  %v3676_v19 = vpop.f32.mrb[157].mxu1 }
 0x3e6   : > { %7464 = vmatprep.subr.bf16.mxu0 %v8137_v30  ;;  %v3677_v11 = vadd.f32 %v6923_v27, %v3676_v19  ;;  %v7499_v62 = vpop.f32.mrb[158].mxu1  ;;  %v6117_v27 = vld [vmem:[%s10198_s3] ss:$0 sm:$0xff] }
 0x3e7   : > { %v3688_v45 = vadd.f32 %v7499_v62, %v6932_v24  ;;  %v3679_v52 = vpop.f32.mrb[159].mxu1 }
 0x3e8   : > { %v3680_v42 = vadd.f32 %v6926_v13, %v3679_v52 }
 0x3e9   : > { %7465 = vmatpush3.bf16.msra.mxu0 %v8137_v30  ;;  %v3694_v43 = vpack.c.bf16 %v3688_v45, %v3685_v7 }
 0x3ea   : > { %7466 = vmatprep.subr.bf16.mxu0 %v8138_v41  ;;  %v3693_v63 = vpack.c.bf16 %v3680_v42, %v3677_v11 }
 0x3ed   : > { %7467 = vmatpush3.bf16.msra.mxu0 %v8138_v41 }
 0x3ee   : > { %7500 = vmatprep.subr.bf16.mxu0 %v8139_v23 }
 0x4a3   : > { %v7446_v44 = vpop.f32.mrb[56].mxu0 }
 0x4a4   : > { %v3316_v47 = vadd.f32 %v7446_v44, %v9615_v60  ;;  %v3307_v3 = vpop.f32.mrb[57].mxu0 }
 0x4a5   : > { %v3308_v4 = vadd.f32 %v9611_v29, %v3307_v3  ;;  %v7447_v56 = vpop.f32.mrb[58].mxu0 }
 0x4a6   : > { %v3319_v12 = vadd.f32 %v7447_v56, %v9617_v46  ;;  %v3310_v22 = vpop.f32.mrb[59].mxu0 }
 0x4a7   : > { %v3311_v28 = vadd.f32 %v9613_v40, %v3310_v22  ;;  %v8141_v40 = vld [vmem:[%s10197_s2 + $0x210] sm:$0xff]  }
 0x4a8   : > { %v3339_v6 = vpack.c.bf16 %v3319_v12, %v3316_v47 }
 0x4a9   : > { %v3338_v31 = vpack.c.bf16 %v3311_v28, %v3308_v4 }
 0x4ab   : > { %v7450_v35 = vpop.f32.mrb[60].mxu0  ;;  %7468 = vmatprep.mubr.bf16.mxu0 %v3338_v31 }
 0x4ac   : > { %v3332_v36 = vadd.f32 %v7450_v35, %v9623_v37  ;;  %v3323_v60 = vpop.f32.mrb[61].mxu0  ;;  %7469 = vmatmul.mubr.bf16.vlgmr.msra.gmra.mrb[32].mxu0 %v3339_v6  ;;  %v8143_v37 = vld [vmem:[%s10197_s2 + $0x220] sm:$0xff]  }
 0x4ad   : > { %v3324_v29 = vadd.f32 %v9619_v8, %v3323_v60  ;;  %7501 = vmatpush3.bf16.msra.mxu0 %v8139_v23  ;;  %v7451_v39 = vpop.f32.mrb[62].mxu0  ;;  %v8142_v8 = vld [vmem:[%s10197_s2 + $0x218] sm:$0xff]  }
 0x4ae   : > { %v3335_v46 = vadd.f32 %v7451_v39, %v9625_v1  ;;  %v3326_v49 = vpop.f32.mrb[63].mxu0  ;;  %7502 = vmatprep.subr.bf16.mxu0 %v8140_v32  ;;  %v8145_v1 = vld [vmem:[%s10197_s2 + $0x230] sm:$0xff]  }
 0x4af   : > { %v3327_v55 = vadd.f32 %v9621_v14, %v3326_v49  ;;  %v8144_v14 = vld [vmem:[%s10197_s2 + $0x228] sm:$0xff]  }
 0x4b0   : > { %v3341_v16 = vpack.c.bf16 %v3335_v46, %v3332_v36 }
 0x4b1   : > { %v3340_v58 = vpack.c.bf16 %v3327_v55, %v3324_v29  ;;  %7503 = vmatpush3.bf16.msra.mxu0 %v8140_v32 }
 0x4b2   : > { %7504 = vmatprep.subr.bf16.mxu0 %v8141_v40 }
 0x4b3   : > { %7472 = vmatprep.mubr.bf16.mxu0 %v3340_v58 }
 0x4b4   : > { %7473 = vmatmul.mubr.bf16.gmra.mrb[36].mxu0 %v3341_v16 }
 0x4b5   : > { %7505 = vmatpush3.bf16.msra.mxu0 %v8141_v40  ;;  %7516 = vmatprep.mubr.bf16.mxu0 %v3691_v50 }
 0x4b6   : > { %7506 = vmatprep.subr.bf16.mxu0 %v8142_v8 }
 0x4b9   : > { %7507 = vmatpush3.bf16.msra.mxu0 %v8142_v8 }
 0x4ba   : > { %7508 = vmatprep.subr.bf16.mxu0 %v8143_v37 }
 0x4bd   : > { %7509 = vmatpush3.bf16.msra.mxu0 %v8143_v37 }
 0x4be   : > { %7510 = vmatprep.subr.bf16.mxu0 %v8144_v14 }
 0x4c1   : > { %7511 = vmatpush3.bf16.msra.mxu0 %v8144_v14 }
 0x4c2   : > { %7512 = vmatprep.subr.bf16.mxu0 %v8145_v1 }
 0x4c5   : > { %7513 = vmatpush3.bf16.msra.mxu0 %v8145_v1 }
 0x4c6   : > { %7514 = vmatprep.subr.bf16.mxu0 %v8146_v10 }
 0x4c9   : > { %7515 = vmatpush3.bf16.msra.mxu0 %v8146_v10 }
 0x4ca   : > { %7548 = vmatprep.subr.bf16.mxu0 %v8340_v51 }
 0x4cc   : > { %7517 = vmatmul.mubr.bf16.vlgmr.msra.gmra.mrb[32].mxu0 %v3692_v0 }
 0x4cd   : > { %7520 = vmatprep.mubr.bf16.mxu0 %v3693_v63  ;;  %7549 = vmatpush3.bf16.msra.mxu0 %v8153_v38 }
 0x4ce   : > { %7550 = vmatprep.subr.bf16.mxu0 %v8340_v51 }
 0x4d1   : > { %7551 = vmatpush3.bf16.msra.mxu0 %v8155_v17  ;;  %v8147_v17 = vld [vmem:[%s10199_s4] sm:$0xff]  }
 0x4d2   : > { %7552 = vmatprep.subr.bf16.mxu0 %v8340_v51 }
 0x4d4   : > { %7521 = vmatmul.mubr.bf16.gmra.mrb[36].mxu0 %v3694_v43 }
 0x4d5   : > { %7564 = vmatprep.mubr.msk.bf16.mxu0 %vm8341_vm0, %v8340_v51  ;;  %7553 = vmatpush3.bf16.msra.mxu0 %v8157_v18  ;;  %v8148_v18 = vld [vmem:[%s10199_s4 + $0x8] sm:$0xff]  }
 0x4d6   : > { %7554 = vmatprep.subr.bf16.mxu0 %v8340_v51 }
 0x59f   : > { %v7518_v2 = vpop.f32.mrb[32].mxu0 }
 0x5a0   : > { %v3842_v33 = vadd.f32 %v7518_v2, %v6117_v27  ;;  %v3794_v13 = vpop.f32.mrb[33].mxu0  ;;  %v8150_v2 = vld [vmem:[%s10200_s5 + $0x8] sm:$0xff]  }
 0x5a1   : > { %v3840_v34 = vadd.f32 %v6117_v27, %v3794_v13  ;;  %v7519_v5 = vpop.f32.mrb[34].mxu0  ;;  %v8152_v13 = vld [vmem:[%s10200_s5 + $0x18] sm:$0xff]  }
 0x5a2   : > { %v6120_v15 = vmul.f32 -1.442695, %v3842_v33  ;;  %v3843_v54 = vadd.f32 %v7519_v5, %v6117_v27  ;;  %v3797_v61 = vpop.f32.mrb[35].mxu0  ;;  %v8156_v5 = vld [vmem:[%s10200_s5 + $0x28] sm:$0xff]  }
 0x5a3   : > { %v6118_v24 = vmul.f32 -1.442695, %v3840_v34  ;;  %v3841_v21 = vadd.f32 %v6117_v27, %v3797_v61  ;;  %v8160_v61 = vld [vmem:[%s10200_s5 + $0x38] sm:$0xff]  }
 0x5a4   : > { %8236 = vpow2.f32 %v6120_v15  ;;  %v6121_v30 = vmul.f32 -1.442695, %v3843_v54  ;;  %v8158_v15 = vld [vmem:[%s10200_s5 + $0x30] sm:$0xff]  }
 0x5a5   : > { %8238 = vpow2.f32 %v6118_v24  ;;  %v6119_v20 = vmul.f32 -1.442695, %v3841_v21  ;;  %v8161_v24 = vld [vmem:[%s10200_s5 + $0x60] sm:$0xff]  }
 0x5a6   : > { %8240 = vpow2.f32 %v6121_v30  ;;  %v8163_v30 = vld [vmem:[%s10200_s5 + $0x70] sm:$0xff]  }
 0x5a7   : > { %8242 = vpow2.f32 %v6119_v20  ;;  %v7522_v53 = vpop.f32.mrb[36].mxu0  ;;  %v8164_v20 = vld [vmem:[%s10200_s5 + $0x78] sm:$0xff]  }
 0x5a8   : > { %v3846_v57 = vadd.f32 %v7522_v53, %v6117_v27  ;;  %v3810_v48 = vpop.f32.mrb[37].mxu0 }
 0x5a9   : > { %v3844_v25 = vadd.f32 %v6117_v27, %v3810_v48  ;;  %v7523_v9 = vpop.f32.mrb[38].mxu0 }
 0x5aa   : > { %v6124_v59 = vmul.f32 -1.442695, %v3846_v57  ;;  %v3847_v41 = vadd.f32 %v7523_v9, %v6117_v27  ;;  %v3813_v0 = vpop.f32.mrb[39].mxu0 }
 0x5ab   : > { %v6122_v50 = vmul.f32 -1.442695, %v3844_v25  ;;  %v3845_v23 = vadd.f32 %v6117_v27, %v3813_v0  ;;  %v8149_v27 = vld [vmem:[%s10200_s5] sm:$0xff]  }
 0x5ac   : > { %8244 = vpow2.f32 %v6124_v59  ;;  %v6125_v26 = vmul.f32 -1.442695, %v3847_v41 }
 0x5ad   : > { %8246 = vpow2.f32 %v6122_v50  ;;  %v6123_v7 = vmul.f32 -1.442695, %v3845_v23 }
 0x5ae   : > { %v8237_v19 = vpop.eup %8236  ;;  %8248 = vpow2.f32 %v6125_v26  ;;  %v8165_v26 = vld [vmem:[%s10199_s4 + $0x10] sm:$0xff]  }
 0x5af   : > { %v8239_v11 = vpop.eup %8238  ;;  %v3874_v62 = vadd.f32 1.0, %v8237_v19  ;;  %8250 = vpow2.f32 %v6123_v7  ;;  %v8166_v7 = vld [vmem:[%s10199_s4 + $0x18] sm:$0xff]   ;;  %v8167_v19 = vld [vmem:[%s10200_s5 + $0x80] sm:$0xff]  }
 0x5b0   : > { %v8241_v45 = vpop.eup %8240  ;;  %v3872_v52 = vadd.f32 1.0, %v8239_v11  ;;  %v8168_v11 = vld [vmem:[%s10200_s5 + $0x88] sm:$0xff]  }
 0x5b1   : > { %v8243_v42 = vpop.eup %8242  ;;  %8252 = vrcp.f32 %v3874_v62  ;;  %v3875_v43 = vadd.f32 1.0, %v8241_v45  ;;  %v8169_v62 = vld [vmem:[%s10200_s5 + $0x90] sm:$0xff]   ;;  %v8170_v45 = vld [vmem:[%s10200_s5 + $0x98] sm:$0xff]  }
 0x5b2   : > { %8254 = vrcp.f32 %v3872_v52  ;;  %v3873_v63 = vadd.f32 1.0, %v8243_v42  ;;  %v8171_v52 = vld [vmem:[%s10200_s5 + $0xa0] sm:$0xff]  }
 0x5b3   : > { %8256 = vrcp.f32 %v3875_v43  ;;  %v8172_v42 = vld [vmem:[%s10200_s5 + $0xc0] sm:$0xff]   ;;  %v8173_v43 = vld [vmem:[%s10200_s5 + $0xa8] sm:$0xff]  }
 0x5b4   : > { %8258 = vrcp.f32 %v3873_v63  ;;  %v8174_v63 = vld [vmem:[%s10200_s5 + $0xc8] sm:$0xff]  }
 0x5b6   : > { %v8245_v44 = vpop.eup %8244 }
 0x5b7   : > { %v8247_v47 = vpop.eup %8246  ;;  %v3878_v3 = vadd.f32 1.0, %v8245_v44  ;;  %v8175_v44 = vld [vmem:[%s10200_s5 + $0xb0] sm:$0xff]  }
 0x5b8   : > { %v8249_v4 = vpop.eup %8248  ;;  %v3876_v56 = vadd.f32 1.0, %v8247_v47  ;;  %v8176_v47 = vld [vmem:[%s10200_s5 + $0xd0] sm:$0xff]  }
 0x5b9   : > { %v8251_v12 = vpop.eup %8250  ;;  %8260 = vrcp.f32 %v3878_v3  ;;  %v3879_v22 = vadd.f32 1.0, %v8249_v4  ;;  %v8177_v3 = vld [vmem:[%s10200_s5 + $0xb8] sm:$0xff]  }
 0x5ba   : > { %8262 = vrcp.f32 %v3876_v56  ;;  %v3877_v28 = vadd.f32 1.0, %v8251_v12  ;;  %v8178_v4 = vld [vmem:[%s10200_s5 + $0xd8] sm:$0xff]   ;;  %v8179_v56 = vld [vmem:[%s10200_s5 + $0xe0] sm:$0xff]   ;;  %v8180_v12 = vld [vmem:[%s10200_s5 + $0xe8] sm:$0xff]  }
 0x5bb   : > { %v8253_v6 = vpop.eup %8252  ;;  %8264 = vrcp.f32 %v3879_v22  ;;  %v8181_v22 = vld [vmem:[%s10200_s5 + $0xf0] sm:$0xff]  }
 0x5bc   : > { %v8255_v31 = vpop.eup %8254  ;;  %8266 = vrcp.f32 %v3877_v28  ;;  %v3898_v36 = vmul.f32 %v8253_v6, %v3842_v33  ;;  %v8151_v33 = vld [vmem:[%s10200_s5 + $0x10] sm:$0xff]   ;;  %v8182_v28 = vld [vmem:[%s10200_s5 + $0xf8] sm:$0xff]  }
 0x5bd   : > { %v8257_v32 = vpop.eup %8256  ;;  %v3896_v29 = vmul.f32 %v8255_v31, %v3840_v34  ;;  %v8154_v34 = vld [vmem:[%s10200_s5 + $0x20] sm:$0xff]  }
 0x5be   : > { %v8259_v35 = vpop.eup %8258  ;;  %v3899_v60 = vmul.f32 %v8257_v32, %v3843_v54  ;;  %v8159_v54 = vld [vmem:[%s10200_s5 + $0x58] sm:$0xff]  }
 0x5bf   : > { %v3897_v39 = vmul.f32 %v8259_v35, %v3841_v21  ;;  %7555 = vmatpush3.bf16.msra.mxu0 %v8159_v54  ;;  %v8162_v21 = vld [vmem:[%s10200_s5 + $0x68] sm:$0xff]   ;;  %v8188_v54 = vld [vmem:[%s10200_s5 + $0x118] sm:$0xff]  }
 0x5c0   : > { %v9692_v46 = vpack.c.bf16 %v3899_v60, %v3898_v36  ;;  %7556 = vmatprep.subr.bf16.mxu0 %v8340_v51 }
 0x5c1   : > { %v9694_v49 = vpack.c.bf16 %v3897_v39, %v3896_v29 }
 0x5c3   : > { %v8261_v40 = vpop.eup %8260  ;;  %7525 = vmatpush3.bf16.msra.mxu1 %v9694_v49  ;;  %7557 = vmatpush3.bf16.msra.mxu0 %v8161_v24  ;;  %v8190_v24 = vld [vmem:[%s10200_s5 + $0x140] sm:$0xff]  }
 0x5c4   : > { %v8263_v55 = vpop.eup %8262  ;;  %7526 = vmatprep.subr.bf16.mxu1 %v8340_v51  ;;  %v3902_v8 = vmul.f32 %v8261_v40, %v3846_v57  ;;  %7558 = vmatprep.subr.bf16.mxu0 %v8340_v51 }
 0x5c5   : > { %v8265_v16 = vpop.eup %8264  ;;  %v3900_v14 = vmul.f32 %v8263_v55, %v3844_v25 }
 0x5c6   : > { %v8267_v58 = vpop.eup %8266  ;;  %v3903_v37 = vmul.f32 %v8265_v16, %v3847_v41 }
 0x5c7   : > { %v3901_v1 = vmul.f32 %v8267_v58, %v3845_v23  ;;  %7527 = vmatpush3.bf16.msra.mxu1 %v9692_v46  ;;  %7559 = vmatpush3.bf16.msra.mxu0 %v8162_v21  ;;  %v8191_v21 = vld [vmem:[%s10200_s5 + $0x128] sm:$0xff]  }
 0x5c8   : > { %v9699_v10 = vpack.c.bf16 %v3903_v37, %v3902_v8  ;;  %7528 = vmatprep.subr.bf16.mxu1 %v8340_v51  ;;  %7560 = vmatprep.subr.bf16.mxu0 %v8340_v51 }
 0x5c9   : > { %v9702_v38 = vpack.c.bf16 %v3901_v1, %v3900_v14 }
 0x5cb   : > { %7529 = vmatpush3.bf16.msra.mxu1 %v9702_v38  ;;  %7561 = vmatpush3.bf16.msra.mxu0 %v8163_v30  ;;  %v8192_v30 = vld [vmem:[%s10200_s5 + $0x148] sm:$0xff]  }
 0x5cc   : > { %7530 = vmatprep.subr.bf16.mxu1 %v8340_v51  ;;  %7562 = vmatprep.subr.bf16.mxu0 %v8340_v51 }
 0x5cf   : > { %7531 = vmatpush3.bf16.msra.mxu1 %v9699_v10  ;;  %7563 = vmatpush3.bf16.msra.mxu0 %v8164_v20  ;;  %v8193_v20 = vld [vmem:[%s10200_s5 + $0x130] sm:$0xff]  }
 0x5d0   : > { %7536 = vmatprep.subr.bf16.mxu1 %v8340_v51  ;;  %7588 = vmatprep.subr.bf16.mxu0 %v8340_v51 }
 0x5d2   : > { %7533 = vmatmul.mubr.msk.bf16.vlgmr.msra.gmra.mrb[160].mxu1 %vm3915_vm1, %v8147_v17 }
 0x5d3   : > { %7537 = vmatpush3.bf16.msra.mxu1 %v9694_v49  ;;  %7544 = vmatprep.mubr.msk.bf16.mxu1 %vm8341_vm0, %v8340_v51 }
 0x5d4   : > { %7538 = vmatprep.subr.bf16.mxu1 %v8340_v51 }
 0x5d7   : > { %7539 = vmatpush3.bf16.msra.mxu1 %v9692_v46 }
 0x5d8   : > { %7540 = vmatprep.subr.bf16.mxu1 %v8340_v51 }
 0x5db   : > { %7541 = vmatpush3.bf16.msra.mxu1 %v9702_v38 }
 0x5dc   : > { %7542 = vmatprep.subr.bf16.mxu1 %v8340_v51 }
 0x5df   : > { %7543 = vmatpush3.bf16.msra.mxu1 %v9699_v10 }
 0x5e0   : > { %7568 = vmatprep.subr.bf16.mxu1 %v8340_v51 }
 0x5e2   : > { %7545 = vmatmul.mubr.msk.bf16.vlgmr.msra.gmra.mrb[164].mxu1 %vm3915_vm1, %v8148_v18  ;;  %v8183_v18 = vld [vmem:[%s10199_s4 + $0x20] sm:$0xff]  }
 0x5e3   : > { %7569 = vmatpush3.bf16.msra.mxu1 %v8149_v27  ;;  %7584 = vmatprep.mubr.msk.bf16.mxu1 %vm8341_vm0, %v8340_v51 }
 0x5e4   : > { %7570 = vmatprep.subr.bf16.mxu1 %v8340_v51 }
 0x5e7   : > { %7571 = vmatpush3.bf16.msra.mxu1 %v8150_v2 }
 0x5e8   : > { %7572 = vmatprep.subr.bf16.mxu1 %v8340_v51 }
 0x5eb   : > { %7573 = vmatpush3.bf16.msra.mxu1 %v8151_v33  ;;  %v8185_v33 = vld [vmem:[%s10200_s5 + $0x100] sm:$0xff]  }
 0x5ec   : > { %7574 = vmatprep.subr.bf16.mxu1 %v8340_v51 }
 0x5ef   : > { %7575 = vmatpush3.bf16.msra.mxu1 %v8152_v13 }
 0x5f0   : > { %7576 = vmatprep.subr.bf16.mxu1 %v8340_v51 }
 0x5f3   : > { %7577 = vmatpush3.bf16.msra.mxu1 %v8154_v34  ;;  %v8186_v34 = vld [vmem:[%s10200_s5 + $0x108] sm:$0xff]  }
 0x5f4   : > { %7578 = vmatprep.subr.bf16.mxu1 %v8340_v51 }
 0x5f7   : > { %7579 = vmatpush3.bf16.msra.mxu1 %v8156_v5  ;;  %v8187_v5 = vld [vmem:[%s10200_s5 + $0x110] sm:$0xff]  }
 0x5f8   : > { %7580 = vmatprep.subr.bf16.mxu1 %v8340_v51 }
 0x5fb   : > { %7581 = vmatpush3.bf16.msra.mxu1 %v8158_v15  ;;  %v8184_v15 = vld [vmem:[%s10199_s4 + $0x28] sm:$0xff]  }
 0x5fc   : > { %7582 = vmatprep.subr.bf16.mxu1 %v8340_v51 }
 0x5ff   : > { %7583 = vmatpush3.bf16.msra.mxu1 %v8160_v61  ;;  %v8189_v61 = vld [vmem:[%s10200_s5 + $0x120] sm:$0xff]  }
 0x600   : > { %7600 = vmatprep.subr.bf16.mxu1 %v8340_v51 }
 0x6a5   : > { %v3953_v53 = vpop.f32.mrb[160].mxu1 }
 0x6a6   : > { %v7534_v57 = vpop.f32.mrb[161].mxu1 }
 0x6a7   : > { %v3956_v48 = vpop.f32.mrb[162].mxu1  ;;  %v8195_v57 = vld [vmem:[%s10200_s5 + $0x138] sm:$0xff]  }
 0x6a8   : > { %v3960_v25 = vpack.c.bf16 %v3956_v48, %v3953_v53  ;;  %v7535_v9 = vpop.f32.mrb[163].mxu1  ;;  %v8194_v53 = vld [vmem:[%s10200_s5 + $0x150] sm:$0xff]   ;;  %v8196_v48 = vld [vmem:[%s10200_s5 + $0x158] sm:$0xff]  }
 0x6a9   : > { %v8198_v9 = vld [vmem:[%s10200_s5 + $0x168] sm:$0xff]  }
 0x6aa   : > { %7585 = vmatmul.mubr.bf16.vlgmr.msra.gmra.mrb[168].mxu1 %v3960_v25  ;;  %v8197_v25 = vld [vmem:[%s10200_s5 + $0x160] sm:$0xff]  }
 0x6ab   : > { %7616 = vmatprep.mubr.msk.bf16.mxu1 %vm8341_vm0, %v8340_v51  ;;  %7601 = vmatpush3.bf16.msra.mxu1 %v8167_v19 }
 0x6ac   : > { %7602 = vmatprep.subr.bf16.mxu1 %v8340_v51 }
 0x6af   : > { %7603 = vmatpush3.bf16.msra.mxu1 %v8168_v11 }
 0x6b0   : > { %7604 = vmatprep.subr.bf16.mxu1 %v8340_v51 }
 0x6b3   : > { %7605 = vmatpush3.bf16.msra.mxu1 %v8169_v62 }
 0x6b4   : > { %7606 = vmatprep.subr.bf16.mxu1 %v8340_v51 }
 0x6b5   : > { %v4022_v59 = vpop.f32.mrb[164].mxu1 }
 0x6b6   : > { %v7546_v41 = vpop.f32.mrb[165].mxu1 }
 0x6b7   : > { %v4025_v0 = vpop.f32.mrb[166].mxu1  ;;  %7607 = vmatpush3.bf16.msra.mxu1 %v8170_v45  ;;  %v8200_v41 = vld [vmem:[%s10200_s5 + $0x178] sm:$0xff]  }
 0x6b8   : > { %v4029_v50 = vpack.c.bf16 %v4025_v0, %v4022_v59  ;;  %v7547_v23 = vpop.f32.mrb[167].mxu1  ;;  %7608 = vmatprep.subr.bf16.mxu1 %v8340_v51  ;;  %v8199_v59 = vld [vmem:[%s10200_s5 + $0x170] sm:$0xff]  }
 0x6ba   : > { %7565 = vmatmul.mubr.bf16.vlgmr.msra.gmra.mrb[64].mxu0 %v4029_v50 }
 0x6bb   : > { %7589 = vmatpush3.bf16.msra.mxu0 %v9694_v49  ;;  %7596 = vmatprep.mubr.msk.bf16.mxu0 %vm8341_vm0, %v8340_v51 }
 0x6bc   : > { %7590 = vmatprep.subr.bf16.mxu0 %v8340_v51  ;;  %7609 = vmatpush3.bf16.msra.mxu1 %v8171_v52 }
 0x6bd   : > { %7610 = vmatprep.subr.bf16.mxu1 %v8340_v51 }
 0x6bf   : > { %7591 = vmatpush3.bf16.msra.mxu0 %v9692_v46 }
 0x6c0   : > { %7592 = vmatprep.subr.bf16.mxu0 %v8340_v51  ;;  %7611 = vmatpush3.bf16.msra.mxu1 %v8173_v43 }
 0x6c1   : > { %7612 = vmatprep.subr.bf16.mxu1 %v8340_v51 }
 0x6c3   : > { %7593 = vmatpush3.bf16.msra.mxu0 %v9702_v38 }
 0x6c4   : > { %7594 = vmatprep.subr.bf16.mxu0 %v8340_v51  ;;  %7613 = vmatpush3.bf16.msra.mxu1 %v8175_v44 }
 0x6c5   : > { %7614 = vmatprep.subr.bf16.mxu1 %v8340_v51 }
 0x6c7   : > { %7595 = vmatpush3.bf16.msra.mxu0 %v9699_v10 }
 0x6c8   : > { %7620 = vmatprep.subr.bf16.mxu0 %v8340_v51  ;;  %7615 = vmatpush3.bf16.msra.mxu1 %v8177_v3 }
 0x6c9   : > { %7652 = vmatprep.subr.bf16.mxu1 %v8340_v51 }
 0x6ca   : > { %7597 = vmatmul.mubr.msk.bf16.vlgmr.msra.gmra.mrb[68].mxu0 %vm3915_vm1, %v8165_v26 }
 0x6cb   : > { %7621 = vmatpush3.bf16.msra.mxu0 %v9694_v49  ;;  %7628 = vmatprep.mubr.msk.bf16.mxu0 %vm8341_vm0, %v8340_v51 }
 0x6cc   : > { %7622 = vmatprep.subr.bf16.mxu0 %v8340_v51 }
 0x6cf   : > { %7623 = vmatpush3.bf16.msra.mxu0 %v9692_v46 }
 0x6d0   : > { %7624 = vmatprep.subr.bf16.mxu0 %v8340_v51 }
 0x6d3   : > { %7625 = vmatpush3.bf16.msra.mxu0 %v9702_v38 }
 0x6d4   : > { %7626 = vmatprep.subr.bf16.mxu0 %v8340_v51 }
 0x6d7   : > { %7627 = vmatpush3.bf16.msra.mxu0 %v9699_v10 }
 0x6d8   : > { %7632 = vmatprep.subr.bf16.mxu0 %v8340_v51 }
 0x6da   : > { %7629 = vmatmul.mubr.msk.bf16.vlgmr.msra.gmra.mrb[72].mxu0 %vm3915_vm1, %v8166_v7 }
 0x6db   : > { %7648 = vmatprep.mubr.msk.bf16.mxu0 %vm8341_vm0, %v8340_v51  ;;  %7633 = vmatpush3.bf16.msra.mxu0 %v8172_v42 }
 0x6dc   : > { %7634 = vmatprep.subr.bf16.mxu0 %v8340_v51 }
 0x6df   : > { %7635 = vmatpush3.bf16.msra.mxu0 %v8174_v63 }
 0x6e0   : > { %7636 = vmatprep.subr.bf16.mxu0 %v8340_v51 }
 0x6e3   : > { %7637 = vmatpush3.bf16.msra.mxu0 %v8176_v47 }
 0x6e4   : > { %7638 = vmatprep.subr.bf16.mxu0 %v8340_v51 }
 0x6e7   : > { %7639 = vmatpush3.bf16.msra.mxu0 %v8178_v4 }
 0x6e8   : > { %7640 = vmatprep.subr.bf16.mxu0 %v8340_v51 }
 0x6eb   : > { %7641 = vmatpush3.bf16.msra.mxu0 %v8179_v56 }
 0x6ec   : > { %7642 = vmatprep.subr.bf16.mxu0 %v8340_v51 }
 0x6ef   : > { %7643 = vmatpush3.bf16.msra.mxu0 %v8180_v12 }
 0x6f0   : > { %7644 = vmatprep.subr.bf16.mxu0 %v8340_v51 }
 0x6f3   : > { %7645 = vmatpush3.bf16.msra.mxu0 %v8181_v22  ;;  %v8201_v22 = vld [vmem:[%s10199_s4 + $0x30] sm:$0xff]  }
 0x6f4   : > { %7646 = vmatprep.subr.bf16.mxu0 %v8340_v51 }
 0x6f7   : > { %7647 = vmatpush3.bf16.msra.mxu0 %v8182_v28 }
 0x6f8   : > { %7684 = vmatprep.subr.bf16.mxu0 %v8340_v51 }
 0x77d   : > { %v4218_v6 = vpop.f32.mrb[168].mxu1 }
 0x77e   : > { %v7586_v31 = vpop.f32.mrb[169].mxu1 }
 0x77f   : > { %v4221_v32 = vpop.f32.mrb[170].mxu1  ;;  %v8203_v31 = vld [vmem:[%s10200_s5 + $0x180] sm:$0xff]  }
 0x780   : > { %v7587_v35 = vpop.f32.mrb[171].mxu1 }
 0x781   : > { %v8204_v35 = vld [vmem:[%s10200_s5 + $0x188] sm:$0xff]  }
 0x78d   : > { %v4129_v36 = vpop.f32.mrb[64].mxu0 }
 0x78e   : > { %v9876_v60 = vadd.f32 %v4218_v6, %v4129_v36  ;;  %v7566_v29 = vpop.f32.mrb[65].mxu0  ;;  %v8205_v36 = vld [vmem:[%s10200_s5 + $0x190] sm:$0xff]  }
 0x78f   : > { %v4132_v39 = vpop.f32.mrb[66].mxu0  ;;  %v8206_v29 = vld [vmem:[%s10200_s5 + $0x198] sm:$0xff]  }
 0x790   : > { %v9878_v40 = vadd.f32 %v4221_v32, %v4132_v39  ;;  %v7567_v55 = vpop.f32.mrb[67].mxu0  ;;  %v8207_v39 = vld [vmem:[%s10200_s5 + $0x1a0] sm:$0xff]  }
 0x791   : > { %v8209_v55 = vld [vmem:[%s10200_s5 + $0x1a8] sm:$0xff]  }
 0x79d   : > { %v4270_v16 = vpop.f32.mrb[68].mxu0 }
 0x79e   : > { %v7598_v58 = vpop.f32.mrb[69].mxu0 }
 0x79f   : > { %v4273_v8 = vpop.f32.mrb[70].mxu0  ;;  %v8211_v58 = vld [vmem:[%s10200_s5 + $0x1b0] sm:$0xff]  }
 0x7a0   : > { %v4277_v37 = vpack.c.bf16 %v4273_v8, %v4270_v16  ;;  %v7599_v14 = vpop.f32.mrb[71].mxu0  ;;  %v8210_v16 = vld [vmem:[%s10200_s5 + $0x1c8] sm:$0xff]   ;;  %v8212_v8 = vld [vmem:[%s10200_s5 + $0x1d0] sm:$0xff]  }
 0x7a1   : > { %v8214_v14 = vld [vmem:[%s10200_s5 + $0x1d8] sm:$0xff]  }
 0x7a2   : > { %7617 = vmatmul.mubr.bf16.vlgmr.msra.gmra.mrb[172].mxu1 %v4277_v37  ;;  %v8213_v37 = vld [vmem:[%s10200_s5 + $0x1b8] sm:$0xff]  }
 0x7a3   : > { %7653 = vmatpush3.bf16.msra.mxu1 %v9694_v49  ;;  %7660 = vmatprep.mubr.msk.bf16.mxu1 %vm8341_vm0, %v8340_v51 }
 0x7a4   : > { %7654 = vmatprep.subr.bf16.mxu1 %v8340_v51 }
 0x7a7   : > { %7655 = vmatpush3.bf16.msra.mxu1 %v9692_v46 }
 0x7a8   : > { %7656 = vmatprep.subr.bf16.mxu1 %v8340_v51 }
 0x7ab   : > { %7657 = vmatpush3.bf16.msra.mxu1 %v9702_v38 }
 0x7ac   : > { %7658 = vmatprep.subr.bf16.mxu1 %v8340_v51 }
 0x7ad   : > { %v4431_v1 = vpop.f32.mrb[72].mxu0 }
 0x7ae   : > { %v7630_v17 = vpop.f32.mrb[73].mxu0 }
 0x7af   : > { %7659 = vmatpush3.bf16.msra.mxu1 %v9699_v10  ;;  %v4434_v27 = vpop.f32.mrb[74].mxu0  ;;  %v8216_v17 = vld [vmem:[%s10200_s5 + $0x1e8] sm:$0xff]  }
 0x7b0   : > { %v4438_v2 = vpack.c.bf16 %v4434_v27, %v4431_v1  ;;  %7664 = vmatprep.subr.bf16.mxu1 %v8340_v51  ;;  %v7631_v13 = vpop.f32.mrb[75].mxu0  ;;  %v8215_v1 = vld [vmem:[%s10200_s5 + $0x1e0] sm:$0xff]   ;;  %v8218_v27 = vld [vmem:[%s10200_s5 + $0x1f8] sm:$0xff]  }
 0x7b2   : > { %7661 = vmatmul.mubr.msk.bf16.vlgmr.msra.gmra.mrb[176].mxu1 %vm3915_vm1, %v8183_v18  ;;  %7649 = vmatmul.mubr.bf16.vlgmr.msra.gmra.mrb[76].mxu0 %v4438_v2  ;;  %v8217_v18 = vld [vmem:[%s10200_s5 + $0x1f0] sm:$0xff]  }
 0x7b3   : > { %7685 = vmatpush3.bf16.msra.mxu0 %v9694_v49  ;;  %7692 = vmatprep.mubr.msk.bf16.mxu0 %vm8341_vm0, %v8340_v51 }
 0x7b4   : > { %7686 = vmatprep.subr.bf16.mxu0 %v8340_v51  ;;  %7665 = vmatpush3.bf16.msra.mxu1 %v8185_v33 }
 0x7b5   : > { %7666 = vmatprep.subr.bf16.mxu1 %v8340_v51  ;;  %7680 = vmatprep.mubr.msk.bf16.mxu1 %vm8341_vm0, %v8340_v51 }
 0x7b7   : > { %7687 = vmatpush3.bf16.msra.mxu0 %v9692_v46 }
 0x7b8   : > { %7688 = vmatprep.subr.bf16.mxu0 %v8340_v51  ;;  %7667 = vmatpush3.bf16.msra.mxu1 %v8186_v34 }
 0x7b9   : > { %7668 = vmatprep.subr.bf16.mxu1 %v8340_v51 }
 0x7bb   : > { %7689 = vmatpush3.bf16.msra.mxu0 %v9702_v38 }
 0x7bc   : > { %7690 = vmatprep.subr.bf16.mxu0 %v8340_v51  ;;  %7669 = vmatpush3.bf16.msra.mxu1 %v8187_v5 }
 0x7bd   : > { %7670 = vmatprep.subr.bf16.mxu1 %v8340_v51 }
 0x7bf   : > { %7691 = vmatpush3.bf16.msra.mxu0 %v9699_v10 }
 0x7c0   : > { %7696 = vmatprep.subr.bf16.mxu0 %v8340_v51  ;;  %7671 = vmatpush3.bf16.msra.mxu1 %v8188_v54 }
 0x7c1   : > { %7672 = vmatprep.subr.bf16.mxu1 %v8340_v51 }
 0x7c2   : > { %7693 = vmatmul.mubr.msk.bf16.vlgmr.msra.gmra.mrb[80].mxu0 %vm3915_vm1, %v8184_v15 }
 0x7c3   : > { %7712 = vmatprep.mubr.msk.bf16.mxu0 %vm8341_vm0, %v8340_v51  ;;  %7697 = vmatpush3.bf16.msra.mxu0 %v8190_v24 }
 0x7c4   : > { %7673 = vmatpush3.bf16.msra.mxu1 %v8189_v61  ;;  %7698 = vmatprep.subr.bf16.mxu0 %v8340_v51 }
 0x7c5   : > { %7674 = vmatprep.subr.bf16.mxu1 %v8340_v51 }
 0x7c7   : > { %7699 = vmatpush3.bf16.msra.mxu0 %v8192_v30 }
 0x7c8   : > { %7675 = vmatpush3.bf16.msra.mxu1 %v8191_v21  ;;  %7700 = vmatprep.subr.bf16.mxu0 %v8340_v51 }
 0x7c9   : > { %7676 = vmatprep.subr.bf16.mxu1 %v8340_v51 }
 0x7cb   : > { %7701 = vmatpush3.bf16.msra.mxu0 %v8194_v53 }
 0x7cc   : > { %7677 = vmatpush3.bf16.msra.mxu1 %v8193_v20  ;;  %7702 = vmatprep.subr.bf16.mxu0 %v8340_v51 }
 0x7cd   : > { %7678 = vmatprep.subr.bf16.mxu1 %v8340_v51 }
 0x7cf   : > { %7703 = vmatpush3.bf16.msra.mxu0 %v8196_v48 }
 0x7d0   : > { %7679 = vmatpush3.bf16.msra.mxu1 %v8195_v57  ;;  %7704 = vmatprep.subr.bf16.mxu0 %v8340_v51 }
 0x7d1   : > { %7716 = vmatprep.subr.bf16.mxu1 %v8340_v51 }
 0x7d3   : > { %7705 = vmatpush3.bf16.msra.mxu0 %v8197_v25 }
 0x7d4   : > { %7706 = vmatprep.subr.bf16.mxu0 %v8340_v51 }
 0x7d7   : > { %7707 = vmatpush3.bf16.msra.mxu0 %v8198_v9 }
 0x7d8   : > { %7708 = vmatprep.subr.bf16.mxu0 %v8340_v51 }
 0x7db   : > { %7709 = vmatpush3.bf16.msra.mxu0 %v8199_v59 }
 0x7dc   : > { %7710 = vmatprep.subr.bf16.mxu0 %v8340_v51 }
 0x7df   : > { %7711 = vmatpush3.bf16.msra.mxu0 %v8200_v41 }
 0x7e0   : > { %7748 = vmatprep.subr.bf16.mxu0 %v8340_v51 }
 0x875   : > { %v4377_v0 = vpop.f32.mrb[172].mxu1 }
 0x876   : > { %v4384_v50 = vadd.f32 %v4377_v0, %v9876_v60  ;;  %v7618_v23 = vpop.f32.mrb[173].mxu1  ;;  %v8202_v60 = vld [vmem:[%s10199_s4 + $0x38] sm:$0xff]   ;;  %v8219_v0 = vld [vmem:[%s10199_s4 + $0x40] sm:$0xff]  }
 0x877   : > { %v4380_v26 = vpop.f32.mrb[174].mxu1 }
 0x878   : > { %v4385_v7 = vadd.f32 %v4380_v26, %v9878_v40  ;;  %v7619_v19 = vpop.f32.mrb[175].mxu1  ;;  %v8208_v40 = vld [vmem:[%s10200_s5 + $0x1c0] sm:$0xff]   ;;  %v8223_v26 = vld [vmem:[%s10200_s5 + $0x218] sm:$0xff]  }
 0x879   : > { %v8225_v19 = vld [vmem:[%s10200_s5 + $0x228] sm:$0xff]  }
 0x885   : > { %v4592_v11 = vpop.f32.mrb[176].mxu1  ;;  %v4538_v62 = vpop.f32.mrb[76].mxu0 }
 0x886   : > { %v9978_v45 = vadd.f32 %v4538_v62, %v4384_v50  ;;  %v7662_v52 = vpop.f32.mrb[177].mxu1  ;;  %v7650_v42 = vpop.f32.mrb[77].mxu0  ;;  %v8220_v50 = vld [vmem:[%s10200_s5 + $0x200] sm:$0xff]   ;;  %v8227_v62 = vld [vmem:[%s10200_s5 + $0x238] sm:$0xff]  }
 0x887   : > { %v4595_v43 = vpop.f32.mrb[178].mxu1  ;;  %v4541_v63 = vpop.f32.mrb[78].mxu0 }
 0x888   : > { %v4599_v44 = vpack.c.bf16 %v4595_v43, %v4592_v11  ;;  %v9980_v47 = vadd.f32 %v4541_v63, %v4385_v7  ;;  %v7663_v3 = vpop.f32.mrb[179].mxu1  ;;  %v7651_v4 = vpop.f32.mrb[79].mxu0  ;;  %v8224_v7 = vld [vmem:[%s10200_s5 + $0x220] sm:$0xff]   ;;  %v8226_v11 = vld [vmem:[%s10200_s5 + $0x230] sm:$0xff]  }
 0x88a   : > { %7681 = vmatmul.mubr.bf16.vlgmr.msra.gmra.mrb[180].mxu1 %v4599_v44 }
 0x88b   : > { %7717 = vmatpush3.bf16.msra.mxu1 %v9694_v49  ;;  %7724 = vmatprep.mubr.msk.bf16.mxu1 %vm8341_vm0, %v8340_v51 }
 0x88c   : > { %7718 = vmatprep.subr.bf16.mxu1 %v8340_v51 }
 0x88f   : > { %7719 = vmatpush3.bf16.msra.mxu1 %v9692_v46 }
 0x890   : > { %7720 = vmatprep.subr.bf16.mxu1 %v8340_v51 }
 0x893   : > { %7721 = vmatpush3.bf16.msra.mxu1 %v9702_v38 }
 0x894   : > { %7722 = vmatprep.subr.bf16.mxu1 %v8340_v51 }
 0x895   : > { %v4753_v56 = vpop.f32.mrb[80].mxu0 }
 0x896   : > { %v7694_v12 = vpop.f32.mrb[81].mxu0 }
 0x897   : > { %7723 = vmatpush3.bf16.msra.mxu1 %v9699_v10  ;;  %v4756_v28 = vpop.f32.mrb[82].mxu0 }
 0x898   : > { %v4760_v6 = vpack.c.bf16 %v4756_v28, %v4753_v56  ;;  %7728 = vmatprep.subr.bf16.mxu1 %v8340_v51  ;;  %v7695_v32 = vpop.f32.mrb[83].mxu0 }
 0x89a   : > { %7725 = vmatmul.mubr.msk.bf16.vlgmr.msra.gmra.mrb[184].mxu1 %vm3915_vm1, %v8201_v22  ;;  %7713 = vmatmul.mubr.bf16.vlgmr.msra.gmra.mrb[84].mxu0 %v4760_v6 }
 0x89b   : > { %7749 = vmatpush3.bf16.msra.mxu0 %v9694_v49  ;;  %7756 = vmatprep.mubr.msk.bf16.mxu0 %vm8341_vm0, %v8340_v51 }
 0x89c   : > { %7750 = vmatprep.subr.bf16.mxu0 %v8340_v51  ;;  %7729 = vmatpush3.bf16.msra.mxu1 %v8203_v31 }
 0x89d   : > { %7730 = vmatprep.subr.bf16.mxu1 %v8340_v51  ;;  %7744 = vmatprep.mubr.msk.bf16.mxu1 %vm8341_vm0, %v8340_v51 }
 0x89f   : > { %7751 = vmatpush3.bf16.msra.mxu0 %v9692_v46 }
 0x8a0   : > { %7752 = vmatprep.subr.bf16.mxu0 %v8340_v51  ;;  %7731 = vmatpush3.bf16.msra.mxu1 %v8204_v35 }
 0x8a1   : > { %7732 = vmatprep.subr.bf16.mxu1 %v8340_v51 }
 0x8a3   : > { %7753 = vmatpush3.bf16.msra.mxu0 %v9702_v38 }
 0x8a4   : > { %7754 = vmatprep.subr.bf16.mxu0 %v8340_v51  ;;  %7733 = vmatpush3.bf16.msra.mxu1 %v8205_v36  ;;  %v8228_v36 = vld [vmem:[%s10202_s7] sm:$0xff]  }
 0x8a5   : > { %7734 = vmatprep.subr.bf16.mxu1 %v8340_v51 }
 0x8a7   : > { %7755 = vmatpush3.bf16.msra.mxu0 %v9699_v10 }
 0x8a8   : > { %7760 = vmatprep.subr.bf16.mxu0 %v8340_v51  ;;  %7735 = vmatpush3.bf16.msra.mxu1 %v8206_v29  ;;  %v8230_v29 = vld [vmem:[%s10202_s7 + $0x10] sm:$0xff]  }
 0x8a9   : > { %7736 = vmatprep.subr.bf16.mxu1 %v8340_v51 }
 0x8aa   : > { %7757 = vmatmul.mubr.msk.bf16.vlgmr.msra.gmra.mrb[88].mxu0 %vm3915_vm1, %v8202_v60  ;;  %v8229_v60 = vld [vmem:[%s10202_s7 + $0x8] sm:$0xff]  }
 0x8ab   : > { %7776 = vmatprep.mubr.msk.bf16.mxu0 %vm8341_vm0, %v8340_v51  ;;  %7761 = vmatpush3.bf16.msra.mxu0 %v8208_v40  ;;  %v8232_v40 = vld [vmem:[%s10202_s7 + $0x20] sm:$0xff]  }
 0x8ac   : > { %7737 = vmatpush3.bf16.msra.mxu1 %v8207_v39  ;;  %7762 = vmatprep.subr.bf16.mxu0 %v8340_v51  ;;  %v8231_v39 = vld [vmem:[%s10202_s7 + $0x18] sm:$0xff]  }
 0x8ad   : > { %7738 = vmatprep.subr.bf16.mxu1 %v8340_v51 }
 0x8af   : > { %7763 = vmatpush3.bf16.msra.mxu0 %v8210_v16  ;;  %v8234_v16 = vld [vmem:[%s10202_s7 + $0x30] sm:$0xff]  }
 0x8b0   : > { %7739 = vmatpush3.bf16.msra.mxu1 %v8209_v55  ;;  %7764 = vmatprep.subr.bf16.mxu0 %v8340_v51  ;;  %v8233_v55 = vld [vmem:[%s10202_s7 + $0x28] sm:$0xff]  }
 0x8b1   : > { %7740 = vmatprep.subr.bf16.mxu1 %v8340_v51 }
 0x8b3   : > { %7765 = vmatpush3.bf16.msra.mxu0 %v8212_v8 }
 0x8b4   : > { %7741 = vmatpush3.bf16.msra.mxu1 %v8211_v58  ;;  %7766 = vmatprep.subr.bf16.mxu0 %v8340_v51  ;;  %v8235_v58 = vld [vmem:[%s10202_s7 + $0x38] sm:$0xff]  }
 0x8b5   : > { %7742 = vmatprep.subr.bf16.mxu1 %v8340_v51 }
 0x8b7   : > { %7767 = vmatpush3.bf16.msra.mxu0 %v8214_v14 }
 0x8b8   : > { %7743 = vmatpush3.bf16.msra.mxu1 %v8213_v37  ;;  %7768 = vmatprep.subr.bf16.mxu0 %v8340_v51  ;;  %v6360_v37 = vld [vmem:[%s10201_s6] ss:$0 sm:$0xff] }
 0x8b9   : > { %7780 = vmatprep.subr.bf16.mxu1 %v8340_v51 }
 0x8bb   : > { %7769 = vmatpush3.bf16.msra.mxu0 %v8215_v1 }
 0x8bc   : > { %7770 = vmatprep.subr.bf16.mxu0 %v8340_v51 }
 0x8bf   : > { %7771 = vmatpush3.bf16.msra.mxu0 %v8216_v17 }
 0x8c0   : > { %7772 = vmatprep.subr.bf16.mxu0 %v8340_v51 }
 0x8c3   : > { %7773 = vmatpush3.bf16.msra.mxu0 %v8217_v18 }
 0x8c4   : > { %7774 = vmatprep.subr.bf16.mxu0 %v8340_v51 }
 0x8c7   : > { %7775 = vmatpush3.bf16.msra.mxu0 %v8218_v27 }
 0x8c8   : > { %7812 = vmatprep.subr.bf16.mxu0 %v8340_v51 }
 0x95d   : > { %v4699_v2 = vpop.f32.mrb[180].mxu1 }
 0x95e   : > { %v4706_v33 = vadd.f32 %v4699_v2, %v9978_v45  ;;  %v7682_v13 = vpop.f32.mrb[181].mxu1 }
 0x95f   : > { %v4702_v34 = vpop.f32.mrb[182].mxu1 }
 0x960   : > { %v4707_v5 = vadd.f32 %v4702_v34, %v9980_v47  ;;  %v7683_v15 = vpop.f32.mrb[183].mxu1 }
 0x96d   : > { %v4914_v54 = vpop.f32.mrb[184].mxu1  ;;  %v4860_v61 = vpop.f32.mrb[84].mxu0 }
 0x96e   : > { %v4867_v24 = vadd.f32 %v4860_v61, %v4706_v33  ;;  %v7726_v21 = vpop.f32.mrb[185].mxu1  ;;  %v7714_v30 = vpop.f32.mrb[85].mxu0 }
 0x96f   : > { %v4917_v20 = vpop.f32.mrb[186].mxu1  ;;  %v4863_v53 = vpop.f32.mrb[86].mxu0 }
 0x970   : > { %v4921_v57 = vpack.c.bf16 %v4917_v20, %v4914_v54  ;;  %v4868_v48 = vadd.f32 %v4863_v53, %v4707_v5  ;;  %v7727_v25 = vpop.f32.mrb[187].mxu1  ;;  %v7715_v9 = vpop.f32.mrb[87].mxu0  ;;  %v6363_v53 = vld [vmem:[%s10203_s8] ss:$0 sm:$0xff] }
 0x972   : > { %7745 = vmatmul.mubr.bf16.vlgmr.msra.gmra.mrb[188].mxu1 %v4921_v57 }
 0x973   : > { %7781 = vmatpush3.bf16.msra.mxu1 %v9694_v49  ;;  %7788 = vmatprep.mubr.msk.bf16.mxu1 %vm8341_vm0, %v8340_v51 }
 0x974   : > { %7782 = vmatprep.subr.bf16.mxu1 %v8340_v51 }
 0x977   : > { %7783 = vmatpush3.bf16.msra.mxu1 %v9692_v46 }
 0x978   : > { %7784 = vmatprep.subr.bf16.mxu1 %v8340_v51 }
 0x97b   : > { %7785 = vmatpush3.bf16.msra.mxu1 %v9702_v38  ;;  %v8221_v38 = vld [vmem:[%s10200_s5 + $0x208] sm:$0xff]  }
 0x97c   : > { %7786 = vmatprep.subr.bf16.mxu1 %v8340_v51 }
 0x97d   : > { %v5075_v59 = vpop.f32.mrb[88].mxu0 }
 0x97e   : > { %v7758_v41 = vpop.f32.mrb[89].mxu0 }
 0x97f   : > { %7787 = vmatpush3.bf16.msra.mxu1 %v9699_v10  ;;  %v5078_v49 = vpop.f32.mrb[90].mxu0  ;;  %v8222_v10 = vld [vmem:[%s10200_s5 + $0x210] sm:$0xff]  }
 0x980   : > { %v5082_v46 = vpack.c.bf16 %v5078_v49, %v5075_v59  ;;  %7792 = vmatprep.subr.bf16.mxu1 %v8340_v51  ;;  %v7759_v23 = vpop.f32.mrb[91].mxu0 }
 0x982   : > { %7789 = vmatmul.mubr.msk.bf16.vlgmr.msra.gmra.mrb[192].mxu1 %vm3915_vm1, %v8219_v0  ;;  %7777 = vmatmul.mubr.bf16.vlgmr.msra.gmra.mrb[92].mxu0 %v5082_v46 }
 0x983   : > { %7793 = vmatpush3.bf16.msra.mxu1 %v8220_v50  ;;  %7808 = vmatprep.mubr.msk.bf16.mxu1 %vm8341_vm0, %v8340_v51 }
 0x984   : > { %7794 = vmatprep.subr.bf16.mxu1 %v8340_v51  ;;  %7828 = vmatprep.mubr.msk.bf16.mxu0 %vm8341_vm0, %v8340_v51 }
 0x985   : > { %7813 = vmatpush3.bf16.msra.mxu0 %v8228_v36 }
 0x986   : > { %7814 = vmatprep.subr.bf16.mxu0 %v8340_v51 }
 0x987   : > { %7795 = vmatpush3.bf16.msra.mxu1 %v8221_v38 }
 0x988   : > { %7796 = vmatprep.subr.bf16.mxu1 %v8340_v51 }
 0x989   : > { %7815 = vmatpush3.bf16.msra.mxu0 %v8229_v60 }
 0x98a   : > { %7816 = vmatprep.subr.bf16.mxu0 %v8340_v51 }
 0x98b   : > { %7797 = vmatpush3.bf16.msra.mxu1 %v8222_v10  ;;  %v5526_v10 = vlaneseq }
 0x98c   : > { %7798 = vmatprep.subr.bf16.mxu1 %v8340_v51 }
 0x98d   : > { %7817 = vmatpush3.bf16.msra.mxu0 %v8230_v29 }
 0x98e   : > { %7818 = vmatprep.subr.bf16.mxu0 %v8340_v51 }
 0x98f   : > { %7799 = vmatpush3.bf16.msra.mxu1 %v8223_v26  ;;  %v5500_v26 = vld [vmem:[%s10206_s11] sm:$0x1] }
 0x990   : > { %7800 = vmatprep.subr.bf16.mxu1 %v8340_v51 }
 0x991   : > { %7819 = vmatpush3.bf16.msra.mxu0 %v8231_v39 }
 0x992   : > { %7820 = vmatprep.subr.bf16.mxu0 %v8340_v51 }
 0x993   : > { %7801 = vmatpush3.bf16.msra.mxu1 %v8224_v7  ;;  %v5527_v7 = vshrl.u32 %v5526_v10, 7 }
 0x994   : > { %7802 = vmatprep.subr.bf16.mxu1 %v8340_v51 }
 0x995   : > { %7821 = vmatpush3.bf16.msra.mxu0 %v8232_v40 }
 0x996   : > { %7822 = vmatprep.subr.bf16.mxu0 %v8340_v51 }
 0x997   : > { %7803 = vmatpush3.bf16.msra.mxu1 %v8225_v19  ;;  %v5543_v19 = vsub.f32 1.0, %v5500_v26 }
 0x998   : > { %7804 = vmatprep.subr.bf16.mxu1 %v8340_v51 }
 0x999   : > { %7823 = vmatpush3.bf16.msra.mxu0 %v8233_v55 }
 0x99a   : > { %7824 = vmatprep.subr.bf16.mxu0 %v8340_v51 }
 0x99b   : > { %7805 = vmatpush3.bf16.msra.mxu1 %v8226_v11  ;;  %v5501_v11 = vld [vmem:[%s10207_s12] sm:$0x1] }
 0x99c   : > { %7806 = vmatprep.subr.bf16.mxu1 %v8340_v51 }
 0x99d   : > { %7825 = vmatpush3.bf16.msra.mxu0 %v8234_v16 }
 0x99e   : > { %7826 = vmatprep.subr.bf16.mxu0 %v8340_v51 }
 0x99f   : > { %7807 = vmatpush3.bf16.msra.mxu1 %v8227_v62 }
 0x9a1   : > { %7827 = vmatpush3.bf16.msra.mxu0 %v8235_v58 }
 0xa45   : > { %v5021_v45 = vpop.f32.mrb[188].mxu1 }
 0xa46   : > { %v5028_v52 = vadd.f32 %v5021_v45, %v4867_v24  ;;  %v7746_v42 = vpop.f32.mrb[189].mxu1 }
 0xa47   : > { %v5024_v43 = vpop.f32.mrb[190].mxu1 }
 0xa48   : > { %v5029_v63 = vadd.f32 %v5024_v43, %v4868_v48  ;;  %v7747_v44 = vpop.f32.mrb[191].mxu1  ;;  %v5506_v43 = vld [vmem:[%s10204_s9] sm:$0xff] }
 0xa49   : > { %v5528_v44 = vsub.s32 0, %v5527_v7 }
 0xa55   : > { %v5236_v47 = vpop.f32.mrb[192].mxu1  ;;  %v5182_v3 = vpop.f32.mrb[92].mxu0 }
 0xa56   : > { %v5189_v4 = vadd.f32 %v5182_v3, %v5028_v52  ;;  %v7790_v56 = vpop.f32.mrb[193].mxu1  ;;  %v7778_v12 = vpop.f32.mrb[93].mxu0 }
 0xa57   : > { %v5239_v22 = vpop.f32.mrb[194].mxu1  ;;  %v5185_v28 = vpop.f32.mrb[94].mxu0 }
 0xa58   : > { %v5243_v6 = vpack.c.bf16 %v5239_v22, %v5236_v47  ;;  %v5190_v31 = vadd.f32 %v5185_v28, %v5029_v63  ;;  %v7791_v32 = vpop.f32.mrb[195].mxu1  ;;  %v7779_v35 = vpop.f32.mrb[95].mxu0  ;;  %v6376_v63 = vld [vmem:[%s10205_s10] ss:$0 sm:$0xff]  ;;  %v5544_v47 = vsub.f32 %v5543_v19, %v5501_v11  ;;  %v5529_v22 = vrot.slane %v5500_v26, %v5528_v44 }
 0xa59   : > { %v5537_v28 = vrot.slane %v5501_v11, %v5528_v44 }
 0xa5a   : > { %7809 = vmatmul.mubr.bf16.vlgmr.msra.gmra.mrb[196].mxu1 %v5243_v6  ;;  %v5507_v6 = vld [vmem:[%s10204_s9 + $0x8] sm:$0xff]  ;;  %v5549_v29 = vrot.slane %v5544_v47, %v5528_v44 }
 0xb2d   : > { %v5343_v8 = vpop.f32.mrb[196].mxu1 }
 0xb2e   : > { %v5350_v14 = vadd.f32 %v5343_v8, %v5189_v4  ;;  %v7810_v1 = vpop.f32.mrb[197].mxu1 }
 0xb2f   : > { %v5346_v17 = vpop.f32.mrb[198].mxu1 }
 0xb30   : > { %v5359_v18 = vadd.f32 %v6360_v37, %v5350_v14  ;;  %v5351_v27 = vadd.f32 %v5346_v17, %v5190_v31  ;;  %v7811_v2 = vpop.f32.mrb[199].mxu1 }
 0xb32   : > { %v6361_v33 = vmul.f32 -1.442695, %v5359_v18  ;;  %v5360_v13 = vadd.f32 %v6360_v37, %v5351_v27 }
 0xb34   : > { %8268 = vpow2.f32 %v6361_v33  ;;  %v6362_v51 = vmul.f32 -1.442695, %v5360_v13 }
 0xb36   : > { %8270 = vpow2.f32 %v6362_v51 }
 0xb3e   : > { %v8269_v34 = vpop.eup %8268 }
 0xb3f   : > { %v5367_v5 = vadd.f32 1.0, %v8269_v34 }
 0xb40   : > { %v8271_v15 = vpop.eup %8270 }
 0xb41   : > { %8272 = vrcp.f32 %v5367_v5  ;;  %v5368_v54 = vadd.f32 1.0, %v8271_v15 }
 0xb43   : > { %8274 = vrcp.f32 %v5368_v54 }
 0xb4b   : > { %v8273_v61 = vpop.eup %8272 }
 0xb4c   : > { %v5373_v21 = vmul.f32 %v8273_v61, %v5359_v18 }
 0xb4d   : > { %v8275_v24 = vpop.eup %8274 }
 0xb4e   : > { %v5374_v30 = vmul.f32 %v8275_v24, %v5360_v13 }
 0xb50   : > { %v5375_v20 = vpack.c.bf16 %v5374_v30, %v5373_v21 }
 0xb52   : > { %7829 = vmatmul.mubr.bf16.vlgmr.msra.gmra.mrb[96].mxu0 %v5375_v20 }
 0xc25   : > { %v5481_v57 = vpop.f32.mrb[96].mxu0 }
 0xc26   : > { %v5482_v48 = vadd.f32 %v6363_v53, %v5481_v57  ;;  %v7830_v25 = vpop.f32.mrb[97].mxu0 }
 0xc27   : > { %v5484_v9 = vpop.f32.mrb[98].mxu0 }
 0xc28   : > { %v6372_v59 = vmul.f32 -1.442695, %v5482_v48  ;;  %v5485_v41 = vadd.f32 %v6363_v53, %v5484_v9  ;;  %v7831_v0 = vpop.f32.mrb[99].mxu0 }
 0xc2a   : > { %8276 = vpow2.f32 %v6372_v59  ;;  %v6373_v49 = vmul.f32 -1.442695, %v5485_v41 }
 0xc2c   : > { %8278 = vpow2.f32 %v6373_v49 }
 0xc34   : > { %v8277_v50 = vpop.eup %8276 }
 0xc35   : > { %v5494_v46 = vadd.f32 1.0, %v8277_v50 }
 0xc36   : > { %v8279_v23 = vpop.eup %8278 }
 0xc37   : > { %8280 = vrcp.f32 %v5494_v46  ;;  %v5495_v38 = vadd.f32 1.0, %v8279_v23 }
 0xc39   : > { %8282 = vrcp.f32 %v5495_v38 }
 0xc41   : > { %v8281_v62 = vpop.eup %8280 }
 0xc42   : > { %v5502_v45 = vmul.f32 2.0, %v8281_v62  ;;  %v5512_v52 = vmul.f32 %v8281_v62, %v8281_v62  ;;  %5555 = vst [vmem:[%s475_s16] sm:$0xff] %v8281_v62  ;;  %v5551_v37 = vmul.f32 %v8281_v62, %v5549_v29 }
 0xc43   : > { %v8283_v42 = vpop.eup %8282 }
 0xc44   : > { %v6374_v3 = vadd.f32 -0.5, %v5502_v45  ;;  %v5514_v4 = vmul.f32 4.0, %v5512_v52  ;;  %v5503_v56 = vmul.f32 2.0, %v8283_v42  ;;  %v5513_v12 = vmul.f32 %v8283_v42, %v8283_v42  ;;  %5556 = vst [vmem:[%s475_s16 + $0x8] sm:$0xff] %v8283_v42 }
 0xc45   : > { %v5552_v27 = vmul.f32 %v8283_v42, %v5549_v29 }
 0xc46   : > { %v5508_v31 = vadd.f32 %v6374_v3, %v5506_v43  ;;  %v5523_v32 = vmul.f32 %v6376_v63, %v5514_v4  ;;  %v6375_v35 = vadd.f32 -0.5, %v5503_v56  ;;  %v5515_v36 = vmul.f32 4.0, %v5513_v12 }
 0xc48   : > { %v5510_v60 = vmul.f32 4.0, %v5508_v31  ;;  %v5509_v39 = vadd.f32 %v6375_v35, %v5507_v6  ;;  %v5524_v40 = vmul.f32 %v6376_v63, %v5515_v36  ;;  %v5539_v16 = vmul.f32 %v5537_v28, %v5523_v32 }
 0xc4a   : > { %v5531_v55 = vmul.f32 %v5529_v22, %v5510_v60  ;;  %v5511_v58 = vmul.f32 4.0, %v5509_v39  ;;  %v5540_v1 = vmul.f32 %v5537_v28, %v5524_v40 }
 0xc4c   : > { %v5541_v8 = vadd.f32 %v5539_v16, %v5531_v55  ;;  %v5532_v14 = vmul.f32 %v5529_v22, %v5511_v58 }
 0xc4e   : > { %v5553_v17 = vadd.f32 %v5551_v37, %v5541_v8  ;;  %v5542_v18 = vadd.f32 %v5540_v1, %v5532_v14 }
 0xc50   : > { %5557 = vst [vmem:[%s480_s28] sm:$0xff] %v5553_v17  ;;  %v5554_v2 = vadd.f32 %v5552_v27, %v5542_v18 }
 0xc52   : > { %5558 = vst [vmem:[%s480_s28 + $0x8] sm:$0xff] %v5554_v2 }
 0xc53 PF: > { %s25_s29 = sadd.s32 1, %s8338_s29  }
 0xc54   : > { %p22_p4 = scmp.ge.s32.totalorder %s25_s29, 4  }
 0xc56   :  { %24 = sbr.rel (!%p22_p4) target bundleno = 1 (0x1), region = 146 }

</bundles_post_ra>
